<compile_context>
chip_gen: v5e
topology: v5e:2x2
jax: 0.10.0
libtpu: 0.0.40
codegen_flags: <defaults>
</compile_context>

<pallas_src>
import jax
import jax.numpy as jnp
from jax import lax
from jax.experimental import pallas as pl
from jax.experimental.pallas import tpu as pltpu

# ---- small demo dimensions (module implies (batch, n_timesteps, n_vars)) ----
B = 4            # logical batch
T = 8            # n_timesteps (original script uses 100; small here)
V = 4            # n_vars
H = 32           # latent_dim
H2 = 2 * H       # 64
G = 4 * H2       # 256 = fused gate width (both directions, gates [i|f|g|o])
BP = ((B + 7) // 8) * 8   # batch padded to sublane multiple (8)
LN_EPS = 1e-5    # nn.LayerNorm default


def bilstm_ae_kernel(
    x_pair_ref,                               # (T, BP, 2V) bf16: [x[t], x[T-1-t]]
    w_enc_in, b_enc,                          # (2V, G) bf16, (1, G) f32
    w_enc_hh,                                 # (2H, G) bf16 (block structured)
    w_b, b_b,                                 # bottleneck (2H, H) bf16, (1, H) f32
    w_dec_in, b_dec,                          # (H, G) bf16, (1, G) f32
    w_dec_hh,                                 # (2H, G) bf16 (block structured)
    gamma, beta,                              # LayerNorm(2H) params, (1, 2H) f32
    w_h, b_h,                                 # hidden Linear (2H, 2H) bf16, (1, 2H) f32
    w_o, b_o,                                 # output Linear (2H, V) bf16, (1, V) f32
    out_ref,                                  # (T, BP, V) f32
    z_ref,                                    # (BP, H) f32
    xp_enc_ref,                               # scratch (T, BP, G) f32
    dec_fwd_ref,                              # scratch (T, BP, H) f32
    dec_bwd_ref,                              # scratch (T, BP, H) f32
):
    f32 = jnp.float32
    bf16 = jnp.bfloat16

    # Hoist weight loads out of the recurrent loops (closed over below).
    w_enc_hh_v = w_enc_hh[...]
    w_dec_hh_v = w_dec_hh[...]

    # ---- encoder input projection for all timesteps + both directions:
    # one (T*BP, 2V) x (2V, G) MXU pass, bias folded in here. ----
    xp = jnp.dot(x_pair_ref[...].reshape(T * BP, 2 * V), w_enc_in[...],
                 preferred_element_type=f32) + b_enc[...]
    xp_enc_ref[...] = xp.reshape(T, BP, G)

    def lstm_step(xg, h, c, whh):
        """Fused bidirectional LSTM cell. h, c: (BP, 2H) = [fwd | rev]."""
        gates = xg + jnp.dot(h.astype(bf16), whh, preferred_element_type=f32)
        i_g = jax.nn.sigmoid(gates[:, 0 * H2:1 * H2])
        f_g = jax.nn.sigmoid(gates[:, 1 * H2:2 * H2])
        g_g = jnp.tanh(gates[:, 2 * H2:3 * H2])
        o_g = jax.nn.sigmoid(gates[:, 3 * H2:4 * H2])
        c_new = f_g * c + i_g * g_g
        h_new = o_g * jnp.tanh(c_new)
        return h_new, c_new

    zeros2 = jnp.zeros((BP, H2), f32)

    # ---------------- encoder: fused fwd + bwd recurrence ----------------
    def enc_body(s, carry):
        h, c = carry
        return lstm_step(xp_enc_ref[s], h, c, w_enc_hh_v)

    h_enc, _ = lax.fori_loop(0, T, enc_body, (zeros2, zeros2), unroll=True)

    # last = cat(enc_out[:, -1, :H], enc_out[:, 0, H:]) == fused final h.
    z = jnp.dot(h_enc.astype(bf16), w_b[...],
                preferred_element_type=f32) + b_b[...]
    z_ref[...] = z

    # Decoder input is z repeated over time -> constant input projection
    # (both directions), computed once, bias folded in.
    zproj = jnp.dot(z.astype(bf16), w_dec_in[...],
                    preferred_element_type=f32) + b_dec[...]

    # ---------------- decoder: fused fwd + bwd recurrence ----------------
    def dec_body(s, carry):
        h, c = carry
        h, c = lstm_step(zproj, h, c, w_dec_hh_v)
        dec_fwd_ref[s] = h[:, :H]           # fwd hidden at time s
        dec_bwd_ref[T - 1 - s] = h[:, H:]   # bwd hidden corresponds to time T-1-s
        return (h, c)

    lax.fori_loop(0, T, dec_body, (zeros2, zeros2), unroll=True)

    # -------- head (LayerNorm + tanh(Linear) + Linear) over all timesteps --------
    combined = jnp.concatenate([dec_fwd_ref[...], dec_bwd_ref[...]], axis=-1)
    combined = combined.reshape(T * BP, H2)
    mu = jnp.mean(combined, axis=1, keepdims=True)
    var = jnp.mean(jnp.square(combined - mu), axis=1, keepdims=True)
    normed = (combined - mu) * lax.rsqrt(var + LN_EPS)
    normed = normed * gamma[...] + beta[...]
    hid = jnp.tanh(jnp.dot(normed.astype(bf16), w_h[...],
                           preferred_element_type=f32) + b_h[...])
    # TODO(synk): nn.Dropout(p=0.2) is identity in eval/inference mode; omitted.
    out = jnp.dot(hid.astype(bf16), w_o[...],
                  preferred_element_type=f32) + b_o[...]
    out_ref[...] = out.reshape(T, BP, V)


def bilstm_autoencoder(x_btv, fused_params):
    """x_btv: (B, T, V) float32.  Returns (out (B, T, V), z (B, H))."""
    # Pad batch to a sublane multiple so vregs are fully occupied.
    x_p = jnp.zeros((BP, T, V), x_btv.dtype).at[:B].set(x_btv)
    x_tbv = jnp.transpose(x_p, (1, 0, 2))                        # (T, BP, V)
    # Layout plumbing: pair x[t] with x[T-1-t] so one matmul produces both
    # directions' input projections in the fused gate layout.
    x_pair = jnp.concatenate([x_tbv, x_tbv[::-1]], axis=-1).astype(jnp.bfloat16)

    vmem = pltpu.MemorySpace.VMEM
    out_tbv, z = pl.pallas_call(
        bilstm_ae_kernel,
        out_shape=(
            jax.ShapeDtypeStruct((T, BP, V), jnp.float32),
            jax.ShapeDtypeStruct((BP, H), jnp.float32),
        ),
        in_specs=[pl.BlockSpec(memory_space=vmem)] * 15,
        out_specs=(pl.BlockSpec(memory_space=vmem),
                   pl.BlockSpec(memory_space=vmem)),
        scratch_shapes=[
            pltpu.VMEM((T, BP, G), jnp.float32),   # encoder input projections
            pltpu.VMEM((T, BP, H), jnp.float32),   # decoder fwd states
            pltpu.VMEM((T, BP, H), jnp.float32),   # decoder bwd states
        ],
    )(x_pair, *fused_params)

    out = jnp.transpose(out_tbv, (1, 0, 2))[:B]
    return out, z[:B]


def init_params(key):
    """PyTorch-layout params mirroring init_weights: xavier_uniform W, zero b."""
    keys = jax.random.split(key, 12)
    it = iter(keys)

    def xav(shape):  # shape in PyTorch (out, in) convention
        fan_out, fan_in = shape
        bound = (6.0 / (fan_in + fan_out)) ** 0.5
        return jax.random.uniform(next(it), shape, jnp.float32, -bound, bound)

    p = {
        "e_wih_f": xav((4 * H, V)), "e_whh_f": xav((4 * H, H)),
        "e_wih_r": xav((4 * H, V)), "e_whh_r": xav((4 * H, H)),
        "wb": xav((H, H2)),
        "d_wih_f": xav((4 * H, H)), "d_whh_f": xav((4 * H, H)),
        "d_wih_r": xav((4 * H, H)), "d_whh_r": xav((4 * H, H)),
        "wh": xav((H2, H2)), "wo": xav((V, H2)),
    }
    return p


def fuse_params(p):
    """Build the fused / interleaved kernel-layout weights.

    Fused gate layout (width G = 8H): [i | f | g | o], each block 2H wide with
    [forward H | reverse H] halves — matching the fused (B, 2H) h/c state.
    LSTM biases are zero here (pre-summed bias_ih + bias_hh contract).
    """
    bf16 = jnp.bfloat16

    def fuse_hh(w_f, w_r):                      # (4H, H) each -> (2H, G)
        out = jnp.zeros((H2, G), jnp.float32)
        for gi in range(4):
            out = out.at[:H, gi * H2:gi * H2 + H].set(w_f[gi * H:(gi + 1) * H, :].T)
            out = out.at[H:, gi * H2 + H:(gi + 1) * H2].set(w_r[gi * H:(gi + 1) * H, :].T)
        return out

    def fuse_ih_pair(w_f, w_r):                 # (4H, V) each -> (2V, G)
        vin = w_f.shape[1]
        out = jnp.zeros((2 * vin, G), jnp.float32)
        for gi in range(4):
            out = out.at[:vin, gi * H2:gi * H2 + H].set(w_f[gi * H:(gi + 1) * H, :].T)
            out = out.at[vin:, gi * H2 + H:(gi + 1) * H2].set(w_r[gi * H:(gi + 1) * H, :].T)
        return out

    def fuse_ih_shared(w_f, w_r):               # (4H, H) each -> (H, G)
        kin = w_f.shape[1]
        out = jnp.zeros((kin, G), jnp.float32)
        for gi in range(4):
            out = out.at[:, gi * H2:gi * H2 + H].set(w_f[gi * H:(gi + 1) * H, :].T)
            out = out.at[:, gi * H2 + H:(gi + 1) * H2].set(w_r[gi * H:(gi + 1) * H, :].T)
        return out

    w_enc_in = fuse_ih_pair(p["e_wih_f"], p["e_wih_r"]).astype(bf16)
    b_enc = jnp.zeros((1, G), jnp.float32)
    w_enc_hh = fuse_hh(p["e_whh_f"], p["e_whh_r"]).astype(bf16)
    w_b = p["wb"].T.astype(bf16)
    b_b = jnp.zeros((1, H), jnp.float32)
    w_dec_in = fuse_ih_shared(p["d_wih_f"], p["d_wih_r"]).astype(bf16)
    b_dec = jnp.zeros((1, G), jnp.float32)
    w_dec_hh = fuse_hh(p["d_whh_f"], p["d_whh_r"]).astype(bf16)
    gamma = jnp.ones((1, H2), jnp.float32)
    beta = jnp.zeros((1, H2), jnp.float32)
    w_h = p["wh"].T.astype(bf16)
    b_h = jnp.zeros((1, H2), jnp.float32)
    w_o = p["wo"].T.astype(bf16)
    b_o = jnp.zeros((1, V), jnp.float32)

    return (w_enc_in, b_enc, w_enc_hh, w_b, b_b, w_dec_in, b_dec, w_dec_hh,
            gamma, beta, w_h, b_h, w_o, b_o)


if __name__ == "__main__":
    root = jax.random.PRNGKey(0)
    pkey, xkey = jax.random.split(root)
    fused = fuse_params(init_params(pkey))
    x = jax.random.normal(xkey, (B, T, V), jnp.float32)

    out, z = jax.jit(bilstm_autoencoder)(x, fused)
    jax.block_until_ready((out, z))

    assert out.shape == (B, T, V) and out.dtype == jnp.float32
    assert z.shape == (B, H) and z.dtype == jnp.float32
    assert bool(jnp.all(jnp.isfinite(out))) and bool(jnp.all(jnp.isfinite(z)))
    print("KERNEL_OK")
</pallas_src>

<mosaic_0001>
module attributes {stable_mosaic.version = 11 : i64} {
  func.func @bilstm_ae_kernel(%arg0: memref<8x8x8xbf16, #tpu.memory_space<vmem>>, %arg1: memref<8x256xbf16, #tpu.memory_space<vmem>>, %arg2: memref<1x256xf32, #tpu.memory_space<vmem>>, %arg3: memref<64x256xbf16, #tpu.memory_space<vmem>>, %arg4: memref<64x32xbf16, #tpu.memory_space<vmem>>, %arg5: memref<1x32xf32, #tpu.memory_space<vmem>>, %arg6: memref<32x256xbf16, #tpu.memory_space<vmem>>, %arg7: memref<1x256xf32, #tpu.memory_space<vmem>>, %arg8: memref<64x256xbf16, #tpu.memory_space<vmem>>, %arg9: memref<1x64xf32, #tpu.memory_space<vmem>>, %arg10: memref<1x64xf32, #tpu.memory_space<vmem>>, %arg11: memref<64x64xbf16, #tpu.memory_space<vmem>>, %arg12: memref<1x64xf32, #tpu.memory_space<vmem>>, %arg13: memref<64x4xbf16, #tpu.memory_space<vmem>>, %arg14: memref<1x4xf32, #tpu.memory_space<vmem>>, %arg15: memref<8x8x4xf32, #tpu.memory_space<vmem>>, %arg16: memref<8x32xf32, #tpu.memory_space<vmem>>, %arg17: memref<8x8x256xf32, #tpu.memory_space<vmem>>, %arg18: memref<8x8x32xf32, #tpu.memory_space<vmem>>, %arg19: memref<8x8x32xf32, #tpu.memory_space<vmem>>) attributes {dimension_semantics = [], scalar_prefetch = 0 : i64, scratch_operands = 3 : i64, tpu.core_type = #tpu.core_type<tc>} {
    %c0 = arith.constant 0 : index
    %c0_0 = arith.constant 0 : index
    %0 = vector.load %arg3[%c0, %c0_0] : memref<64x256xbf16, #tpu.memory_space<vmem>>, vector<64x256xbf16>
    %c0_1 = arith.constant 0 : index
    %c0_2 = arith.constant 0 : index
    %1 = vector.load %arg8[%c0_1, %c0_2] : memref<64x256xbf16, #tpu.memory_space<vmem>>, vector<64x256xbf16>
    %c0_3 = arith.constant 0 : index
    %c0_4 = arith.constant 0 : index
    %c0_5 = arith.constant 0 : index
    %2 = vector.load %arg0[%c0_3, %c0_4, %c0_5] : memref<8x8x8xbf16, #tpu.memory_space<vmem>>, vector<8x8x8xbf16>
    %3 = vector.shape_cast %2 : vector<8x8x8xbf16> to vector<64x8xbf16>
    %c0_6 = arith.constant 0 : index
    %c0_7 = arith.constant 0 : index
    %4 = vector.load %arg1[%c0_6, %c0_7] : memref<8x256xbf16, #tpu.memory_space<vmem>>, vector<8x256xbf16>
    %cst = arith.constant dense<0.000000e+00> : vector<64x256xf32>
    %5 = tpu.matmul %3, %4, %cst {dimension_numbers = #tpu.dot_dimension_numbers<[1], [0], [0], [1], [0, 0, 1, 1], [], []>} : vector<64x8xbf16>, vector<8x256xbf16>, vector<64x256xf32> -> vector<64x256xf32>
    %c0_8 = arith.constant 0 : index
    %c0_9 = arith.constant 0 : index
    %6 = vector.load %arg2[%c0_8, %c0_9] : memref<1x256xf32, #tpu.memory_space<vmem>>, vector<1x256xf32>
    %7 = vector.broadcast %6 : vector<1x256xf32> to vector<64x256xf32>
    %8 = arith.addf %5, %7 : vector<64x256xf32>
    %9 = vector.shape_cast %8 : vector<64x256xf32> to vector<8x8x256xf32>
    %c0_10 = arith.constant 0 : index
    %c0_11 = arith.constant 0 : index
    %c0_12 = arith.constant 0 : index
    %10 = vector.load %arg17[%c0_10, %c0_11, %c0_12] : memref<8x8x256xf32, #tpu.memory_space<vmem>>, vector<8x8x256xf32>
    tpu.vector_store %arg17[%c0_10, %c0_11, %c0_12], %9 {strides = array<i32>} : memref<8x8x256xf32, #tpu.memory_space<vmem>>, vector<8x8x256xf32>,
    %cst_13 = arith.constant 0.000000e+00 : f32
    %11 = vector.broadcast %cst_13 : f32 to vector<8x64xf32>
    %c0_i32 = arith.constant 0 : i32
    %12 = arith.index_cast %c0_i32 : i32 to index
    %c0_14 = arith.constant 0 : index
    %c0_15 = arith.constant 0 : index
    %13 = vector.load %arg17[%12, %c0_14, %c0_15] : memref<8x8x256xf32, #tpu.memory_space<vmem>>, vector<1x8x256xf32>
    %14 = vector.shape_cast %13 : vector<1x8x256xf32> to vector<8x256xf32>
    %15 = arith.truncf %11 : vector<8x64xf32> to vector<8x64xbf16>
    %cst_16 = arith.constant dense<0.000000e+00> : vector<8x256xf32>
    %16 = tpu.matmul %15, %0, %cst_16 {dimension_numbers = #tpu.dot_dimension_numbers<[1], [0], [0], [1], [0, 0, 1, 1], [], []>} : vector<8x64xbf16>, vector<64x256xbf16>, vector<8x256xf32> -> vector<8x256xf32>
    %17 = arith.addf %14, %16 : vector<8x256xf32>
    %18 = vector.extract_strided_slice %17 {offsets = [0, 0], sizes = [8, 64], strides = [1, 1]} : vector<8x256xf32> to vector<8x64xf32>
    %19 = arith.negf %18 : vector<8x64xf32>
    %20 = math.exp %19 : vector<8x64xf32>
    %cst_17 = arith.constant 1.000000e+00 : f32
    %21 = vector.broadcast %cst_17 : f32 to vector<8x64xf32>
    %22 = arith.addf %21, %20 : vector<8x64xf32>
    %23 = arith.divf %21, %22 : vector<8x64xf32>
    %24 = vector.extract_strided_slice %17 {offsets = [0, 64], sizes = [8, 64], strides = [1, 1]} : vector<8x256xf32> to vector<8x64xf32>
    %25 = arith.negf %24 : vector<8x64xf32>
    %26 = math.exp %25 : vector<8x64xf32>
    %cst_18 = arith.constant 1.000000e+00 : f32
    %27 = vector.broadcast %cst_18 : f32 to vector<8x64xf32>
    %28 = arith.addf %27, %26 : vector<8x64xf32>
    %29 = arith.divf %27, %28 : vector<8x64xf32>
    %30 = vector.extract_strided_slice %17 {offsets = [0, 128], sizes = [8, 64], strides = [1, 1]} : vector<8x256xf32> to vector<8x64xf32>
    %31 = math.tanh %30 : vector<8x64xf32>
    %32 = vector.extract_strided_slice %17 {offsets = [0, 192], sizes = [8, 64], strides = [1, 1]} : vector<8x256xf32> to vector<8x64xf32>
    %33 = arith.negf %32 : vector<8x64xf32>
    %34 = math.exp %33 : vector<8x64xf32>
    %cst_19 = arith.constant 1.000000e+00 : f32
    %35 = vector.broadcast %cst_19 : f32 to vector<8x64xf32>
    %36 = arith.addf %35, %34 : vector<8x64xf32>
    %37 = arith.divf %35, %36 : vector<8x64xf32>
    %38 = arith.mulf %29, %11 : vector<8x64xf32>
    %39 = arith.mulf %23, %31 : vector<8x64xf32>
    %40 = arith.addf %38, %39 : vector<8x64xf32>
    %41 = math.tanh %40 : vector<8x64xf32>
    %42 = arith.mulf %37, %41 : vector<8x64xf32>
    %c1_i32 = arith.constant 1 : i32
    %43 = arith.index_cast %c1_i32 : i32 to index
    %c0_20 = arith.constant 0 : index
    %c0_21 = arith.constant 0 : index
    %44 = vector.load %arg17[%43, %c0_20, %c0_21] : memref<8x8x256xf32, #tpu.memory_space<vmem>>, vector<1x8x256xf32>
    %45 = vector.shape_cast %44 : vector<1x8x256xf32> to vector<8x256xf32>
    %46 = arith.truncf %42 : vector<8x64xf32> to vector<8x64xbf16>
    %cst_22 = arith.constant dense<0.000000e+00> : vector<8x256xf32>
    %47 = tpu.matmul %46, %0, %cst_22 {dimension_numbers = #tpu.dot_dimension_numbers<[1], [0], [0], [1], [0, 0, 1, 1], [], []>} : vector<8x64xbf16>, vector<64x256xbf16>, vector<8x256xf32> -> vector<8x256xf32>
    %48 = arith.addf %45, %47 : vector<8x256xf32>
    %49 = vector.extract_strided_slice %48 {offsets = [0, 0], sizes = [8, 64], strides = [1, 1]} : vector<8x256xf32> to vector<8x64xf32>
    %50 = arith.negf %49 : vector<8x64xf32>
    %51 = math.exp %50 : vector<8x64xf32>
    %cst_23 = arith.constant 1.000000e+00 : f32
    %52 = vector.broadcast %cst_23 : f32 to vector<8x64xf32>
    %53 = arith.addf %52, %51 : vector<8x64xf32>
    %54 = arith.divf %52, %53 : vector<8x64xf32>
    %55 = vector.extract_strided_slice %48 {offsets = [0, 64], sizes = [8, 64], strides = [1, 1]} : vector<8x256xf32> to vector<8x64xf32>
    %56 = arith.negf %55 : vector<8x64xf32>
    %57 = math.exp %56 : vector<8x64xf32>
    %cst_24 = arith.constant 1.000000e+00 : f32
    %58 = vector.broadcast %cst_24 : f32 to vector<8x64xf32>
    %59 = arith.addf %58, %57 : vector<8x64xf32>
    %60 = arith.divf %58, %59 : vector<8x64xf32>
    %61 = vector.extract_strided_slice %48 {offsets = [0, 128], sizes = [8, 64], strides = [1, 1]} : vector<8x256xf32> to vector<8x64xf32>
    %62 = math.tanh %61 : vector<8x64xf32>
    %63 = vector.extract_strided_slice %48 {offsets = [0, 192], sizes = [8, 64], strides = [1, 1]} : vector<8x256xf32> to vector<8x64xf32>
    %64 = arith.negf %63 : vector<8x64xf32>
    %65 = math.exp %64 : vector<8x64xf32>
    %cst_25 = arith.constant 1.000000e+00 : f32
    %66 = vector.broadcast %cst_25 : f32 to vector<8x64xf32>
    %67 = arith.addf %66, %65 : vector<8x64xf32>
    %68 = arith.divf %66, %67 : vector<8x64xf32>
    %69 = arith.mulf %60, %40 : vector<8x64xf32>
    %70 = arith.mulf %54, %62 : vector<8x64xf32>
    %71 = arith.addf %69, %70 : vector<8x64xf32>
    %72 = math.tanh %71 : vector<8x64xf32>
    %73 = arith.mulf %68, %72 : vector<8x64xf32>
    %c2_i32 = arith.constant 2 : i32
    %74 = arith.index_cast %c2_i32 : i32 to index
    %c0_26 = arith.constant 0 : index
    %c0_27 = arith.constant 0 : index
    %75 = vector.load %arg17[%74, %c0_26, %c0_27] : memref<8x8x256xf32, #tpu.memory_space<vmem>>, vector<1x8x256xf32>
    %76 = vector.shape_cast %75 : vector<1x8x256xf32> to vector<8x256xf32>
    %77 = arith.truncf %73 : vector<8x64xf32> to vector<8x64xbf16>
    %cst_28 = arith.constant dense<0.000000e+00> : vector<8x256xf32>
    %78 = tpu.matmul %77, %0, %cst_28 {dimension_numbers = #tpu.dot_dimension_numbers<[1], [0], [0], [1], [0, 0, 1, 1], [], []>} : vector<8x64xbf16>, vector<64x256xbf16>, vector<8x256xf32> -> vector<8x256xf32>
    %79 = arith.addf %76, %78 : vector<8x256xf32>
    %80 = vector.extract_strided_slice %79 {offsets = [0, 0], sizes = [8, 64], strides = [1, 1]} : vector<8x256xf32> to vector<8x64xf32>
    %81 = arith.negf %80 : vector<8x64xf32>
    %82 = math.exp %81 : vector<8x64xf32>
    %cst_29 = arith.constant 1.000000e+00 : f32
    %83 = vector.broadcast %cst_29 : f32 to vector<8x64xf32>
    %84 = arith.addf %83, %82 : vector<8x64xf32>
    %85 = arith.divf %83, %84 : vector<8x64xf32>
    %86 = vector.extract_strided_slice %79 {offsets = [0, 64], sizes = [8, 64], strides = [1, 1]} : vector<8x256xf32> to vector<8x64xf32>
    %87 = arith.negf %86 : vector<8x64xf32>
    %88 = math.exp %87 : vector<8x64xf32>
    %cst_30 = arith.constant 1.000000e+00 : f32
    %89 = vector.broadcast %cst_30 : f32 to vector<8x64xf32>
    %90 = arith.addf %89, %88 : vector<8x64xf32>
    %91 = arith.divf %89, %90 : vector<8x64xf32>
    %92 = vector.extract_strided_slice %79 {offsets = [0, 128], sizes = [8, 64], strides = [1, 1]} : vector<8x256xf32> to vector<8x64xf32>
    %93 = math.tanh %92 : vector<8x64xf32>
    %94 = vector.extract_strided_slice %79 {offsets = [0, 192], sizes = [8, 64], strides = [1, 1]} : vector<8x256xf32> to vector<8x64xf32>
    %95 = arith.negf %94 : vector<8x64xf32>
    %96 = math.exp %95 : vector<8x64xf32>
    %cst_31 = arith.constant 1.000000e+00 : f32
    %97 = vector.broadcast %cst_31 : f32 to vector<8x64xf32>
    %98 = arith.addf %97, %96 : vector<8x64xf32>
    %99 = arith.divf %97, %98 : vector<8x64xf32>
    %100 = arith.mulf %91, %71 : vector<8x64xf32>
    %101 = arith.mulf %85, %93 : vector<8x64xf32>
    %102 = arith.addf %100, %101 : vector<8x64xf32>
    %103 = math.tanh %102 : vector<8x64xf32>
    %104 = arith.mulf %99, %103 : vector<8x64xf32>
    %c3_i32 = arith.constant 3 : i32
    %105 = arith.index_cast %c3_i32 : i32 to index
    %c0_32 = arith.constant 0 : index
    %c0_33 = arith.constant 0 : index
    %106 = vector.load %arg17[%105, %c0_32, %c0_33] : memref<8x8x256xf32, #tpu.memory_space<vmem>>, vector<1x8x256xf32>
    %107 = vector.shape_cast %106 : vector<1x8x256xf32> to vector<8x256xf32>
    %108 = arith.truncf %104 : vector<8x64xf32> to vector<8x64xbf16>
    %cst_34 = arith.constant dense<0.000000e+00> : vector<8x256xf32>
    %109 = tpu.matmul %108, %0, %cst_34 {dimension_numbers = #tpu.dot_dimension_numbers<[1], [0], [0], [1], [0, 0, 1, 1], [], []>} : vector<8x64xbf16>, vector<64x256xbf16>, vector<8x256xf32> -> vector<8x256xf32>
    %110 = arith.addf %107, %109 : vector<8x256xf32>
    %111 = vector.extract_strided_slice %110 {offsets = [0, 0], sizes = [8, 64], strides = [1, 1]} : vector<8x256xf32> to vector<8x64xf32>
    %112 = arith.negf %111 : vector<8x64xf32>
    %113 = math.exp %112 : vector<8x64xf32>
    %cst_35 = arith.constant 1.000000e+00 : f32
    %114 = vector.broadcast %cst_35 : f32 to vector<8x64xf32>
    %115 = arith.addf %114, %113 : vector<8x64xf32>
    %116 = arith.divf %114, %115 : vector<8x64xf32>
    %117 = vector.extract_strided_slice %110 {offsets = [0, 64], sizes = [8, 64], strides = [1, 1]} : vector<8x256xf32> to vector<8x64xf32>
    %118 = arith.negf %117 : vector<8x64xf32>
    %119 = math.exp %118 : vector<8x64xf32>
    %cst_36 = arith.constant 1.000000e+00 : f32
    %120 = vector.broadcast %cst_36 : f32 to vector<8x64xf32>
    %121 = arith.addf %120, %119 : vector<8x64xf32>
    %122 = arith.divf %120, %121 : vector<8x64xf32>
    %123 = vector.extract_strided_slice %110 {offsets = [0, 128], sizes = [8, 64], strides = [1, 1]} : vector<8x256xf32> to vector<8x64xf32>
    %124 = math.tanh %123 : vector<8x64xf32>
    %125 = vector.extract_strided_slice %110 {offsets = [0, 192], sizes = [8, 64], strides = [1, 1]} : vector<8x256xf32> to vector<8x64xf32>
    %126 = arith.negf %125 : vector<8x64xf32>
    %127 = math.exp %126 : vector<8x64xf32>
    %cst_37 = arith.constant 1.000000e+00 : f32
    %128 = vector.broadcast %cst_37 : f32 to vector<8x64xf32>
    %129 = arith.addf %128, %127 : vector<8x64xf32>
    %130 = arith.divf %128, %129 : vector<8x64xf32>
    %131 = arith.mulf %122, %102 : vector<8x64xf32>
    %132 = arith.mulf %116, %124 : vector<8x64xf32>
    %133 = arith.addf %131, %132 : vector<8x64xf32>
    %134 = math.tanh %133 : vector<8x64xf32>
    %135 = arith.mulf %130, %134 : vector<8x64xf32>
    %c4_i32 = arith.constant 4 : i32
    %136 = arith.index_cast %c4_i32 : i32 to index
    %c0_38 = arith.constant 0 : index
    %c0_39 = arith.constant 0 : index
    %137 = vector.load %arg17[%136, %c0_38, %c0_39] : memref<8x8x256xf32, #tpu.memory_space<vmem>>, vector<1x8x256xf32>
    %138 = vector.shape_cast %137 : vector<1x8x256xf32> to vector<8x256xf32>
    %139 = arith.truncf %135 : vector<8x64xf32> to vector<8x64xbf16>
    %cst_40 = arith.constant dense<0.000000e+00> : vector<8x256xf32>
    %140 = tpu.matmul %139, %0, %cst_40 {dimension_numbers = #tpu.dot_dimension_numbers<[1], [0], [0], [1], [0, 0, 1, 1], [], []>} : vector<8x64xbf16>, vector<64x256xbf16>, vector<8x256xf32> -> vector<8x256xf32>
    %141 = arith.addf %138, %140 : vector<8x256xf32>
    %142 = vector.extract_strided_slice %141 {offsets = [0, 0], sizes = [8, 64], strides = [1, 1]} : vector<8x256xf32> to vector<8x64xf32>
    %143 = arith.negf %142 : vector<8x64xf32>
    %144 = math.exp %143 : vector<8x64xf32>
    %cst_41 = arith.constant 1.000000e+00 : f32
    %145 = vector.broadcast %cst_41 : f32 to vector<8x64xf32>
    %146 = arith.addf %145, %144 : vector<8x64xf32>
    %147 = arith.divf %145, %146 : vector<8x64xf32>
    %148 = vector.extract_strided_slice %141 {offsets = [0, 64], sizes = [8, 64], strides = [1, 1]} : vector<8x256xf32> to vector<8x64xf32>
    %149 = arith.negf %148 : vector<8x64xf32>
    %150 = math.exp %149 : vector<8x64xf32>
    %cst_42 = arith.constant 1.000000e+00 : f32
    %151 = vector.broadcast %cst_42 : f32 to vector<8x64xf32>
    %152 = arith.addf %151, %150 : vector<8x64xf32>
    %153 = arith.divf %151, %152 : vector<8x64xf32>
    %154 = vector.extract_strided_slice %141 {offsets = [0, 128], sizes = [8, 64], strides = [1, 1]} : vector<8x256xf32> to vector<8x64xf32>
    %155 = math.tanh %154 : vector<8x64xf32>
    %156 = vector.extract_strided_slice %141 {offsets = [0, 192], sizes = [8, 64], strides = [1, 1]} : vector<8x256xf32> to vector<8x64xf32>
    %157 = arith.negf %156 : vector<8x64xf32>
    %158 = math.exp %157 : vector<8x64xf32>
    %cst_43 = arith.constant 1.000000e+00 : f32
    %159 = vector.broadcast %cst_43 : f32 to vector<8x64xf32>
    %160 = arith.addf %159, %158 : vector<8x64xf32>
    %161 = arith.divf %159, %160 : vector<8x64xf32>
    %162 = arith.mulf %153, %133 : vector<8x64xf32>
    %163 = arith.mulf %147, %155 : vector<8x64xf32>
    %164 = arith.addf %162, %163 : vector<8x64xf32>
    %165 = math.tanh %164 : vector<8x64xf32>
    %166 = arith.mulf %161, %165 : vector<8x64xf32>
    %c5_i32 = arith.constant 5 : i32
    %167 = arith.index_cast %c5_i32 : i32 to index
    %c0_44 = arith.constant 0 : index
    %c0_45 = arith.constant 0 : index
    %168 = vector.load %arg17[%167, %c0_44, %c0_45] : memref<8x8x256xf32, #tpu.memory_space<vmem>>, vector<1x8x256xf32>
    %169 = vector.shape_cast %168 : vector<1x8x256xf32> to vector<8x256xf32>
    %170 = arith.truncf %166 : vector<8x64xf32> to vector<8x64xbf16>
    %cst_46 = arith.constant dense<0.000000e+00> : vector<8x256xf32>
    %171 = tpu.matmul %170, %0, %cst_46 {dimension_numbers = #tpu.dot_dimension_numbers<[1], [0], [0], [1], [0, 0, 1, 1], [], []>} : vector<8x64xbf16>, vector<64x256xbf16>, vector<8x256xf32> -> vector<8x256xf32>
    %172 = arith.addf %169, %171 : vector<8x256xf32>
    %173 = vector.extract_strided_slice %172 {offsets = [0, 0], sizes = [8, 64], strides = [1, 1]} : vector<8x256xf32> to vector<8x64xf32>
    %174 = arith.negf %173 : vector<8x64xf32>
    %175 = math.exp %174 : vector<8x64xf32>
    %cst_47 = arith.constant 1.000000e+00 : f32
    %176 = vector.broadcast %cst_47 : f32 to vector<8x64xf32>
    %177 = arith.addf %176, %175 : vector<8x64xf32>
    %178 = arith.divf %176, %177 : vector<8x64xf32>
    %179 = vector.extract_strided_slice %172 {offsets = [0, 64], sizes = [8, 64], strides = [1, 1]} : vector<8x256xf32> to vector<8x64xf32>
    %180 = arith.negf %179 : vector<8x64xf32>
    %181 = math.exp %180 : vector<8x64xf32>
    %cst_48 = arith.constant 1.000000e+00 : f32
    %182 = vector.broadcast %cst_48 : f32 to vector<8x64xf32>
    %183 = arith.addf %182, %181 : vector<8x64xf32>
    %184 = arith.divf %182, %183 : vector<8x64xf32>
    %185 = vector.extract_strided_slice %172 {offsets = [0, 128], sizes = [8, 64], strides = [1, 1]} : vector<8x256xf32> to vector<8x64xf32>
    %186 = math.tanh %185 : vector<8x64xf32>
    %187 = vector.extract_strided_slice %172 {offsets = [0, 192], sizes = [8, 64], strides = [1, 1]} : vector<8x256xf32> to vector<8x64xf32>
    %188 = arith.negf %187 : vector<8x64xf32>
    %189 = math.exp %188 : vector<8x64xf32>
    %cst_49 = arith.constant 1.000000e+00 : f32
    %190 = vector.broadcast %cst_49 : f32 to vector<8x64xf32>
    %191 = arith.addf %190, %189 : vector<8x64xf32>
    %192 = arith.divf %190, %191 : vector<8x64xf32>
    %193 = arith.mulf %184, %164 : vector<8x64xf32>
    %194 = arith.mulf %178, %186 : vector<8x64xf32>
    %195 = arith.addf %193, %194 : vector<8x64xf32>
    %196 = math.tanh %195 : vector<8x64xf32>
    %197 = arith.mulf %192, %196 : vector<8x64xf32>
    %c6_i32 = arith.constant 6 : i32
    %198 = arith.index_cast %c6_i32 : i32 to index
    %c0_50 = arith.constant 0 : index
    %c0_51 = arith.constant 0 : index
    %199 = vector.load %arg17[%198, %c0_50, %c0_51] : memref<8x8x256xf32, #tpu.memory_space<vmem>>, vector<1x8x256xf32>
    %200 = vector.shape_cast %199 : vector<1x8x256xf32> to vector<8x256xf32>
    %201 = arith.truncf %197 : vector<8x64xf32> to vector<8x64xbf16>
    %cst_52 = arith.constant dense<0.000000e+00> : vector<8x256xf32>
    %202 = tpu.matmul %201, %0, %cst_52 {dimension_numbers = #tpu.dot_dimension_numbers<[1], [0], [0], [1], [0, 0, 1, 1], [], []>} : vector<8x64xbf16>, vector<64x256xbf16>, vector<8x256xf32> -> vector<8x256xf32>
    %203 = arith.addf %200, %202 : vector<8x256xf32>
    %204 = vector.extract_strided_slice %203 {offsets = [0, 0], sizes = [8, 64], strides = [1, 1]} : vector<8x256xf32> to vector<8x64xf32>
    %205 = arith.negf %204 : vector<8x64xf32>
    %206 = math.exp %205 : vector<8x64xf32>
    %cst_53 = arith.constant 1.000000e+00 : f32
    %207 = vector.broadcast %cst_53 : f32 to vector<8x64xf32>
    %208 = arith.addf %207, %206 : vector<8x64xf32>
    %209 = arith.divf %207, %208 : vector<8x64xf32>
    %210 = vector.extract_strided_slice %203 {offsets = [0, 64], sizes = [8, 64], strides = [1, 1]} : vector<8x256xf32> to vector<8x64xf32>
    %211 = arith.negf %210 : vector<8x64xf32>
    %212 = math.exp %211 : vector<8x64xf32>
    %cst_54 = arith.constant 1.000000e+00 : f32
    %213 = vector.broadcast %cst_54 : f32 to vector<8x64xf32>
    %214 = arith.addf %213, %212 : vector<8x64xf32>
    %215 = arith.divf %213, %214 : vector<8x64xf32>
    %216 = vector.extract_strided_slice %203 {offsets = [0, 128], sizes = [8, 64], strides = [1, 1]} : vector<8x256xf32> to vector<8x64xf32>
    %217 = math.tanh %216 : vector<8x64xf32>
    %218 = vector.extract_strided_slice %203 {offsets = [0, 192], sizes = [8, 64], strides = [1, 1]} : vector<8x256xf32> to vector<8x64xf32>
    %219 = arith.negf %218 : vector<8x64xf32>
    %220 = math.exp %219 : vector<8x64xf32>
    %cst_55 = arith.constant 1.000000e+00 : f32
    %221 = vector.broadcast %cst_55 : f32 to vector<8x64xf32>
    %222 = arith.addf %221, %220 : vector<8x64xf32>
    %223 = arith.divf %221, %222 : vector<8x64xf32>
    %224 = arith.mulf %215, %195 : vector<8x64xf32>
    %225 = arith.mulf %209, %217 : vector<8x64xf32>
    %226 = arith.addf %224, %225 : vector<8x64xf32>
    %227 = math.tanh %226 : vector<8x64xf32>
    %228 = arith.mulf %223, %227 : vector<8x64xf32>
    %c7_i32 = arith.constant 7 : i32
    %229 = arith.index_cast %c7_i32 : i32 to index
    %c0_56 = arith.constant 0 : index
    %c0_57 = arith.constant 0 : index
    %230 = vector.load %arg17[%229, %c0_56, %c0_57] : memref<8x8x256xf32, #tpu.memory_space<vmem>>, vector<1x8x256xf32>
    %231 = vector.shape_cast %230 : vector<1x8x256xf32> to vector<8x256xf32>
    %232 = arith.truncf %228 : vector<8x64xf32> to vector<8x64xbf16>
    %cst_58 = arith.constant dense<0.000000e+00> : vector<8x256xf32>
    %233 = tpu.matmul %232, %0, %cst_58 {dimension_numbers = #tpu.dot_dimension_numbers<[1], [0], [0], [1], [0, 0, 1, 1], [], []>} : vector<8x64xbf16>, vector<64x256xbf16>, vector<8x256xf32> -> vector<8x256xf32>
    %234 = arith.addf %231, %233 : vector<8x256xf32>
    %235 = vector.extract_strided_slice %234 {offsets = [0, 0], sizes = [8, 64], strides = [1, 1]} : vector<8x256xf32> to vector<8x64xf32>
    %236 = arith.negf %235 : vector<8x64xf32>
    %237 = math.exp %236 : vector<8x64xf32>
    %cst_59 = arith.constant 1.000000e+00 : f32
    %238 = vector.broadcast %cst_59 : f32 to vector<8x64xf32>
    %239 = arith.addf %238, %237 : vector<8x64xf32>
    %240 = arith.divf %238, %239 : vector<8x64xf32>
    %241 = vector.extract_strided_slice %234 {offsets = [0, 64], sizes = [8, 64], strides = [1, 1]} : vector<8x256xf32> to vector<8x64xf32>
    %242 = arith.negf %241 : vector<8x64xf32>
    %243 = math.exp %242 : vector<8x64xf32>
    %cst_60 = arith.constant 1.000000e+00 : f32
    %244 = vector.broadcast %cst_60 : f32 to vector<8x64xf32>
    %245 = arith.addf %244, %243 : vector<8x64xf32>
    %246 = arith.divf %244, %245 : vector<8x64xf32>
    %247 = vector.extract_strided_slice %234 {offsets = [0, 128], sizes = [8, 64], strides = [1, 1]} : vector<8x256xf32> to vector<8x64xf32>
    %248 = math.tanh %247 : vector<8x64xf32>
    %249 = vector.extract_strided_slice %234 {offsets = [0, 192], sizes = [8, 64], strides = [1, 1]} : vector<8x256xf32> to vector<8x64xf32>
    %250 = arith.negf %249 : vector<8x64xf32>
    %251 = math.exp %250 : vector<8x64xf32>
    %cst_61 = arith.constant 1.000000e+00 : f32
    %252 = vector.broadcast %cst_61 : f32 to vector<8x64xf32>
    %253 = arith.addf %252, %251 : vector<8x64xf32>
    %254 = arith.divf %252, %253 : vector<8x64xf32>
    %255 = arith.mulf %246, %226 : vector<8x64xf32>
    %256 = arith.mulf %240, %248 : vector<8x64xf32>
    %257 = arith.addf %255, %256 : vector<8x64xf32>
    %258 = math.tanh %257 : vector<8x64xf32>
    %259 = arith.mulf %254, %258 : vector<8x64xf32>
    %c8_i32 = arith.constant 8 : i32
    %260 = arith.truncf %259 : vector<8x64xf32> to vector<8x64xbf16>
    %c0_62 = arith.constant 0 : index
    %c0_63 = arith.constant 0 : index
    %261 = vector.load %arg4[%c0_62, %c0_63] : memref<64x32xbf16, #tpu.memory_space<vmem>>, vector<64x32xbf16>
    %cst_64 = arith.constant dense<0.000000e+00> : vector<8x32xf32>
    %262 = tpu.matmul %260, %261, %cst_64 {dimension_numbers = #tpu.dot_dimension_numbers<[1], [0], [0], [1], [0, 0, 1, 1], [], []>} : vector<8x64xbf16>, vector<64x32xbf16>, vector<8x32xf32> -> vector<8x32xf32>
    %c0_65 = arith.constant 0 : index
    %c0_66 = arith.constant 0 : index
    %263 = vector.load %arg5[%c0_65, %c0_66] : memref<1x32xf32, #tpu.memory_space<vmem>>, vector<1x32xf32>
    %264 = vector.broadcast %263 : vector<1x32xf32> to vector<8x32xf32>
    %265 = arith.addf %262, %264 : vector<8x32xf32>
    %c0_67 = arith.constant 0 : index
    %c0_68 = arith.constant 0 : index
    %266 = vector.load %arg16[%c0_67, %c0_68] : memref<8x32xf32, #tpu.memory_space<vmem>>, vector<8x32xf32>
    tpu.vector_store %arg16[%c0_67, %c0_68], %265 {strides = array<i32>} : memref<8x32xf32, #tpu.memory_space<vmem>>, vector<8x32xf32>,
    %267 = arith.truncf %265 : vector<8x32xf32> to vector<8x32xbf16>
    %c0_69 = arith.constant 0 : index
    %c0_70 = arith.constant 0 : index
    %268 = vector.load %arg6[%c0_69, %c0_70] : memref<32x256xbf16, #tpu.memory_space<vmem>>, vector<32x256xbf16>
    %cst_71 = arith.constant dense<0.000000e+00> : vector<8x256xf32>
    %269 = tpu.matmul %267, %268, %cst_71 {dimension_numbers = #tpu.dot_dimension_numbers<[1], [0], [0], [1], [0, 0, 1, 1], [], []>} : vector<8x32xbf16>, vector<32x256xbf16>, vector<8x256xf32> -> vector<8x256xf32>
    %c0_72 = arith.constant 0 : index
    %c0_73 = arith.constant 0 : index
    %270 = vector.load %arg7[%c0_72, %c0_73] : memref<1x256xf32, #tpu.memory_space<vmem>>, vector<1x256xf32>
    %271 = vector.broadcast %270 : vector<1x256xf32> to vector<8x256xf32>
    %272 = arith.addf %269, %271 : vector<8x256xf32>
    %c0_i32_74 = arith.constant 0 : i32
    %273 = arith.truncf %11 : vector<8x64xf32> to vector<8x64xbf16>
    %cst_75 = arith.constant dense<0.000000e+00> : vector<8x256xf32>
    %274 = tpu.matmul %273, %1, %cst_75 {dimension_numbers = #tpu.dot_dimension_numbers<[1], [0], [0], [1], [0, 0, 1, 1], [], []>} : vector<8x64xbf16>, vector<64x256xbf16>, vector<8x256xf32> -> vector<8x256xf32>
    %275 = arith.addf %272, %274 : vector<8x256xf32>
    %276 = vector.extract_strided_slice %275 {offsets = [0, 0], sizes = [8, 64], strides = [1, 1]} : vector<8x256xf32> to vector<8x64xf32>
    %277 = arith.negf %276 : vector<8x64xf32>
    %278 = math.exp %277 : vector<8x64xf32>
    %cst_76 = arith.constant 1.000000e+00 : f32
    %279 = vector.broadcast %cst_76 : f32 to vector<8x64xf32>
    %280 = arith.addf %279, %278 : vector<8x64xf32>
    %281 = arith.divf %279, %280 : vector<8x64xf32>
    %282 = vector.extract_strided_slice %275 {offsets = [0, 64], sizes = [8, 64], strides = [1, 1]} : vector<8x256xf32> to vector<8x64xf32>
    %283 = arith.negf %282 : vector<8x64xf32>
    %284 = math.exp %283 : vector<8x64xf32>
    %cst_77 = arith.constant 1.000000e+00 : f32
    %285 = vector.broadcast %cst_77 : f32 to vector<8x64xf32>
    %286 = arith.addf %285, %284 : vector<8x64xf32>
    %287 = arith.divf %285, %286 : vector<8x64xf32>
    %288 = vector.extract_strided_slice %275 {offsets = [0, 128], sizes = [8, 64], strides = [1, 1]} : vector<8x256xf32> to vector<8x64xf32>
    %289 = math.tanh %288 : vector<8x64xf32>
    %290 = vector.extract_strided_slice %275 {offsets = [0, 192], sizes = [8, 64], strides = [1, 1]} : vector<8x256xf32> to vector<8x64xf32>
    %291 = arith.negf %290 : vector<8x64xf32>
    %292 = math.exp %291 : vector<8x64xf32>
    %cst_78 = arith.constant 1.000000e+00 : f32
    %293 = vector.broadcast %cst_78 : f32 to vector<8x64xf32>
    %294 = arith.addf %293, %292 : vector<8x64xf32>
    %295 = arith.divf %293, %294 : vector<8x64xf32>
    %296 = arith.mulf %287, %11 : vector<8x64xf32>
    %297 = arith.mulf %281, %289 : vector<8x64xf32>
    %298 = arith.addf %296, %297 : vector<8x64xf32>
    %299 = math.tanh %298 : vector<8x64xf32>
    %300 = arith.mulf %295, %299 : vector<8x64xf32>
    %301 = vector.extract_strided_slice %300 {offsets = [0, 0], sizes = [8, 32], strides = [1, 1]} : vector<8x64xf32> to vector<8x32xf32>
    %302 = arith.index_cast %c0_i32_74 : i32 to index
    %c0_79 = arith.constant 0 : index
    %c0_80 = arith.constant 0 : index
    %303 = vector.load %arg18[%302, %c0_79, %c0_80] : memref<8x8x32xf32, #tpu.memory_space<vmem>>, vector<1x8x32xf32>
    %304 = vector.shape_cast %303 : vector<1x8x32xf32> to vector<8x32xf32>
    %305 = vector.shape_cast %301 : vector<8x32xf32> to vector<1x8x32xf32>
    tpu.vector_store %arg18[%302, %c0_79, %c0_80], %305 {strides = array<i32>} : memref<8x8x32xf32, #tpu.memory_space<vmem>>, vector<1x8x32xf32>,
    %306 = vector.extract_strided_slice %300 {offsets = [0, 32], sizes = [8, 32], strides = [1, 1]} : vector<8x64xf32> to vector<8x32xf32>
    %c7_i32_81 = arith.constant 7 : i32
    %307 = arith.subi %c7_i32_81, %c0_i32_74 : i32
    %308 = arith.index_cast %307 : i32 to index
    %c0_82 = arith.constant 0 : index
    %c0_83 = arith.constant 0 : index
    %309 = vector.load %arg19[%308, %c0_82, %c0_83] : memref<8x8x32xf32, #tpu.memory_space<vmem>>, vector<1x8x32xf32>
    %310 = vector.shape_cast %309 : vector<1x8x32xf32> to vector<8x32xf32>
    %311 = vector.shape_cast %306 : vector<8x32xf32> to vector<1x8x32xf32>
    tpu.vector_store %arg19[%308, %c0_82, %c0_83], %311 {strides = array<i32>} : memref<8x8x32xf32, #tpu.memory_space<vmem>>, vector<1x8x32xf32>,
    %c1_i32_84 = arith.constant 1 : i32
    %312 = arith.truncf %300 : vector<8x64xf32> to vector<8x64xbf16>
    %cst_85 = arith.constant dense<0.000000e+00> : vector<8x256xf32>
    %313 = tpu.matmul %312, %1, %cst_85 {dimension_numbers = #tpu.dot_dimension_numbers<[1], [0], [0], [1], [0, 0, 1, 1], [], []>} : vector<8x64xbf16>, vector<64x256xbf16>, vector<8x256xf32> -> vector<8x256xf32>
    %314 = arith.addf %272, %313 : vector<8x256xf32>
    %315 = vector.extract_strided_slice %314 {offsets = [0, 0], sizes = [8, 64], strides = [1, 1]} : vector<8x256xf32> to vector<8x64xf32>
    %316 = arith.negf %315 : vector<8x64xf32>
    %317 = math.exp %316 : vector<8x64xf32>
    %cst_86 = arith.constant 1.000000e+00 : f32
    %318 = vector.broadcast %cst_86 : f32 to vector<8x64xf32>
    %319 = arith.addf %318, %317 : vector<8x64xf32>
    %320 = arith.divf %318, %319 : vector<8x64xf32>
    %321 = vector.extract_strided_slice %314 {offsets = [0, 64], sizes = [8, 64], strides = [1, 1]} : vector<8x256xf32> to vector<8x64xf32>
    %322 = arith.negf %321 : vector<8x64xf32>
    %323 = math.exp %322 : vector<8x64xf32>
    %cst_87 = arith.constant 1.000000e+00 : f32
    %324 = vector.broadcast %cst_87 : f32 to vector<8x64xf32>
    %325 = arith.addf %324, %323 : vector<8x64xf32>
    %326 = arith.divf %324, %325 : vector<8x64xf32>
    %327 = vector.extract_strided_slice %314 {offsets = [0, 128], sizes = [8, 64], strides = [1, 1]} : vector<8x256xf32> to vector<8x64xf32>
    %328 = math.tanh %327 : vector<8x64xf32>
    %329 = vector.extract_strided_slice %314 {offsets = [0, 192], sizes = [8, 64], strides = [1, 1]} : vector<8x256xf32> to vector<8x64xf32>
    %330 = arith.negf %329 : vector<8x64xf32>
    %331 = math.exp %330 : vector<8x64xf32>
    %cst_88 = arith.constant 1.000000e+00 : f32
    %332 = vector.broadcast %cst_88 : f32 to vector<8x64xf32>
    %333 = arith.addf %332, %331 : vector<8x64xf32>
    %334 = arith.divf %332, %333 : vector<8x64xf32>
    %335 = arith.mulf %326, %298 : vector<8x64xf32>
    %336 = arith.mulf %320, %328 : vector<8x64xf32>
    %337 = arith.addf %335, %336 : vector<8x64xf32>
    %338 = math.tanh %337 : vector<8x64xf32>
    %339 = arith.mulf %334, %338 : vector<8x64xf32>
    %340 = vector.extract_strided_slice %339 {offsets = [0, 0], sizes = [8, 32], strides = [1, 1]} : vector<8x64xf32> to vector<8x32xf32>
    %341 = arith.index_cast %c1_i32_84 : i32 to index
    %c0_89 = arith.constant 0 : index
    %c0_90 = arith.constant 0 : index
    %342 = vector.load %arg18[%341, %c0_89, %c0_90] : memref<8x8x32xf32, #tpu.memory_space<vmem>>, vector<1x8x32xf32>
    %343 = vector.shape_cast %342 : vector<1x8x32xf32> to vector<8x32xf32>
    %344 = vector.shape_cast %340 : vector<8x32xf32> to vector<1x8x32xf32>
    tpu.vector_store %arg18[%341, %c0_89, %c0_90], %344 {strides = array<i32>} : memref<8x8x32xf32, #tpu.memory_space<vmem>>, vector<1x8x32xf32>,
    %345 = vector.extract_strided_slice %339 {offsets = [0, 32], sizes = [8, 32], strides = [1, 1]} : vector<8x64xf32> to vector<8x32xf32>
    %c7_i32_91 = arith.constant 7 : i32
    %346 = arith.subi %c7_i32_91, %c1_i32_84 : i32
    %347 = arith.index_cast %346 : i32 to index
    %c0_92 = arith.constant 0 : index
    %c0_93 = arith.constant 0 : index
    %348 = vector.load %arg19[%347, %c0_92, %c0_93] : memref<8x8x32xf32, #tpu.memory_space<vmem>>, vector<1x8x32xf32>
    %349 = vector.shape_cast %348 : vector<1x8x32xf32> to vector<8x32xf32>
    %350 = vector.shape_cast %345 : vector<8x32xf32> to vector<1x8x32xf32>
    tpu.vector_store %arg19[%347, %c0_92, %c0_93], %350 {strides = array<i32>} : memref<8x8x32xf32, #tpu.memory_space<vmem>>, vector<1x8x32xf32>,
    %c2_i32_94 = arith.constant 2 : i32
    %351 = arith.truncf %339 : vector<8x64xf32> to vector<8x64xbf16>
    %cst_95 = arith.constant dense<0.000000e+00> : vector<8x256xf32>
    %352 = tpu.matmul %351, %1, %cst_95 {dimension_numbers = #tpu.dot_dimension_numbers<[1], [0], [0], [1], [0, 0, 1, 1], [], []>} : vector<8x64xbf16>, vector<64x256xbf16>, vector<8x256xf32> -> vector<8x256xf32>
    %353 = arith.addf %272, %352 : vector<8x256xf32>
    %354 = vector.extract_strided_slice %353 {offsets = [0, 0], sizes = [8, 64], strides = [1, 1]} : vector<8x256xf32> to vector<8x64xf32>
    %355 = arith.negf %354 : vector<8x64xf32>
    %356 = math.exp %355 : vector<8x64xf32>
    %cst_96 = arith.constant 1.000000e+00 : f32
    %357 = vector.broadcast %cst_96 : f32 to vector<8x64xf32>
    %358 = arith.addf %357, %356 : vector<8x64xf32>
    %359 = arith.divf %357, %358 : vector<8x64xf32>
    %360 = vector.extract_strided_slice %353 {offsets = [0, 64], sizes = [8, 64], strides = [1, 1]} : vector<8x256xf32> to vector<8x64xf32>
    %361 = arith.negf %360 : vector<8x64xf32>
    %362 = math.exp %361 : vector<8x64xf32>
    %cst_97 = arith.constant 1.000000e+00 : f32
    %363 = vector.broadcast %cst_97 : f32 to vector<8x64xf32>
    %364 = arith.addf %363, %362 : vector<8x64xf32>
    %365 = arith.divf %363, %364 : vector<8x64xf32>
    %366 = vector.extract_strided_slice %353 {offsets = [0, 128], sizes = [8, 64], strides = [1, 1]} : vector<8x256xf32> to vector<8x64xf32>
    %367 = math.tanh %366 : vector<8x64xf32>
    %368 = vector.extract_strided_slice %353 {offsets = [0, 192], sizes = [8, 64], strides = [1, 1]} : vector<8x256xf32> to vector<8x64xf32>
    %369 = arith.negf %368 : vector<8x64xf32>
    %370 = math.exp %369 : vector<8x64xf32>
    %cst_98 = arith.constant 1.000000e+00 : f32
    %371 = vector.broadcast %cst_98 : f32 to vector<8x64xf32>
    %372 = arith.addf %371, %370 : vector<8x64xf32>
    %373 = arith.divf %371, %372 : vector<8x64xf32>
    %374 = arith.mulf %365, %337 : vector<8x64xf32>
    %375 = arith.mulf %359, %367 : vector<8x64xf32>
    %376 = arith.addf %374, %375 : vector<8x64xf32>
    %377 = math.tanh %376 : vector<8x64xf32>
    %378 = arith.mulf %373, %377 : vector<8x64xf32>
    %379 = vector.extract_strided_slice %378 {offsets = [0, 0], sizes = [8, 32], strides = [1, 1]} : vector<8x64xf32> to vector<8x32xf32>
    %380 = arith.index_cast %c2_i32_94 : i32 to index
    %c0_99 = arith.constant 0 : index
    %c0_100 = arith.constant 0 : index
    %381 = vector.load %arg18[%380, %c0_99, %c0_100] : memref<8x8x32xf32, #tpu.memory_space<vmem>>, vector<1x8x32xf32>
    %382 = vector.shape_cast %381 : vector<1x8x32xf32> to vector<8x32xf32>
    %383 = vector.shape_cast %379 : vector<8x32xf32> to vector<1x8x32xf32>
    tpu.vector_store %arg18[%380, %c0_99, %c0_100], %383 {strides = array<i32>} : memref<8x8x32xf32, #tpu.memory_space<vmem>>, vector<1x8x32xf32>,
    %384 = vector.extract_strided_slice %378 {offsets = [0, 32], sizes = [8, 32], strides = [1, 1]} : vector<8x64xf32> to vector<8x32xf32>
    %c7_i32_101 = arith.constant 7 : i32
    %385 = arith.subi %c7_i32_101, %c2_i32_94 : i32
    %386 = arith.index_cast %385 : i32 to index
    %c0_102 = arith.constant 0 : index
    %c0_103 = arith.constant 0 : index
    %387 = vector.load %arg19[%386, %c0_102, %c0_103] : memref<8x8x32xf32, #tpu.memory_space<vmem>>, vector<1x8x32xf32>
    %388 = vector.shape_cast %387 : vector<1x8x32xf32> to vector<8x32xf32>
    %389 = vector.shape_cast %384 : vector<8x32xf32> to vector<1x8x32xf32>
    tpu.vector_store %arg19[%386, %c0_102, %c0_103], %389 {strides = array<i32>} : memref<8x8x32xf32, #tpu.memory_space<vmem>>, vector<1x8x32xf32>,
    %c3_i32_104 = arith.constant 3 : i32
    %390 = arith.truncf %378 : vector<8x64xf32> to vector<8x64xbf16>
    %cst_105 = arith.constant dense<0.000000e+00> : vector<8x256xf32>
    %391 = tpu.matmul %390, %1, %cst_105 {dimension_numbers = #tpu.dot_dimension_numbers<[1], [0], [0], [1], [0, 0, 1, 1], [], []>} : vector<8x64xbf16>, vector<64x256xbf16>, vector<8x256xf32> -> vector<8x256xf32>
    %392 = arith.addf %272, %391 : vector<8x256xf32>
    %393 = vector.extract_strided_slice %392 {offsets = [0, 0], sizes = [8, 64], strides = [1, 1]} : vector<8x256xf32> to vector<8x64xf32>
    %394 = arith.negf %393 : vector<8x64xf32>
    %395 = math.exp %394 : vector<8x64xf32>
    %cst_106 = arith.constant 1.000000e+00 : f32
    %396 = vector.broadcast %cst_106 : f32 to vector<8x64xf32>
    %397 = arith.addf %396, %395 : vector<8x64xf32>
    %398 = arith.divf %396, %397 : vector<8x64xf32>
    %399 = vector.extract_strided_slice %392 {offsets = [0, 64], sizes = [8, 64], strides = [1, 1]} : vector<8x256xf32> to vector<8x64xf32>
    %400 = arith.negf %399 : vector<8x64xf32>
    %401 = math.exp %400 : vector<8x64xf32>
    %cst_107 = arith.constant 1.000000e+00 : f32
    %402 = vector.broadcast %cst_107 : f32 to vector<8x64xf32>
    %403 = arith.addf %402, %401 : vector<8x64xf32>
    %404 = arith.divf %402, %403 : vector<8x64xf32>
    %405 = vector.extract_strided_slice %392 {offsets = [0, 128], sizes = [8, 64], strides = [1, 1]} : vector<8x256xf32> to vector<8x64xf32>
    %406 = math.tanh %405 : vector<8x64xf32>
    %407 = vector.extract_strided_slice %392 {offsets = [0, 192], sizes = [8, 64], strides = [1, 1]} : vector<8x256xf32> to vector<8x64xf32>
    %408 = arith.negf %407 : vector<8x64xf32>
    %409 = math.exp %408 : vector<8x64xf32>
    %cst_108 = arith.constant 1.000000e+00 : f32
    %410 = vector.broadcast %cst_108 : f32 to vector<8x64xf32>
    %411 = arith.addf %410, %409 : vector<8x64xf32>
    %412 = arith.divf %410, %411 : vector<8x64xf32>
    %413 = arith.mulf %404, %376 : vector<8x64xf32>
    %414 = arith.mulf %398, %406 : vector<8x64xf32>
    %415 = arith.addf %413, %414 : vector<8x64xf32>
    %416 = math.tanh %415 : vector<8x64xf32>
    %417 = arith.mulf %412, %416 : vector<8x64xf32>
    %418 = vector.extract_strided_slice %417 {offsets = [0, 0], sizes = [8, 32], strides = [1, 1]} : vector<8x64xf32> to vector<8x32xf32>
    %419 = arith.index_cast %c3_i32_104 : i32 to index
    %c0_109 = arith.constant 0 : index
    %c0_110 = arith.constant 0 : index
    %420 = vector.load %arg18[%419, %c0_109, %c0_110] : memref<8x8x32xf32, #tpu.memory_space<vmem>>, vector<1x8x32xf32>
    %421 = vector.shape_cast %420 : vector<1x8x32xf32> to vector<8x32xf32>
    %422 = vector.shape_cast %418 : vector<8x32xf32> to vector<1x8x32xf32>
    tpu.vector_store %arg18[%419, %c0_109, %c0_110], %422 {strides = array<i32>} : memref<8x8x32xf32, #tpu.memory_space<vmem>>, vector<1x8x32xf32>,
    %423 = vector.extract_strided_slice %417 {offsets = [0, 32], sizes = [8, 32], strides = [1, 1]} : vector<8x64xf32> to vector<8x32xf32>
    %c7_i32_111 = arith.constant 7 : i32
    %424 = arith.subi %c7_i32_111, %c3_i32_104 : i32
    %425 = arith.index_cast %424 : i32 to index
    %c0_112 = arith.constant 0 : index
    %c0_113 = arith.constant 0 : index
    %426 = vector.load %arg19[%425, %c0_112, %c0_113] : memref<8x8x32xf32, #tpu.memory_space<vmem>>, vector<1x8x32xf32>
    %427 = vector.shape_cast %426 : vector<1x8x32xf32> to vector<8x32xf32>
    %428 = vector.shape_cast %423 : vector<8x32xf32> to vector<1x8x32xf32>
    tpu.vector_store %arg19[%425, %c0_112, %c0_113], %428 {strides = array<i32>} : memref<8x8x32xf32, #tpu.memory_space<vmem>>, vector<1x8x32xf32>,
    %c4_i32_114 = arith.constant 4 : i32
    %429 = arith.truncf %417 : vector<8x64xf32> to vector<8x64xbf16>
    %cst_115 = arith.constant dense<0.000000e+00> : vector<8x256xf32>
    %430 = tpu.matmul %429, %1, %cst_115 {dimension_numbers = #tpu.dot_dimension_numbers<[1], [0], [0], [1], [0, 0, 1, 1], [], []>} : vector<8x64xbf16>, vector<64x256xbf16>, vector<8x256xf32> -> vector<8x256xf32>
    %431 = arith.addf %272, %430 : vector<8x256xf32>
    %432 = vector.extract_strided_slice %431 {offsets = [0, 0], sizes = [8, 64], strides = [1, 1]} : vector<8x256xf32> to vector<8x64xf32>
    %433 = arith.negf %432 : vector<8x64xf32>
    %434 = math.exp %433 : vector<8x64xf32>
    %cst_116 = arith.constant 1.000000e+00 : f32
    %435 = vector.broadcast %cst_116 : f32 to vector<8x64xf32>
    %436 = arith.addf %435, %434 : vector<8x64xf32>
    %437 = arith.divf %435, %436 : vector<8x64xf32>
    %438 = vector.extract_strided_slice %431 {offsets = [0, 64], sizes = [8, 64], strides = [1, 1]} : vector<8x256xf32> to vector<8x64xf32>
    %439 = arith.negf %438 : vector<8x64xf32>
    %440 = math.exp %439 : vector<8x64xf32>
    %cst_117 = arith.constant 1.000000e+00 : f32
    %441 = vector.broadcast %cst_117 : f32 to vector<8x64xf32>
    %442 = arith.addf %441, %440 : vector<8x64xf32>
    %443 = arith.divf %441, %442 : vector<8x64xf32>
    %444 = vector.extract_strided_slice %431 {offsets = [0, 128], sizes = [8, 64], strides = [1, 1]} : vector<8x256xf32> to vector<8x64xf32>
    %445 = math.tanh %444 : vector<8x64xf32>
    %446 = vector.extract_strided_slice %431 {offsets = [0, 192], sizes = [8, 64], strides = [1, 1]} : vector<8x256xf32> to vector<8x64xf32>
    %447 = arith.negf %446 : vector<8x64xf32>
    %448 = math.exp %447 : vector<8x64xf32>
    %cst_118 = arith.constant 1.000000e+00 : f32
    %449 = vector.broadcast %cst_118 : f32 to vector<8x64xf32>
    %450 = arith.addf %449, %448 : vector<8x64xf32>
    %451 = arith.divf %449, %450 : vector<8x64xf32>
    %452 = arith.mulf %443, %415 : vector<8x64xf32>
    %453 = arith.mulf %437, %445 : vector<8x64xf32>
    %454 = arith.addf %452, %453 : vector<8x64xf32>
    %455 = math.tanh %454 : vector<8x64xf32>
    %456 = arith.mulf %451, %455 : vector<8x64xf32>
    %457 = vector.extract_strided_slice %456 {offsets = [0, 0], sizes = [8, 32], strides = [1, 1]} : vector<8x64xf32> to vector<8x32xf32>
    %458 = arith.index_cast %c4_i32_114 : i32 to index
    %c0_119 = arith.constant 0 : index
    %c0_120 = arith.constant 0 : index
    %459 = vector.load %arg18[%458, %c0_119, %c0_120] : memref<8x8x32xf32, #tpu.memory_space<vmem>>, vector<1x8x32xf32>
    %460 = vector.shape_cast %459 : vector<1x8x32xf32> to vector<8x32xf32>
    %461 = vector.shape_cast %457 : vector<8x32xf32> to vector<1x8x32xf32>
    tpu.vector_store %arg18[%458, %c0_119, %c0_120], %461 {strides = array<i32>} : memref<8x8x32xf32, #tpu.memory_space<vmem>>, vector<1x8x32xf32>,
    %462 = vector.extract_strided_slice %456 {offsets = [0, 32], sizes = [8, 32], strides = [1, 1]} : vector<8x64xf32> to vector<8x32xf32>
    %c7_i32_121 = arith.constant 7 : i32
    %463 = arith.subi %c7_i32_121, %c4_i32_114 : i32
    %464 = arith.index_cast %463 : i32 to index
    %c0_122 = arith.constant 0 : index
    %c0_123 = arith.constant 0 : index
    %465 = vector.load %arg19[%464, %c0_122, %c0_123] : memref<8x8x32xf32, #tpu.memory_space<vmem>>, vector<1x8x32xf32>
    %466 = vector.shape_cast %465 : vector<1x8x32xf32> to vector<8x32xf32>
    %467 = vector.shape_cast %462 : vector<8x32xf32> to vector<1x8x32xf32>
    tpu.vector_store %arg19[%464, %c0_122, %c0_123], %467 {strides = array<i32>} : memref<8x8x32xf32, #tpu.memory_space<vmem>>, vector<1x8x32xf32>,
    %c5_i32_124 = arith.constant 5 : i32
    %468 = arith.truncf %456 : vector<8x64xf32> to vector<8x64xbf16>
    %cst_125 = arith.constant dense<0.000000e+00> : vector<8x256xf32>
    %469 = tpu.matmul %468, %1, %cst_125 {dimension_numbers = #tpu.dot_dimension_numbers<[1], [0], [0], [1], [0, 0, 1, 1], [], []>} : vector<8x64xbf16>, vector<64x256xbf16>, vector<8x256xf32> -> vector<8x256xf32>
    %470 = arith.addf %272, %469 : vector<8x256xf32>
    %471 = vector.extract_strided_slice %470 {offsets = [0, 0], sizes = [8, 64], strides = [1, 1]} : vector<8x256xf32> to vector<8x64xf32>
    %472 = arith.negf %471 : vector<8x64xf32>
    %473 = math.exp %472 : vector<8x64xf32>
    %cst_126 = arith.constant 1.000000e+00 : f32
    %474 = vector.broadcast %cst_126 : f32 to vector<8x64xf32>
    %475 = arith.addf %474, %473 : vector<8x64xf32>
    %476 = arith.divf %474, %475 : vector<8x64xf32>
    %477 = vector.extract_strided_slice %470 {offsets = [0, 64], sizes = [8, 64], strides = [1, 1]} : vector<8x256xf32> to vector<8x64xf32>
    %478 = arith.negf %477 : vector<8x64xf32>
    %479 = math.exp %478 : vector<8x64xf32>
    %cst_127 = arith.constant 1.000000e+00 : f32
    %480 = vector.broadcast %cst_127 : f32 to vector<8x64xf32>
    %481 = arith.addf %480, %479 : vector<8x64xf32>
    %482 = arith.divf %480, %481 : vector<8x64xf32>
    %483 = vector.extract_strided_slice %470 {offsets = [0, 128], sizes = [8, 64], strides = [1, 1]} : vector<8x256xf32> to vector<8x64xf32>
    %484 = math.tanh %483 : vector<8x64xf32>
    %485 = vector.extract_strided_slice %470 {offsets = [0, 192], sizes = [8, 64], strides = [1, 1]} : vector<8x256xf32> to vector<8x64xf32>
    %486 = arith.negf %485 : vector<8x64xf32>
    %487 = math.exp %486 : vector<8x64xf32>
    %cst_128 = arith.constant 1.000000e+00 : f32
    %488 = vector.broadcast %cst_128 : f32 to vector<8x64xf32>
    %489 = arith.addf %488, %487 : vector<8x64xf32>
    %490 = arith.divf %488, %489 : vector<8x64xf32>
    %491 = arith.mulf %482, %454 : vector<8x64xf32>
    %492 = arith.mulf %476, %484 : vector<8x64xf32>
    %493 = arith.addf %491, %492 : vector<8x64xf32>
    %494 = math.tanh %493 : vector<8x64xf32>
    %495 = arith.mulf %490, %494 : vector<8x64xf32>
    %496 = vector.extract_strided_slice %495 {offsets = [0, 0], sizes = [8, 32], strides = [1, 1]} : vector<8x64xf32> to vector<8x32xf32>
    %497 = arith.index_cast %c5_i32_124 : i32 to index
    %c0_129 = arith.constant 0 : index
    %c0_130 = arith.constant 0 : index
    %498 = vector.load %arg18[%497, %c0_129, %c0_130] : memref<8x8x32xf32, #tpu.memory_space<vmem>>, vector<1x8x32xf32>
    %499 = vector.shape_cast %498 : vector<1x8x32xf32> to vector<8x32xf32>
    %500 = vector.shape_cast %496 : vector<8x32xf32> to vector<1x8x32xf32>
    tpu.vector_store %arg18[%497, %c0_129, %c0_130], %500 {strides = array<i32>} : memref<8x8x32xf32, #tpu.memory_space<vmem>>, vector<1x8x32xf32>,
    %501 = vector.extract_strided_slice %495 {offsets = [0, 32], sizes = [8, 32], strides = [1, 1]} : vector<8x64xf32> to vector<8x32xf32>
    %c7_i32_131 = arith.constant 7 : i32
    %502 = arith.subi %c7_i32_131, %c5_i32_124 : i32
    %503 = arith.index_cast %502 : i32 to index
    %c0_132 = arith.constant 0 : index
    %c0_133 = arith.constant 0 : index
    %504 = vector.load %arg19[%503, %c0_132, %c0_133] : memref<8x8x32xf32, #tpu.memory_space<vmem>>, vector<1x8x32xf32>
    %505 = vector.shape_cast %504 : vector<1x8x32xf32> to vector<8x32xf32>
    %506 = vector.shape_cast %501 : vector<8x32xf32> to vector<1x8x32xf32>
    tpu.vector_store %arg19[%503, %c0_132, %c0_133], %506 {strides = array<i32>} : memref<8x8x32xf32, #tpu.memory_space<vmem>>, vector<1x8x32xf32>,
    %c6_i32_134 = arith.constant 6 : i32
    %507 = arith.truncf %495 : vector<8x64xf32> to vector<8x64xbf16>
    %cst_135 = arith.constant dense<0.000000e+00> : vector<8x256xf32>
    %508 = tpu.matmul %507, %1, %cst_135 {dimension_numbers = #tpu.dot_dimension_numbers<[1], [0], [0], [1], [0, 0, 1, 1], [], []>} : vector<8x64xbf16>, vector<64x256xbf16>, vector<8x256xf32> -> vector<8x256xf32>
    %509 = arith.addf %272, %508 : vector<8x256xf32>
    %510 = vector.extract_strided_slice %509 {offsets = [0, 0], sizes = [8, 64], strides = [1, 1]} : vector<8x256xf32> to vector<8x64xf32>
    %511 = arith.negf %510 : vector<8x64xf32>
    %512 = math.exp %511 : vector<8x64xf32>
    %cst_136 = arith.constant 1.000000e+00 : f32
    %513 = vector.broadcast %cst_136 : f32 to vector<8x64xf32>
    %514 = arith.addf %513, %512 : vector<8x64xf32>
    %515 = arith.divf %513, %514 : vector<8x64xf32>
    %516 = vector.extract_strided_slice %509 {offsets = [0, 64], sizes = [8, 64], strides = [1, 1]} : vector<8x256xf32> to vector<8x64xf32>
    %517 = arith.negf %516 : vector<8x64xf32>
    %518 = math.exp %517 : vector<8x64xf32>
    %cst_137 = arith.constant 1.000000e+00 : f32
    %519 = vector.broadcast %cst_137 : f32 to vector<8x64xf32>
    %520 = arith.addf %519, %518 : vector<8x64xf32>
    %521 = arith.divf %519, %520 : vector<8x64xf32>
    %522 = vector.extract_strided_slice %509 {offsets = [0, 128], sizes = [8, 64], strides = [1, 1]} : vector<8x256xf32> to vector<8x64xf32>
    %523 = math.tanh %522 : vector<8x64xf32>
    %524 = vector.extract_strided_slice %509 {offsets = [0, 192], sizes = [8, 64], strides = [1, 1]} : vector<8x256xf32> to vector<8x64xf32>
    %525 = arith.negf %524 : vector<8x64xf32>
    %526 = math.exp %525 : vector<8x64xf32>
    %cst_138 = arith.constant 1.000000e+00 : f32
    %527 = vector.broadcast %cst_138 : f32 to vector<8x64xf32>
    %528 = arith.addf %527, %526 : vector<8x64xf32>
    %529 = arith.divf %527, %528 : vector<8x64xf32>
    %530 = arith.mulf %521, %493 : vector<8x64xf32>
    %531 = arith.mulf %515, %523 : vector<8x64xf32>
    %532 = arith.addf %530, %531 : vector<8x64xf32>
    %533 = math.tanh %532 : vector<8x64xf32>
    %534 = arith.mulf %529, %533 : vector<8x64xf32>
    %535 = vector.extract_strided_slice %534 {offsets = [0, 0], sizes = [8, 32], strides = [1, 1]} : vector<8x64xf32> to vector<8x32xf32>
    %536 = arith.index_cast %c6_i32_134 : i32 to index
    %c0_139 = arith.constant 0 : index
    %c0_140 = arith.constant 0 : index
    %537 = vector.load %arg18[%536, %c0_139, %c0_140] : memref<8x8x32xf32, #tpu.memory_space<vmem>>, vector<1x8x32xf32>
    %538 = vector.shape_cast %537 : vector<1x8x32xf32> to vector<8x32xf32>
    %539 = vector.shape_cast %535 : vector<8x32xf32> to vector<1x8x32xf32>
    tpu.vector_store %arg18[%536, %c0_139, %c0_140], %539 {strides = array<i32>} : memref<8x8x32xf32, #tpu.memory_space<vmem>>, vector<1x8x32xf32>,
    %540 = vector.extract_strided_slice %534 {offsets = [0, 32], sizes = [8, 32], strides = [1, 1]} : vector<8x64xf32> to vector<8x32xf32>
    %c7_i32_141 = arith.constant 7 : i32
    %541 = arith.subi %c7_i32_141, %c6_i32_134 : i32
    %542 = arith.index_cast %541 : i32 to index
    %c0_142 = arith.constant 0 : index
    %c0_143 = arith.constant 0 : index
    %543 = vector.load %arg19[%542, %c0_142, %c0_143] : memref<8x8x32xf32, #tpu.memory_space<vmem>>, vector<1x8x32xf32>
    %544 = vector.shape_cast %543 : vector<1x8x32xf32> to vector<8x32xf32>
    %545 = vector.shape_cast %540 : vector<8x32xf32> to vector<1x8x32xf32>
    tpu.vector_store %arg19[%542, %c0_142, %c0_143], %545 {strides = array<i32>} : memref<8x8x32xf32, #tpu.memory_space<vmem>>, vector<1x8x32xf32>,
    %c7_i32_144 = arith.constant 7 : i32
    %546 = arith.truncf %534 : vector<8x64xf32> to vector<8x64xbf16>
    %cst_145 = arith.constant dense<0.000000e+00> : vector<8x256xf32>
    %547 = tpu.matmul %546, %1, %cst_145 {dimension_numbers = #tpu.dot_dimension_numbers<[1], [0], [0], [1], [0, 0, 1, 1], [], []>} : vector<8x64xbf16>, vector<64x256xbf16>, vector<8x256xf32> -> vector<8x256xf32>
    %548 = arith.addf %272, %547 : vector<8x256xf32>
    %549 = vector.extract_strided_slice %548 {offsets = [0, 0], sizes = [8, 64], strides = [1, 1]} : vector<8x256xf32> to vector<8x64xf32>
    %550 = arith.negf %549 : vector<8x64xf32>
    %551 = math.exp %550 : vector<8x64xf32>
    %cst_146 = arith.constant 1.000000e+00 : f32
    %552 = vector.broadcast %cst_146 : f32 to vector<8x64xf32>
    %553 = arith.addf %552, %551 : vector<8x64xf32>
    %554 = arith.divf %552, %553 : vector<8x64xf32>
    %555 = vector.extract_strided_slice %548 {offsets = [0, 64], sizes = [8, 64], strides = [1, 1]} : vector<8x256xf32> to vector<8x64xf32>
    %556 = arith.negf %555 : vector<8x64xf32>
    %557 = math.exp %556 : vector<8x64xf32>
    %cst_147 = arith.constant 1.000000e+00 : f32
    %558 = vector.broadcast %cst_147 : f32 to vector<8x64xf32>
    %559 = arith.addf %558, %557 : vector<8x64xf32>
    %560 = arith.divf %558, %559 : vector<8x64xf32>
    %561 = vector.extract_strided_slice %548 {offsets = [0, 128], sizes = [8, 64], strides = [1, 1]} : vector<8x256xf32> to vector<8x64xf32>
    %562 = math.tanh %561 : vector<8x64xf32>
    %563 = vector.extract_strided_slice %548 {offsets = [0, 192], sizes = [8, 64], strides = [1, 1]} : vector<8x256xf32> to vector<8x64xf32>
    %564 = arith.negf %563 : vector<8x64xf32>
    %565 = math.exp %564 : vector<8x64xf32>
    %cst_148 = arith.constant 1.000000e+00 : f32
    %566 = vector.broadcast %cst_148 : f32 to vector<8x64xf32>
    %567 = arith.addf %566, %565 : vector<8x64xf32>
    %568 = arith.divf %566, %567 : vector<8x64xf32>
    %569 = arith.mulf %560, %532 : vector<8x64xf32>
    %570 = arith.mulf %554, %562 : vector<8x64xf32>
    %571 = arith.addf %569, %570 : vector<8x64xf32>
    %572 = math.tanh %571 : vector<8x64xf32>
    %573 = arith.mulf %568, %572 : vector<8x64xf32>
    %574 = vector.extract_strided_slice %573 {offsets = [0, 0], sizes = [8, 32], strides = [1, 1]} : vector<8x64xf32> to vector<8x32xf32>
    %575 = arith.index_cast %c7_i32_144 : i32 to index
    %c0_149 = arith.constant 0 : index
    %c0_150 = arith.constant 0 : index
    %576 = vector.load %arg18[%575, %c0_149, %c0_150] : memref<8x8x32xf32, #tpu.memory_space<vmem>>, vector<1x8x32xf32>
    %577 = vector.shape_cast %576 : vector<1x8x32xf32> to vector<8x32xf32>
    %578 = vector.shape_cast %574 : vector<8x32xf32> to vector<1x8x32xf32>
    tpu.vector_store %arg18[%575, %c0_149, %c0_150], %578 {strides = array<i32>} : memref<8x8x32xf32, #tpu.memory_space<vmem>>, vector<1x8x32xf32>,
    %579 = vector.extract_strided_slice %573 {offsets = [0, 32], sizes = [8, 32], strides = [1, 1]} : vector<8x64xf32> to vector<8x32xf32>
    %c7_i32_151 = arith.constant 7 : i32
    %580 = arith.subi %c7_i32_151, %c7_i32_144 : i32
    %581 = arith.index_cast %580 : i32 to index
    %c0_152 = arith.constant 0 : index
    %c0_153 = arith.constant 0 : index
    %582 = vector.load %arg19[%581, %c0_152, %c0_153] : memref<8x8x32xf32, #tpu.memory_space<vmem>>, vector<1x8x32xf32>
    %583 = vector.shape_cast %582 : vector<1x8x32xf32> to vector<8x32xf32>
    %584 = vector.shape_cast %579 : vector<8x32xf32> to vector<1x8x32xf32>
    tpu.vector_store %arg19[%581, %c0_152, %c0_153], %584 {strides = array<i32>} : memref<8x8x32xf32, #tpu.memory_space<vmem>>, vector<1x8x32xf32>,
    %c8_i32_154 = arith.constant 8 : i32
    %c0_155 = arith.constant 0 : index
    %c0_156 = arith.constant 0 : index
    %c0_157 = arith.constant 0 : index
    %585 = vector.load %arg18[%c0_155, %c0_156, %c0_157] : memref<8x8x32xf32, #tpu.memory_space<vmem>>, vector<8x8x32xf32>
    %c0_158 = arith.constant 0 : index
    %c0_159 = arith.constant 0 : index
    %c0_160 = arith.constant 0 : index
    %586 = vector.load %arg19[%c0_158, %c0_159, %c0_160] : memref<8x8x32xf32, #tpu.memory_space<vmem>>, vector<8x8x32xf32>
    %587 = tpu.concatenate %585, %586 in 2 : vector<8x8x32xf32>, vector<8x8x32xf32> -> vector<8x8x64xf32>
    %588 = vector.shape_cast %587 : vector<8x8x64xf32> to vector<64x64xf32>
    %cst_161 = arith.constant dense<0.000000e+00> : vector<64xf32>
    %589 = vector.multi_reduction <add>, %588, %cst_161 [1] : vector<64x64xf32> to vector<64xf32>
    %590 = vector.shape_cast %589 : vector<64xf32> to vector<64x1xf32>
    %cst_162 = arith.constant 6.400000e+01 : f32
    %591 = vector.broadcast %cst_162 : f32 to vector<64x1xf32>
    %592 = arith.divf %590, %591 : vector<64x1xf32>
    %593 = vector.broadcast %592 : vector<64x1xf32> to vector<64x64xf32>
    %594 = arith.subf %588, %593 : vector<64x64xf32>
    %595 = arith.mulf %594, %594 : vector<64x64xf32>
    %cst_163 = arith.constant dense<0.000000e+00> : vector<64xf32>
    %596 = vector.multi_reduction <add>, %595, %cst_163 [1] : vector<64x64xf32> to vector<64xf32>
    %597 = vector.shape_cast %596 : vector<64xf32> to vector<64x1xf32>
    %cst_164 = arith.constant 6.400000e+01 : f32
    %598 = vector.broadcast %cst_164 : f32 to vector<64x1xf32>
    %599 = arith.divf %597, %598 : vector<64x1xf32>
    %600 = vector.broadcast %592 : vector<64x1xf32> to vector<64x64xf32>
    %601 = arith.subf %588, %600 : vector<64x64xf32>
    %cst_165 = arith.constant 9.99999974E-6 : f32
    %602 = vector.broadcast %cst_165 : f32 to vector<64x1xf32>
    %603 = arith.addf %599, %602 : vector<64x1xf32>
    %604 = math.rsqrt %603 : vector<64x1xf32>
    %605 = vector.broadcast %604 : vector<64x1xf32> to vector<64x64xf32>
    %606 = arith.mulf %601, %605 : vector<64x64xf32>
    %c0_166 = arith.constant 0 : index
    %c0_167 = arith.constant 0 : index
    %607 = vector.load %arg9[%c0_166, %c0_167] : memref<1x64xf32, #tpu.memory_space<vmem>>, vector<1x64xf32>
    %608 = vector.broadcast %607 : vector<1x64xf32> to vector<64x64xf32>
    %609 = arith.mulf %606, %608 : vector<64x64xf32>
    %c0_168 = arith.constant 0 : index
    %c0_169 = arith.constant 0 : index
    %610 = vector.load %arg10[%c0_168, %c0_169] : memref<1x64xf32, #tpu.memory_space<vmem>>, vector<1x64xf32>
    %611 = vector.broadcast %610 : vector<1x64xf32> to vector<64x64xf32>
    %612 = arith.addf %609, %611 : vector<64x64xf32>
    %613 = arith.truncf %612 : vector<64x64xf32> to vector<64x64xbf16>
    %c0_170 = arith.constant 0 : index
    %c0_171 = arith.constant 0 : index
    %614 = vector.load %arg11[%c0_170, %c0_171] : memref<64x64xbf16, #tpu.memory_space<vmem>>, vector<64x64xbf16>
    %cst_172 = arith.constant dense<0.000000e+00> : vector<64x64xf32>
    %615 = tpu.matmul %613, %614, %cst_172 {dimension_numbers = #tpu.dot_dimension_numbers<[1], [0], [0], [1], [0, 0, 1, 1], [], []>} : vector<64x64xbf16>, vector<64x64xbf16>, vector<64x64xf32> -> vector<64x64xf32>
    %c0_173 = arith.constant 0 : index
    %c0_174 = arith.constant 0 : index
    %616 = vector.load %arg12[%c0_173, %c0_174] : memref<1x64xf32, #tpu.memory_space<vmem>>, vector<1x64xf32>
    %617 = vector.broadcast %616 : vector<1x64xf32> to vector<64x64xf32>
    %618 = arith.addf %615, %617 : vector<64x64xf32>
    %619 = math.tanh %618 : vector<64x64xf32>
    %620 = arith.truncf %619 : vector<64x64xf32> to vector<64x64xbf16>
    %c0_175 = arith.constant 0 : index
    %c0_176 = arith.constant 0 : index
    %621 = vector.load %arg13[%c0_175, %c0_176] : memref<64x4xbf16, #tpu.memory_space<vmem>>, vector<64x4xbf16>
    %cst_177 = arith.constant dense<0.000000e+00> : vector<64x4xf32>
    %622 = tpu.matmul %620, %621, %cst_177 {dimension_numbers = #tpu.dot_dimension_numbers<[1], [0], [0], [1], [0, 0, 1, 1], [], []>} : vector<64x64xbf16>, vector<64x4xbf16>, vector<64x4xf32> -> vector<64x4xf32>
    %c0_178 = arith.constant 0 : index
    %c0_179 = arith.constant 0 : index
    %623 = vector.load %arg14[%c0_178, %c0_179] : memref<1x4xf32, #tpu.memory_space<vmem>>, vector<1x4xf32>
    %624 = vector.broadcast %623 : vector<1x4xf32> to vector<64x4xf32>
    %625 = arith.addf %622, %624 : vector<64x4xf32>
    %626 = vector.shape_cast %625 : vector<64x4xf32> to vector<8x8x4xf32>
    %c0_180 = arith.constant 0 : index
    %c0_181 = arith.constant 0 : index
    %c0_182 = arith.constant 0 : index
    %627 = vector.load %arg15[%c0_180, %c0_181, %c0_182] : memref<8x8x4xf32, #tpu.memory_space<vmem>>, vector<8x8x4xf32>
    tpu.vector_store %arg15[%c0_180, %c0_181, %c0_182], %626 {strides = array<i32>} : memref<8x8x4xf32, #tpu.memory_space<vmem>>, vector<8x8x4xf32>,
    return
  }
}

</mosaic_0001>

<bundles_post_ra>
// kernel: bilstm_autoencoder.1
= control target key start
LH: loop header
LB: loop body
LE: loop exit
PB: predicated region body
PF: predicated region fallthrough
CT: control target
= control target key end

     0   :  { %vm122_vm0 = vcmask 1043456   ;;  %vm109_vm1 = vcmask 64512   ;;  %v2773_v32 = vmov 0   ;;  %vm245_vm10 = vcmask 523264   ;;  %s3629_s3 = inlined_call_operand.vmem [shape: bf16[64,256], index: 3, kind: input, shape index: {}]   ;;  %s3630_s1 = inlined_call_operand.vmem [shape: bf16[8,256], index: 1, kind: input, shape index: {}]   ;;  %s3631_s0 = inlined_call_operand.vmem [shape: bf16[8,8,8], index: 0, kind: input, shape index: {}]   ;;  %s3632_s2 = inlined_call_operand.vmem [shape: f32[1,256], index: 2, kind: input, shape index: {}]   ;;  %s3633_s4 = inlined_call_operand.vmem [shape: bf16[64,32], index: 4, kind: input, shape index: {}]   ;;  %s3634_s5 = inlined_call_operand.vmem [shape: f32[1,32], index: 5, kind: input, shape index: {}]   ;;  %s3635_s8 = inlined_call_operand.vmem [shape: bf16[64,256], index: 8, kind: input, shape index: {}]   ;;  %s3636_s6 = inlined_call_operand.vmem [shape: bf16[32,256], index: 6, kind: input, shape index: {}]   ;;  %s3637_s16 = inlined_call_operand.vmem [shape: f32[8,32], index: 16, kind: output, shape index: {1}]   ;;  %s3638_s7 = inlined_call_operand.vmem [shape: f32[1,256], index: 7, kind: input, shape index: {}]   ;;  %s3639_s9 = inlined_call_operand.vmem [shape: f32[1,64], index: 9, kind: input, shape index: {}]   ;;  %s3640_s10 = inlined_call_operand.vmem [shape: f32[1,64], index: 10, kind: input, shape index: {}]   ;;  %s3641_s11 = inlined_call_operand.vmem [shape: bf16[64,64], index: 11, kind: input, shape index: {}]   ;;  %s3642_s12 = inlined_call_operand.vmem [shape: f32[1,64], index: 12, kind: input, shape index: {}]   ;;  %s3643_s13 = inlined_call_operand.vmem [shape: bf16[64,4], index: 13, kind: input, shape index: {}]   ;;  %s3644_s14 = inlined_call_operand.vmem [shape: f32[1,4], index: 14, kind: input, shape index: {}]   ;;  %s3645_s15 = inlined_call_operand.vmem [shape: f32[8,8,4], index: 15, kind: output, shape index: {0}]  }
   0x1   :  { %3647 = sst [smem:[#allocation5_spill]] %s3629_s3  ;;  %v77_v2 = vld [vmem:[%s3630_s1] sm:$0xff]  ;;  %v2897_v16 = vld [vmem:[%s3631_s0 + $0x8] sm:$0xff]  ;;  %v2519_v34 = vld [vmem:[%s3631_s0 + $0x10] sm:$0xff] }
   0x2   :  { %s3648_s23 = sld [smem:[#allocation5_spill]]  ;;  %v105_v4 = vunpack.c.l.b16 %v77_v2  ;;  %v106_v7 = vunpack.c.h.b16 %v77_v2  ;;  %v2902_v18 = vld [vmem:[%s3631_s0] sm:$0xff]  ;;  %v2520_v35 = vld [vmem:[%s3631_s0 + $0x18] sm:$0xff] }
   0x3   :  { %v78_v36 = vld [vmem:[%s3632_s2] sm:$0x3]  ;;  %s2774_s2 = smov 64  }
   0x4   :  { %v107_v8 = vpack.c.b16 %v105_v4, %v105_v4  ;;  %v108_v10 = vpack.c.b16 %v106_v7, %v106_v7  ;;  %v2998_v37 = vperm.slane %v78_v36, 0  ;;  %v3018_v62 = vperm.slane %v78_v36, 1 }
   0x6   :  { %v124_v15 = vsel %vm122_vm0, %v107_v8, 0  ;;  %v127_v17 = vsel %vm122_vm0, %v108_v10, 0 }
   0x7   :  { %2537 = vmatpush.bf16.msra.mxu1 %v124_v15  ;;  %136 = vmatpush.bf16.msra.mxu0 %v124_v15 }
   0x8   :  { %v2328_v0 = vld [vmem:[%s3648_s23 + $0x30] sm:$0xf]  ;;  %v2508_v1 = vld [vmem:[%s3648_s23 + $0x34] sm:$0xf0]  ;;  %v2320_v5 = vld [vmem:[%s3648_s23 + $0x20] sm:$0xf] }
   0x9   :  { %v2871_v3 = vor.u32 %v2508_v1, %v2328_v0  ;;  %v2506_v6 = vld [vmem:[%s3648_s23 + $0x24] sm:$0xf0]  ;;  %v2312_v11 = vld [vmem:[%s3648_s23 + $0x10] sm:$0xf]  ;;  %v2504_v12 = vld [vmem:[%s3648_s23 + $0x14] sm:$0xf0] }
   0xa   :  { %v2880_v9 = vor.u32 %v2506_v6, %v2320_v5  ;;  %v2507_v13 = vld [vmem:[%s3648_s23 + $0x34] sm:$0xf]  ;;  %v2330_v14 = vld [vmem:[%s3648_s23 + $0x38] sm:$0xf0]  ;;  %v2907_v20 = vor.u32 %v2504_v12, %v2312_v11  ;;  %v2505_v21 = vld [vmem:[%s3648_s23 + $0x24] sm:$0xf]  ;;  %2295 = vmatmul.msk.bf16.vlgmr.msra.gmra.mxu1 %vm109_vm1, %v2897_v16  ;;  %2294 = vmatmul.msk.bf16.vlgmr.msra.gmra.mxu0 %vm109_vm1, %v2902_v18 }
   0xb   :  { %253 = vmatpush.bf16.msra.mxu2 %v2871_v3  ;;  %v2904_v19 = vor.u32 %v2507_v13, %v2330_v14  ;;  %165 = vmatpush.bf16.msrb.mxu1 %v127_v17  ;;  %v2322_v22 = vld [vmem:[%s3648_s23 + $0x28] sm:$0xf0]  ;;  %v2304_v23 = vld [vmem:[%s3648_s23] sm:$0xf]  ;;  %v2502_v24 = vld [vmem:[%s3648_s23 + $0x4] sm:$0xf0] }
   0xc   :  { %597 = vmatpush.bf16.msrb.mxu0 %v2871_v3  ;;  %v2927_v25 = vor.u32 %v2505_v21, %v2322_v22  ;;  %v2931_v26 = vor.u32 %v2502_v24, %v2304_v23  ;;  %v2503_v27 = vld [vmem:[%s3648_s23 + $0x14] sm:$0xf]  ;;  %v2314_v28 = vld [vmem:[%s3648_s23 + $0x18] sm:$0xf0]  ;;  %v2501_v30 = vld [vmem:[%s3648_s23 + $0x4] sm:$0xf] }
   0xd   :  { %352 = vmatpush.bf16.msra.mxu3 %v2904_v19  ;;  %v2941_v29 = vor.u32 %v2503_v27, %v2314_v28  ;;  %v2306_v31 = vld [vmem:[%s3648_s23 + $0x8] sm:$0xf0] }
   0xe   :  { %v2955_v33 = vor.u32 %v2501_v30, %v2306_v31 }
   0xf   :  { %254 = vmatpush.bf16.msra.mxu2 %v2880_v9  ;;  %782 = vmatpush.bf16.msra.mxu1 %v2904_v19 }
  0x10   :  { %598 = vmatpush.bf16.msrb.mxu0 %v2880_v9 }
  0x11   :  { %353 = vmatpush.bf16.msra.mxu3 %v2927_v25 }
  0x13   :  { %255 = vmatpush.bf16.msra.mxu2 %v2907_v20  ;;  %783 = vmatpush.bf16.msra.mxu1 %v2927_v25 }
  0x14   :  { %599 = vmatpush.bf16.msrb.mxu0 %v2907_v20 }
  0x15   :  { %354 = vmatpush.bf16.msra.mxu3 %v2941_v29 }
  0x17   :  { %256 = vmatpush.bf16.msra.mxu2 %v2931_v26  ;;  %784 = vmatpush.bf16.msra.mxu1 %v2941_v29 }
  0x18   :  { %600 = vmatpush.bf16.msrb.mxu0 %v2931_v26 }
  0x19   :  { %355 = vmatpush.bf16.msra.mxu3 %v2955_v33 }
  0x1a   :  { %257 = vmatmul.bf16.vlgmr.msra.gmra.mxu2 %v2773_v32  ;;  %2296 = vmatmul.msk.bf16.gmra.mxu1 %vm109_vm1, %v2519_v34 }
  0x1b   :  { %266 = vmatpush.bf16.msrb.mxu2 %v2904_v19  ;;  %785 = vmatpush.bf16.msra.mxu1 %v2955_v33 }
  0x1c   :  { %610 = vmatpush.bf16.msra.mxu0 %v2904_v19 }
  0x1d   :  { %438 = vmatpush.bf16.msrb.mxu3 %v2904_v19 }
  0x1f   :  { %267 = vmatpush.bf16.msrb.mxu2 %v2927_v25 }
  0x20   :  { %611 = vmatpush.bf16.msra.mxu0 %v2927_v25 }
  0x21   :  { %439 = vmatpush.bf16.msrb.mxu3 %v2927_v25 }
  0x23   :  { %268 = vmatpush.bf16.msrb.mxu2 %v2941_v29 }
  0x24   :  { %612 = vmatpush.bf16.msra.mxu0 %v2941_v29 }
  0x25   :  { %440 = vmatpush.bf16.msrb.mxu3 %v2941_v29 }
  0x27   :  { %269 = vmatpush.bf16.msrb.mxu2 %v2955_v33 }
  0x28   :  { %613 = vmatpush.bf16.msra.mxu0 %v2955_v33 }
  0x29   :  { %441 = vmatpush.bf16.msrb.mxu3 %v2955_v33 }
  0x2a   :  { %270 = vmatmul.bf16.vlgmr.msrb.gmra.mxu2 %v2773_v32  ;;  %2297 = vmatmul.msk.bf16.gmra.mxu1 %vm109_vm1, %v2520_v35 }
  0x2b   :  { %339 = vmatpush.bf16.msra.mxu2 %v2871_v3 }
  0x2f   :  { %340 = vmatpush.bf16.msra.mxu2 %v2880_v9 }
  0x33   :  { %341 = vmatpush.bf16.msra.mxu2 %v2907_v20 }
  0x37   :  { %342 = vmatpush.bf16.msra.mxu2 %v2931_v26 }
  0x3a   :  { %2298 = vmatmul.msk.bf16.vlgmr.msrb.gmra.mxu1 %vm109_vm1, %v2902_v18 }
  0x3b   :  { %425 = vmatpush.bf16.msrb.mxu2 %v2871_v3 }
  0x3f   :  { %426 = vmatpush.bf16.msrb.mxu2 %v2880_v9 }
  0x43   :  { %427 = vmatpush.bf16.msrb.mxu2 %v2907_v20 }
  0x47   :  { %428 = vmatpush.bf16.msrb.mxu2 %v2931_v26 }
  0x4a   :  { %2299 = vmatmul.msk.bf16.gmra.mxu1 %vm109_vm1, %v2897_v16 }
  0x5a   :  { %2300 = vmatmul.msk.bf16.gmra.mxu1 %vm109_vm1, %v2519_v34 }
  0x6a   :  { %2301 = vmatmul.msk.bf16.gmra.mxu1 %vm109_vm1, %v2520_v35 }
  0x87   :  { %v143_v38 = vpop.f32.mrf.mxu1  ;;  %v138_v41 = vpop.f32.mrf.mxu0 }
  0x88   :  { %v3001_v39 = vadd.f32 %v143_v38, %v2998_v37  ;;  %v139_v42 = vadd.f32 %v138_v41, %v2998_v37 }
  0x8f   :  { %v3003_v40 = vpop.f32.mrf.mxu1 }
  0x97   :  { %v148_v44 = vpop.f32.mrf.mxu1 }
  0x98   :  { %v3007_v46 = vadd.f32 %v148_v44, %v2998_v37 }
  0x9d   :  { %v258_v43 = vpop.f32.mrf.mxu2 }
  0x9e   :  { %v275_v45 = vadd.f32 %v258_v43, %v139_v42  ;;  %v140_v43 = vpop.f32.mrf.mxu0 }
  0x9f   :  { %v150_v49 = vpop.f32.mrf.mxu1  ;;  %v141_v44 = vadd.f32 %v140_v43, %v2998_v37 }
  0xa0   :  { %v2334_v47 = vmul.f32 -1.442695, %v275_v45  ;;  %v3010_v50 = vadd.f32 %v150_v49, %v2998_v37 }
  0xa2   :  { %2547 = vpow2.f32 %v2334_v47 }
  0xa5   :  { %v260_v48 = vpop.f32.mrf.mxu2 }
  0xa7   :  { %v153_v54 = vpop.f32.mrf.mxu1 }
  0xa8   :  { %v2548_v51 = vpop.eup %2547  ;;  %v3013_v55 = vadd.f32 %v153_v54, %v2998_v37 }
  0xa9   :  { %v280_v52 = vadd.f32 1.0, %v2548_v51 }
  0xab   :  { %2549 = vrcp.f32 %v280_v52  ;;  %vm286_vm2 = vweird.f32 %v280_v52  ;;  %v292_v4 = vand.u32 2147483648, %v280_v52  ;;  %v290_v6 = vand.u32 2147483647, %v280_v52 }
  0xad   :  { %v271_v53 = vpop.f32.mrf.mxu2  ;;  %v293_v7 = vor.u32 1.1754944e-38, %v292_v4  ;;  %vm291_vm5 = vcmp.eq.f32.partialorder %v290_v6, 8.507059e+37 }
  0xaf   :  { %v155_v58 = vpop.f32.mrf.mxu1 }
  0xb0   :  { %v3016_v60 = vadd.f32 %v155_v58, %v2998_v37 }
  0xb1   :  { %v2550_v56 = vpop.eup %2549 }
  0xb2   :  { %v282_v59 = vmul.f32 %v2550_v56, %v280_v52  ;;  %vm287_vm3 = vweird.f32 %v2550_v56 }
  0xb3   :  { %vm288_vm4 = vmor %vm286_vm2, %vm287_vm3 }
  0xb4   :  { %v283_v61 = vsub.f32 1.0, %v282_v59 }
  0xb5   :  { %v273_v57 = vpop.f32.mrf.mxu2 }
  0xb6   :  { %v284_v0 = vmul.f32 %v2550_v56, %v283_v61 }
  0xb7   :  { %v167_v63 = vpop.f32.mrf.mxu1 }
  0xb8   :  { %v168_v1 = vadd.f32 %v167_v63, %v3018_v62  ;;  %v285_v5 = vadd.f32 %v2550_v56, %v284_v0 }
  0xba   :  { %v276_v2 = vadd.f32 %v271_v53, %v168_v1  ;;  %v289_v8 = vsel %vm288_vm4, %v2550_v56, %v285_v5 }
  0xbb   :  { %v294_v11 = vsel %vm291_vm5, %v293_v7, %v289_v8 }
  0xbc   :  { %2551 = vtanh.f32 %v276_v2  ;;  %v2335_v13 = vmul.f32 -1.442695, %v276_v2  ;;  %v316_v22 = vmul.f32 0.0, %v294_v11 }
  0xbe   :  { %2553 = vpow2.f32 %v2335_v13 }
  0xbf   :  { %v169_v56 = vpop.f32.mrf.mxu1 }
  0xc0   :  { %v170_v57 = vadd.f32 %v169_v56, %v3018_v62 }
  0xc2   :  { %v2552_v10 = vpop.eup %2551 }
  0xc3   :  { %v317_v12 = vmul.f32 %v2552_v10, %v294_v11 }
  0xc4   :  { %v2554_v14 = vpop.eup %2553 }
  0xc5   :  { %319 = vrot.lane.b32.xlu0 %v317_v12, %s2774_s2  ;;  %v300_v15 = vadd.f32 1.0, %v2554_v14 }
  0xc7   :  { %2555 = vrcp.f32 %v300_v15  ;;  %v312_v28 = vand.u32 2147483648, %v300_v15  ;;  %vm306_vm7 = vweird.f32 %v300_v15  ;;  %v310_v30 = vand.u32 2147483647, %v300_v15 }
  0xc9   :  { %v313_v34 = vor.u32 1.1754944e-38, %v312_v28  ;;  %vm311_vm9 = vcmp.eq.f32.partialorder %v310_v30, 8.507059e+37 }
  0xcd   :  { %v2556_v16 = vpop.eup %2555 }
  0xce   :  { %v302_v17 = vmul.f32 %v2556_v16, %v300_v15  ;;  %vm307_vm6 = vweird.f32 %v2556_v16 }
  0xcf   :  { %vm308_vm8 = vmor %vm306_vm7, %vm307_vm6 }
  0xd0   :  { %v303_v18 = vsub.f32 1.0, %v302_v17 }
  0xd2   :  { %v304_v21 = vmul.f32 %v2556_v16, %v303_v18 }
  0xd4   :  { %v305_v27 = vadd.f32 %v2556_v16, %v304_v21 }
  0xd6   :  { %v309_v31 = vsel %vm308_vm8, %v2556_v16, %v305_v27 }
  0xd7   :  { %v314_v36 = vsel %vm311_vm9, %v313_v34, %v309_v31 }
 0x137   :  { %v320_v23 = vpop.permute.xlu0 %319 }
 0x138   :  { %v3022_v24 = vadd.f32 %v320_v23, %v316_v22 }
 0x13a   :  { %2557 = vtanh.f32 %v3022_v24 }
 0x140   :  { %v2558_v35 = vpop.eup %2557 }
 0x141   :  { %v324_v38 = vmul.f32 %v2558_v35, %v314_v36 }
 0x143   :  { %v328_v41 = vpack.c.bf16 %v324_v38, %v324_v38 }
 0x145   :  { %330 = vrot.lane.b32.xlu0 %v328_v41, %s2774_s2 }
 0x1b7   :  { %v331_v42 = vpop.permute.xlu0 %330 }
 0x1b8   :  { %2336 = vmatmul.msk.bf16.vlgmr.msra.gmra.mxu2 %vm245_vm10, %v331_v42  ;;  %2337 = vmatmul.msk.bf16.vlgmr.msra.gmra.mxu3 %vm245_vm10, %v331_v42 }
 0x1b9   :  { %511 = vmatpush.bf16.msra.mxu2 %v2871_v3  ;;  %524 = vmatpush.bf16.msra.mxu3 %v2904_v19 }
 0x1bd   :  { %512 = vmatpush.bf16.msra.mxu2 %v2880_v9  ;;  %525 = vmatpush.bf16.msra.mxu3 %v2927_v25 }
 0x1c1   :  { %513 = vmatpush.bf16.msra.mxu2 %v2907_v20  ;;  %526 = vmatpush.bf16.msra.mxu3 %v2941_v29 }
 0x1c5   :  { %514 = vmatpush.bf16.msra.mxu2 %v2931_v26  ;;  %527 = vmatpush.bf16.msra.mxu3 %v2955_v33 }
 0x23b   :  { %v344_v45 = vpop.f32.mrf.mxu2  ;;  %v357_v47 = vpop.f32.mrf.mxu3 }
 0x23c   :  { %v361_v48 = vadd.f32 %v344_v45, %v141_v44  ;;  %v362_v59 = vadd.f32 %v357_v47, %v170_v57 }
 0x23e   :  { %v2338_v49 = vmul.f32 -1.442695, %v361_v48  ;;  %v2339_v11 = vmul.f32 -1.442695, %v362_v59 }
 0x240   :  { %2559 = vpow2.f32 %v2338_v49 }
 0x243   :  { %v346_v51 = vpop.f32.mrf.mxu2  ;;  %v359_v52 = vpop.f32.mrf.mxu3 }
 0x244   :  { %v172_v51 = vpop.f32.mrf.mxu1 }
 0x245   :  { %v173_v52 = vadd.f32 %v172_v51, %v3018_v62 }
 0x246   :  { %v2560_v53 = vpop.eup %2559 }
 0x247   :  { %v366_v54 = vadd.f32 1.0, %v2560_v53 }
 0x249   :  { %2561 = vrcp.f32 %v366_v54  ;;  %v378_v0 = vand.u32 2147483648, %v366_v54  ;;  %v376_v2 = vand.u32 2147483647, %v366_v54  ;;  %vm372_vm12 = vweird.f32 %v366_v54 }
 0x24a   :  { %2563 = vtanh.f32 %v362_v59 }
 0x24b   :  { %v379_v5 = vor.u32 1.1754944e-38, %v378_v0  ;;  %vm377_vm14 = vcmp.eq.f32.partialorder %v376_v2, 8.507059e+37  ;;  %2565 = vpow2.f32 %v2339_v11 }
 0x24f   :  { %v2562_v58 = vpop.eup %2561 }
 0x250   :  { %v368_v61 = vmul.f32 %v2562_v58, %v366_v54  ;;  %vm373_vm11 = vweird.f32 %v2562_v58  ;;  %v2564_v7 = vpop.eup %2563 }
 0x251   :  { %vm374_vm13 = vmor %vm372_vm12, %vm373_vm11  ;;  %v2566_v12 = vpop.eup %2565 }
 0x252   :  { %v369_v63 = vsub.f32 1.0, %v368_v61  ;;  %v386_v13 = vadd.f32 1.0, %v2566_v12 }
 0x254   :  { %v370_v1 = vmul.f32 %v2562_v58, %v369_v63  ;;  %2567 = vrcp.f32 %v386_v13  ;;  %v398_v27 = vand.u32 2147483648, %v386_v13  ;;  %vm392_vm0 = vweird.f32 %v386_v13 }
 0x255   :  { %v396_v28 = vand.u32 2147483647, %v386_v13 }
 0x256   :  { %v371_v4 = vadd.f32 %v2562_v58, %v370_v1  ;;  %v399_v31 = vor.u32 1.1754944e-38, %v398_v27 }
 0x257   :  { %vm397_vm2 = vcmp.eq.f32.partialorder %v396_v28, 8.507059e+37 }
 0x258   :  { %v375_v6 = vsel %vm374_vm13, %v2562_v58, %v371_v4 }
 0x259   :  { %v380_v8 = vsel %vm377_vm14, %v379_v5, %v375_v6 }
 0x25a   :  { %v403_v10 = vmul.f32 %v2564_v7, %v380_v8  ;;  %v2568_v14 = vpop.eup %2567  ;;  %v402_v18 = vmul.f32 %v380_v8, %v3022_v24 }
 0x25b   :  { %v388_v15 = vmul.f32 %v2568_v14, %v386_v13  ;;  %vm393_vm15 = vweird.f32 %v2568_v14 }
 0x25c   :  { %405 = vrot.lane.b32.xlu1 %v403_v10, %s2774_s2  ;;  %vm394_vm1 = vmor %vm392_vm0, %vm393_vm15 }
 0x25d   :  { %v389_v16 = vsub.f32 1.0, %v388_v15 }
 0x25f   :  { %v390_v17 = vmul.f32 %v2568_v14, %v389_v16 }
 0x261   :  { %v391_v23 = vadd.f32 %v2568_v14, %v390_v17 }
 0x263   :  { %v395_v30 = vsel %vm394_vm1, %v2568_v14, %v391_v23 }
 0x264   :  { %v400_v35 = vsel %vm397_vm2, %v399_v31, %v395_v30 }
 0x2ce   :  { %v406_v21 = vpop.permute.xlu1 %405 }
 0x2cf   :  { %v3040_v22 = vadd.f32 %v406_v21, %v402_v18 }
 0x2d1   :  { %2569 = vtanh.f32 %v3040_v22 }
 0x2d7   :  { %v2570_v34 = vpop.eup %2569 }
 0x2d8   :  { %v410_v36 = vmul.f32 %v2570_v34, %v400_v35  ;;  %v146_v34 = vadd.f32 %v3003_v40, %v2998_v37 }
 0x2da   :  { %v414_v38 = vpack.c.bf16 %v410_v36, %v410_v36 }
 0x2dc   :  { %416 = vrot.lane.b32.xlu1 %v414_v38, %s2774_s2 }
 0x34e   :  { %v417_v24 = vpop.permute.xlu1 %416 }
 0x34f   :  { %2340 = vmatmul.msk.bf16.vlgmr.msrb.gmra.mxu2 %vm245_vm10, %v417_v24  ;;  %2341 = vmatmul.msk.bf16.vlgmr.msrb.gmra.mxu3 %vm245_vm10, %v417_v24 }
 0x350   :  { %683 = vmatpush.bf16.msrb.mxu2 %v2871_v3  ;;  %696 = vmatpush.bf16.msrb.mxu3 %v2904_v19 }
 0x354   :  { %684 = vmatpush.bf16.msrb.mxu2 %v2880_v9  ;;  %697 = vmatpush.bf16.msrb.mxu3 %v2927_v25 }
 0x358   :  { %685 = vmatpush.bf16.msrb.mxu2 %v2907_v20  ;;  %698 = vmatpush.bf16.msrb.mxu3 %v2941_v29 }
 0x35c   :  { %686 = vmatpush.bf16.msrb.mxu2 %v2931_v26  ;;  %699 = vmatpush.bf16.msrb.mxu3 %v2955_v33 }
 0x3d2   :  { %v430_v41 = vpop.f32.mrf.mxu2  ;;  %v443_v42 = vpop.f32.mrf.mxu3 }
 0x3d3   :  { %v447_v43 = vadd.f32 %v430_v41, %v3001_v39  ;;  %v448_v54 = vadd.f32 %v443_v42, %v173_v52 }
 0x3d5   :  { %v2342_v44 = vmul.f32 -1.442695, %v447_v43  ;;  %v2343_v5 = vmul.f32 -1.442695, %v448_v54  ;;  %v174_v43 = vpop.f32.mrf.mxu1 }
 0x3d7   :  { %2571 = vpow2.f32 %v2342_v44 }
 0x3da   :  { %v432_v45 = vpop.f32.mrf.mxu2  ;;  %v445_v47 = vpop.f32.mrf.mxu3 }
 0x3dd   :  { %v2572_v48 = vpop.eup %2571 }
 0x3de   :  { %v452_v49 = vadd.f32 1.0, %v2572_v48 }
 0x3e0   :  { %2573 = vrcp.f32 %v452_v49  ;;  %v464_v58 = vand.u32 2147483648, %v452_v49  ;;  %v462_v61 = vand.u32 2147483647, %v452_v49  ;;  %vm458_vm4 = vweird.f32 %v452_v49 }
 0x3e1   :  { %2575 = vtanh.f32 %v448_v54 }
 0x3e2   :  { %v465_v63 = vor.u32 1.1754944e-38, %v464_v58  ;;  %vm463_vm6 = vcmp.eq.f32.partialorder %v462_v61, 8.507059e+37  ;;  %2577 = vpow2.f32 %v2343_v5 }
 0x3e6   :  { %v2574_v53 = vpop.eup %2573 }
 0x3e7   :  { %v454_v56 = vmul.f32 %v2574_v53, %v452_v49  ;;  %vm459_vm3 = vweird.f32 %v2574_v53  ;;  %v2576_v1 = vpop.eup %2575 }
 0x3e8   :  { %vm460_vm5 = vmor %vm458_vm4, %vm459_vm3  ;;  %v2578_v6 = vpop.eup %2577 }
 0x3e9   :  { %v455_v57 = vsub.f32 1.0, %v454_v56  ;;  %v472_v7 = vadd.f32 1.0, %v2578_v6 }
 0x3eb   :  { %v456_v59 = vmul.f32 %v2574_v53, %v455_v57  ;;  %2579 = vrcp.f32 %v472_v7  ;;  %v484_v17 = vand.u32 2147483648, %v472_v7  ;;  %vm478_vm8 = vweird.f32 %v472_v7 }
 0x3ec   :  { %v482_v18 = vand.u32 2147483647, %v472_v7 }
 0x3ed   :  { %v457_v39 = vadd.f32 %v2574_v53, %v456_v59  ;;  %v485_v23 = vor.u32 1.1754944e-38, %v484_v17 }
 0x3ee   :  { %vm483_vm11 = vcmp.eq.f32.partialorder %v482_v18, 8.507059e+37 }
 0x3ef   :  { %v461_v0 = vsel %vm460_vm5, %v2574_v53, %v457_v39 }
 0x3f0   :  { %v466_v2 = vsel %vm463_vm6, %v465_v63, %v461_v0 }
 0x3f1   :  { %v489_v4 = vmul.f32 %v2576_v1, %v466_v2  ;;  %v2580_v8 = vpop.eup %2579  ;;  %v488_v13 = vmul.f32 %v466_v2, %v3040_v22 }
 0x3f2   :  { %v474_v10 = vmul.f32 %v2580_v8, %v472_v7  ;;  %vm479_vm7 = vweird.f32 %v2580_v8 }
 0x3f3   :  { %491 = vrot.lane.b32.xlu2 %v489_v4, %s2774_s2  ;;  %vm480_vm9 = vmor %vm478_vm8, %vm479_vm7 }
 0x3f4   :  { %v475_v11 = vsub.f32 1.0, %v474_v10 }
 0x3f6   :  { %v476_v12 = vmul.f32 %v2580_v8, %v475_v11 }
 0x3f8   :  { %v477_v16 = vadd.f32 %v2580_v8, %v476_v12 }
 0x3fa   :  { %v481_v21 = vsel %vm480_vm9, %v2580_v8, %v477_v16 }
 0x3fb   :  { %v486_v28 = vsel %vm483_vm11, %v485_v23, %v481_v21 }
 0x44d   :  { %v492_v14 = vpop.permute.xlu2 %491 }
 0x44e   :  { %v3058_v15 = vadd.f32 %v492_v14, %v488_v13 }
 0x450   :  { %2581 = vtanh.f32 %v3058_v15 }
 0x456   :  { %v2582_v27 = vpop.eup %2581 }
 0x457   :  { %v496_v30 = vmul.f32 %v2582_v27, %v486_v28  ;;  %v177_v28 = vpop.f32.mrf.mxu1 }
 0x459   :  { %v500_v31 = vpack.c.bf16 %v496_v30, %v496_v30 }
 0x45b   :  { %502 = vrot.lane.b32.xlu2 %v500_v31, %s2774_s2 }
 0x4b5   :  { %v503_v22 = vpop.permute.xlu2 %502 }
 0x4b6   :  { %2344 = vmatmul.msk.bf16.vlgmr.msra.gmra.mxu2 %vm245_vm10, %v503_v22  ;;  %2345 = vmatmul.msk.bf16.vlgmr.msra.gmra.mxu3 %vm245_vm10, %v503_v22 }
 0x4b7   :  { %855 = vmatpush.bf16.msra.mxu2 %v2871_v3  ;;  %868 = vmatpush.bf16.msra.mxu3 %v2904_v19 }
 0x4bb   :  { %856 = vmatpush.bf16.msra.mxu2 %v2880_v9  ;;  %869 = vmatpush.bf16.msra.mxu3 %v2927_v25 }
 0x4bf   :  { %857 = vmatpush.bf16.msra.mxu2 %v2907_v20  ;;  %870 = vmatpush.bf16.msra.mxu3 %v2941_v29  ;;  %v175_v29 = vadd.f32 %v174_v43, %v3018_v62 }
 0x4c3   :  { %858 = vmatpush.bf16.msra.mxu2 %v2931_v26  ;;  %871 = vmatpush.bf16.msra.mxu3 %v2955_v33 }
 0x539   :  { %v516_v35 = vpop.f32.mrf.mxu2  ;;  %v529_v36 = vpop.f32.mrf.mxu3 }
 0x53a   :  { %v533_v38 = vadd.f32 %v516_v35, %v146_v34  ;;  %v534_v45 = vadd.f32 %v529_v36, %v175_v29 }
 0x53c   :  { %v2346_v24 = vmul.f32 -1.442695, %v533_v38  ;;  %v2347_v57 = vmul.f32 -1.442695, %v534_v45 }
 0x53e   :  { %2583 = vpow2.f32 %v2346_v24 }
 0x541   :  { %v518_v19 = vpop.f32.mrf.mxu2  ;;  %v531_v41 = vpop.f32.mrf.mxu3 }
 0x544   :  { %v2584_v42 = vpop.eup %2583 }
 0x545   :  { %v538_v25 = vadd.f32 1.0, %v2584_v42 }
 0x547   :  { %2585 = vrcp.f32 %v538_v25  ;;  %v550_v48 = vand.u32 2147483648, %v538_v25  ;;  %v548_v40 = vand.u32 2147483647, %v538_v25  ;;  %vm544_vm13 = vweird.f32 %v538_v25 }
 0x548   :  { %2587 = vtanh.f32 %v534_v45 }
 0x549   :  { %v551_v51 = vor.u32 1.1754944e-38, %v550_v48  ;;  %vm549_vm15 = vcmp.eq.f32.partialorder %v548_v40, 8.507059e+37  ;;  %2589 = vpow2.f32 %v2347_v57 }
 0x54d   :  { %v2586_v44 = vpop.eup %2585 }
 0x54e   :  { %v540_v47 = vmul.f32 %v2586_v44, %v538_v25  ;;  %vm545_vm12 = vweird.f32 %v2586_v44  ;;  %v2588_v53 = vpop.eup %2587 }
 0x54f   :  { %vm546_vm14 = vmor %vm544_vm13, %vm545_vm12  ;;  %v2590_v58 = vpop.eup %2589 }
 0x550   :  { %v541_v33 = vsub.f32 1.0, %v540_v47  ;;  %v558_v59 = vadd.f32 1.0, %v2590_v58 }
 0x552   :  { %v542_v37 = vmul.f32 %v2586_v44, %v541_v33  ;;  %2591 = vrcp.f32 %v558_v59  ;;  %v570_v6 = vand.u32 2147483648, %v558_v59  ;;  %vm564_vm1 = vweird.f32 %v558_v59 }
 0x553   :  { %v568_v7 = vand.u32 2147483647, %v558_v59 }
 0x554   :  { %v543_v49 = vadd.f32 %v2586_v44, %v542_v37  ;;  %v571_v10 = vor.u32 1.1754944e-38, %v570_v6 }
 0x555   :  { %vm569_vm3 = vcmp.eq.f32.partialorder %v568_v7, 8.507059e+37  ;;  %v179_v7 = vpop.f32.mrf.mxu1 }
 0x556   :  { %v547_v52 = vsel %vm546_vm14, %v2586_v44, %v543_v49 }
 0x557   :  { %v552_v54 = vsel %vm549_vm15, %v551_v51, %v547_v52 }
 0x558   :  { %v575_v56 = vmul.f32 %v2588_v53, %v552_v54  ;;  %v2592_v61 = vpop.eup %2591  ;;  %v574_v1 = vmul.f32 %v552_v54, %v3058_v15 }
 0x559   :  { %v560_v39 = vmul.f32 %v2592_v61, %v558_v59  ;;  %vm565_vm0 = vweird.f32 %v2592_v61 }
 0x55a   :  { %577 = vrot.lane.b32.xlu0 %v575_v56, %s2774_s2  ;;  %vm566_vm2 = vmor %vm564_vm1, %vm565_vm0 }
 0x55b   :  { %v561_v63 = vsub.f32 1.0, %v560_v39 }
 0x55d   :  { %v562_v0 = vmul.f32 %v2592_v61, %v561_v63 }
 0x55f   :  { %v563_v5 = vadd.f32 %v2592_v61, %v562_v0 }
 0x561   :  { %v567_v8 = vsel %vm566_vm2, %v2592_v61, %v563_v5 }
 0x562   :  { %v572_v12 = vsel %vm569_vm3, %v571_v10, %v567_v8  ;;  %v180_v8 = vadd.f32 %v179_v7, %v3018_v62 }
 0x5cc   :  { %v578_v2 = vpop.permute.xlu0 %577 }
 0x5cd   :  { %v3077_v4 = vadd.f32 %v578_v2, %v574_v1 }
 0x5cf   :  { %2593 = vtanh.f32 %v3077_v4 }
 0x5d5   :  { %v2594_v11 = vpop.eup %2593 }
 0x5d6   :  { %v582_v13 = vmul.f32 %v2594_v11, %v572_v12 }
 0x5d8   :  { %v586_v14 = vpack.c.bf16 %v582_v13, %v582_v13 }
 0x5da   :  { %588 = vrot.lane.b32.xlu1 %v586_v14, %s2774_s2 }
 0x64c   :  { %v589_v15 = vpop.permute.xlu1 %588 }
 0x64d   :  { %2348 = vmatmul.msk.bf16.vlgmr.msrb.gmra.mxu0 %vm245_vm10, %v589_v15 }
 0x64e   :  { %769 = vmatpush.bf16.msrb.mxu0 %v2871_v3  ;;  %v178_v3 = vadd.f32 %v177_v28, %v3018_v62 }
 0x652   :  { %770 = vmatpush.bf16.msrb.mxu0 %v2880_v9 }
 0x656   :  { %771 = vmatpush.bf16.msrb.mxu0 %v2907_v20 }
 0x65a   :  { %772 = vmatpush.bf16.msrb.mxu0 %v2931_v26 }
 0x65d   :  { %2349 = vmatmul.msk.bf16.vlgmr.msra.gmra.mxu0 %vm245_vm10, %v589_v15 }
 0x6ca   :  { %v602_v16 = vpop.f32.mrf.mxu0 }
 0x6cb   :  { %v619_v17 = vadd.f32 %v602_v16, %v3007_v46 }
 0x6cd   :  { %v2350_v18 = vmul.f32 -1.442695, %v619_v17 }
 0x6cf   :  { %2595 = vpow2.f32 %v2350_v18 }
 0x6d2   :  { %v604_v21 = vpop.f32.mrf.mxu0 }
 0x6d5   :  { %v2596_v23 = vpop.eup %2595 }
 0x6d6   :  { %v624_v27 = vadd.f32 1.0, %v2596_v23 }
 0x6d8   :  { %2597 = vrcp.f32 %v624_v27  ;;  %v636_v34 = vand.u32 2147483648, %v624_v27  ;;  %v634_v46 = vand.u32 2147483647, %v624_v27  ;;  %vm630_vm5 = vweird.f32 %v624_v27 }
 0x6da   :  { %v615_v30 = vpop.f32.mrf.mxu0  ;;  %v637_v38 = vor.u32 1.1754944e-38, %v636_v34  ;;  %vm635_vm7 = vcmp.eq.f32.partialorder %v634_v46, 8.507059e+37 }
 0x6db   :  { %v620_v31 = vadd.f32 %v615_v30, %v178_v3 }
 0x6dd   :  { %2599 = vtanh.f32 %v620_v31  ;;  %v2351_v25 = vmul.f32 -1.442695, %v620_v31 }
 0x6de   :  { %v2598_v9 = vpop.eup %2597 }
 0x6df   :  { %v626_v20 = vmul.f32 %v2598_v9, %v624_v27  ;;  %vm631_vm4 = vweird.f32 %v2598_v9  ;;  %2601 = vpow2.f32 %v2351_v25 }
 0x6e0   :  { %vm632_vm6 = vmor %vm630_vm5, %vm631_vm4 }
 0x6e1   :  { %v627_v22 = vsub.f32 1.0, %v626_v20 }
 0x6e2   :  { %v617_v26 = vpop.f32.mrf.mxu0 }
 0x6e3   :  { %v628_v35 = vmul.f32 %v2598_v9, %v627_v22  ;;  %v2600_v19 = vpop.eup %2599 }
 0x6e5   :  { %v629_v36 = vadd.f32 %v2598_v9, %v628_v35  ;;  %v2602_v43 = vpop.eup %2601 }
 0x6e6   :  { %v644_v29 = vadd.f32 1.0, %v2602_v43 }
 0x6e7   :  { %v633_v24 = vsel %vm632_vm6, %v2598_v9, %v629_v36 }
 0x6e8   :  { %v638_v41 = vsel %vm635_vm7, %v637_v38, %v633_v24  ;;  %2603 = vrcp.f32 %v644_v29  ;;  %v656_v51 = vand.u32 2147483648, %v644_v29  ;;  %vm650_vm9 = vweird.f32 %v644_v29 }
 0x6e9   :  { %v661_v42 = vmul.f32 %v2600_v19, %v638_v41  ;;  %v660_v48 = vmul.f32 %v638_v41, %v3077_v4  ;;  %v654_v52 = vand.u32 2147483647, %v644_v29 }
 0x6ea   :  { %v657_v54 = vor.u32 1.1754944e-38, %v656_v51 }
 0x6eb   :  { %663 = vrot.lane.b32.xlu2 %v661_v42, %s2774_s2  ;;  %vm655_vm12 = vcmp.eq.f32.partialorder %v654_v52, 8.507059e+37 }
 0x6ee   :  { %v2604_v44 = vpop.eup %2603 }
 0x6ef   :  { %v646_v45 = vmul.f32 %v2604_v44, %v644_v29  ;;  %vm651_vm8 = vweird.f32 %v2604_v44 }
 0x6f0   :  { %vm652_vm11 = vmor %vm650_vm9, %vm651_vm8 }
 0x6f1   :  { %v647_v47 = vsub.f32 1.0, %v646_v45 }
 0x6f3   :  { %v648_v33 = vmul.f32 %v2604_v44, %v647_v47 }
 0x6f5   :  { %v649_v49 = vadd.f32 %v2604_v44, %v648_v33 }
 0x6f7   :  { %v653_v53 = vsel %vm652_vm11, %v2604_v44, %v649_v49  ;;  %v182_v44 = vpop.f32.mrf.mxu1 }
 0x6f8   :  { %v658_v57 = vsel %vm655_vm12, %v657_v54, %v653_v53  ;;  %v183_v53 = vadd.f32 %v182_v44, %v3018_v62 }
 0x6ff   :  { %v3100_v45 = vpop.f32.mrf.mxu1 }
 0x745   :  { %v664_v37 = vpop.permute.xlu2 %663 }
 0x746   :  { %v666_v40 = vadd.f32 %v664_v37, %v660_v48 }
 0x748   :  { %2605 = vtanh.f32 %v666_v40 }
 0x74e   :  { %v2606_v56 = vpop.eup %2605 }
 0x74f   :  { %v668_v58 = vmul.f32 %v2606_v56, %v658_v57 }
 0x751   :  { %v672_v59 = vpack.c.bf16 %v668_v58, %v668_v58 }
 0x753   :  { %674 = vrot.lane.b32.xlu0 %v672_v59, %s2774_s2 }
 0x7c5   :  { %v675_v61 = vpop.permute.xlu0 %674 }
 0x7c6   :  { %2352 = vmatmul.msk.bf16.vlgmr.msrb.gmra.mxu2 %vm245_vm10, %v675_v61  ;;  %2353 = vmatmul.msk.bf16.vlgmr.msrb.gmra.mxu3 %vm245_vm10, %v675_v61 }
 0x849   :  { %v688_v39 = vpop.f32.mrf.mxu2  ;;  %v701_v63 = vpop.f32.mrf.mxu3 }
 0x84a   :  { %v705_v0 = vadd.f32 %v688_v39, %v3010_v50  ;;  %v706_v11 = vadd.f32 %v701_v63, %v180_v8 }
 0x84c   :  { %v2354_v1 = vmul.f32 -1.442695, %v705_v0  ;;  %v2355_v28 = vmul.f32 -1.442695, %v706_v11 }
 0x84e   :  { %2607 = vpow2.f32 %v2354_v1 }
 0x851   :  { %v690_v2 = vpop.f32.mrf.mxu2  ;;  %v703_v4 = vpop.f32.mrf.mxu3 }
 0x854   :  { %v2608_v5 = vpop.eup %2607 }
 0x855   :  { %v710_v6 = vadd.f32 1.0, %v2608_v5 }
 0x857   :  { %2609 = vrcp.f32 %v710_v6  ;;  %v722_v14 = vand.u32 2147483648, %v710_v6  ;;  %v720_v16 = vand.u32 2147483647, %v710_v6  ;;  %vm716_vm14 = vweird.f32 %v710_v6 }
 0x858   :  { %2611 = vtanh.f32 %v706_v11 }
 0x859   :  { %v723_v17 = vor.u32 1.1754944e-38, %v722_v14  ;;  %vm721_vm0 = vcmp.eq.f32.partialorder %v720_v16, 8.507059e+37  ;;  %2613 = vpow2.f32 %v2355_v28 }
 0x85d   :  { %v2610_v10 = vpop.eup %2609 }
 0x85e   :  { %v712_v12 = vmul.f32 %v2610_v10, %v710_v6  ;;  %vm717_vm13 = vweird.f32 %v2610_v10  ;;  %v2612_v21 = vpop.eup %2611 }
 0x85f   :  { %vm718_vm15 = vmor %vm716_vm14, %vm717_vm13  ;;  %v2614_v3 = vpop.eup %2613 }
 0x860   :  { %v713_v13 = vsub.f32 1.0, %v712_v12  ;;  %v730_v30 = vadd.f32 1.0, %v2614_v3 }
 0x862   :  { %v714_v15 = vmul.f32 %v2610_v10, %v713_v13  ;;  %2615 = vrcp.f32 %v730_v30  ;;  %v742_v36 = vand.u32 2147483648, %v730_v30  ;;  %vm736_vm2 = vweird.f32 %v730_v30 }
 0x863   :  { %v740_v38 = vand.u32 2147483647, %v730_v30 }
 0x864   :  { %v715_v50 = vadd.f32 %v2610_v10, %v714_v15  ;;  %v743_v19 = vor.u32 1.1754944e-38, %v742_v36  ;;  %v185_v36 = vadd.f32 %v3100_v45, %v3018_v62 }
 0x865   :  { %vm741_vm4 = vcmp.eq.f32.partialorder %v740_v38, 8.507059e+37 }
 0x866   :  { %v719_v18 = vsel %vm718_vm15, %v2610_v10, %v715_v50 }
 0x867   :  { %v724_v23 = vsel %vm721_vm0, %v723_v17, %v719_v18 }
 0x868   :  { %v747_v27 = vmul.f32 %v2612_v21, %v724_v23  ;;  %v2616_v9 = vpop.eup %2615  ;;  %v746_v26 = vmul.f32 %v724_v23, %v666_v40 }
 0x869   :  { %v732_v31 = vmul.f32 %v2616_v9, %v730_v30  ;;  %vm737_vm1 = vweird.f32 %v2616_v9 }
 0x86a   :  { %749 = vrot.lane.b32.xlu1 %v747_v27, %s2774_s2  ;;  %vm738_vm3 = vmor %vm736_vm2, %vm737_vm1 }
 0x86b   :  { %v733_v20 = vsub.f32 1.0, %v732_v31 }
 0x86d   :  { %v734_v22 = vmul.f32 %v2616_v9, %v733_v20 }
 0x86f   :  { %v735_v46 = vadd.f32 %v2616_v9, %v734_v22 }
 0x871   :  { %v739_v24 = vsel %vm738_vm3, %v2616_v9, %v735_v46 }
 0x872   :  { %v744_v42 = vsel %vm741_vm4, %v743_v19, %v739_v24 }
 0x8dc   :  { %v750_v34 = vpop.permute.xlu1 %749 }
 0x8dd   :  { %v752_v35 = vadd.f32 %v750_v34, %v746_v26 }
 0x8df   :  { %2617 = vtanh.f32 %v752_v35 }
 0x8e5   :  { %v2618_v41 = vpop.eup %2617 }
 0x8e6   :  { %v754_v25 = vmul.f32 %v2618_v41, %v744_v42 }
 0x8e8   :  { %v758_v43 = vpack.c.bf16 %v754_v25, %v754_v25 }
 0x8ea   :  { %760 = vrot.lane.b32.xlu2 %v758_v43, %s2774_s2 }
 0x944   :  { %v761_v29 = vpop.permute.xlu2 %760 }
 0x945   :  { %2356 = vmatmul.msk.bf16.vlgmr.msrb.gmra.mxu0 %vm245_vm10, %v761_v29  ;;  %2357 = vmatmul.msk.bf16.vlgmr.msra.gmra.mxu1 %vm245_vm10, %v761_v29 }
 0x9c2   :  { %v774_v47 = vpop.f32.mrf.mxu0  ;;  %v787_v33 = vpop.f32.mrf.mxu1 }
 0x9c3   :  { %v791_v48 = vadd.f32 %v774_v47, %v3013_v55  ;;  %v792_v56 = vadd.f32 %v787_v33, %v183_v53 }
 0x9c5   :  { %v2358_v37 = vmul.f32 -1.442695, %v791_v48  ;;  %v2359_v5 = vmul.f32 -1.442695, %v792_v56 }
 0x9c7   :  { %2619 = vpow2.f32 %v2358_v37 }
 0x9ca   :  { %v776_v40 = vpop.f32.mrf.mxu0  ;;  %v789_v49 = vpop.f32.mrf.mxu1 }
 0x9cb   :  { %v2524_v40 = vld [vmem:[%s3633_s4 + $0x18] sm:$0xff]  ;;  %v2523_v49 = vld [vmem:[%s3633_s4 + $0x10] sm:$0xff] }
 0x9cc   :  { %974 = vmatpush.bf16.msra.mxu0 %v2524_v40 }
 0x9cd   :  { %v2620_v51 = vpop.eup %2619 }
 0x9ce   :  { %v796_v52 = vadd.f32 1.0, %v2620_v51 }
 0x9d0   :  { %2621 = vrcp.f32 %v796_v52  ;;  %v808_v59 = vand.u32 2147483648, %v796_v52  ;;  %v806_v39 = vand.u32 2147483647, %v796_v52  ;;  %vm802_vm6 = vweird.f32 %v796_v52  ;;  %975 = vmatpush.bf16.msra.mxu0 %v2523_v49 }
 0x9d1   :  { %2623 = vtanh.f32 %v792_v56 }
 0x9d2   :  { %v809_v55 = vor.u32 1.1754944e-38, %v808_v59  ;;  %vm807_vm8 = vcmp.eq.f32.partialorder %v806_v39, 8.507059e+37  ;;  %2625 = vpow2.f32 %v2359_v5 }
 0x9d6   :  { %v2622_v54 = vpop.eup %2621 }
 0x9d7   :  { %v798_v57 = vmul.f32 %v2622_v54, %v796_v52  ;;  %vm803_vm5 = vweird.f32 %v2622_v54  ;;  %v2624_v1 = vpop.eup %2623  ;;  %v2522_v52 = vld [vmem:[%s3633_s4 + $0x8] sm:$0xff] }
 0x9d8   :  { %vm804_vm7 = vmor %vm802_vm6, %vm803_vm5  ;;  %v2626_v6 = vpop.eup %2625  ;;  %976 = vmatpush.bf16.msra.mxu0 %v2522_v52  ;;  %vm983_vm6 = vcmask 261120  }
 0x9d9   :  { %v799_v58 = vsub.f32 1.0, %v798_v57  ;;  %v816_v7 = vadd.f32 1.0, %v2626_v6 }
 0x9db   :  { %v800_v61 = vmul.f32 %v2622_v54, %v799_v58  ;;  %2627 = vrcp.f32 %v816_v7  ;;  %v828_v50 = vand.u32 2147483648, %v816_v7  ;;  %vm822_vm11 = vweird.f32 %v816_v7 }
 0x9dc   :  { %v826_v17 = vand.u32 2147483647, %v816_v7 }
 0x9dd   :  { %v801_v63 = vadd.f32 %v2622_v54, %v800_v61  ;;  %v829_v21 = vor.u32 1.1754944e-38, %v828_v50  ;;  %v2512_v50 = vld [vmem:[%s3635_s8 + $0x14] sm:$0xf0] }
 0x9de   :  { %vm827_vm13 = vcmp.eq.f32.partialorder %v826_v17, 8.507059e+37 }
 0x9df   :  { %v805_v0 = vsel %vm804_vm7, %v2622_v54, %v801_v63  ;;  %v2521_v54 = vld [vmem:[%s3633_s4] sm:$0xff] }
 0x9e0   :  { %v810_v2 = vsel %vm807_vm8, %v809_v55, %v805_v0  ;;  %977 = vmatpush.bf16.msra.mxu0 %v2521_v54 }
 0x9e1   :  { %v833_v4 = vmul.f32 %v2624_v1, %v810_v2  ;;  %v2628_v8 = vpop.eup %2627  ;;  %v832_v13 = vmul.f32 %v810_v2, %v752_v35 }
 0x9e2   :  { %v818_v10 = vmul.f32 %v2628_v8, %v816_v7  ;;  %vm823_vm9 = vweird.f32 %v2628_v8  ;;  %v2425_v7 = vld [vmem:[%s3635_s8 + $0x30] sm:$0xf] }
 0x9e3   :  { %835 = vrot.lane.b32.xlu0 %v833_v4, %s2774_s2  ;;  %vm824_vm12 = vmor %vm822_vm11, %vm823_vm9 }
 0x9e4   :  { %v819_v11 = vsub.f32 1.0, %v818_v10  ;;  %v2417_v10 = vld [vmem:[%s3635_s8 + $0x20] sm:$0xf] }
 0x9e6   :  { %v820_v12 = vmul.f32 %v2628_v8, %v819_v11 }
 0x9e8   :  { %v821_v16 = vadd.f32 %v2628_v8, %v820_v12  ;;  %v2514_v12 = vld [vmem:[%s3635_s8 + $0x24] sm:$0xf0] }
 0x9ea   :  { %v825_v18 = vsel %vm824_vm12, %v2628_v8, %v821_v16  ;;  %v2516_v8 = vld [vmem:[%s3635_s8 + $0x34] sm:$0xf0]  ;;  %v3153_v16 = vor.u32 %v2514_v12, %v2417_v10 }
 0x9eb   :  { %v830_v27 = vsel %vm827_vm13, %v829_v21, %v825_v18  ;;  %v3138_v11 = vor.u32 %v2516_v8, %v2425_v7  ;;  %v2383_v18 = vld [vmem:[%s3636_s6] sm:$0xf]  ;;  %v2526_v21 = vld [vmem:[%s3636_s6 + $0x4] sm:$0xf0] }
 0x9ed   :  { %1089 = vmatpush.bf16.msrb.mxu3 %v3138_v11 }
 0x9f1   :  { %1090 = vmatpush.bf16.msrb.mxu3 %v3153_v16 }
 0xa55   :  { %v836_v14 = vpop.permute.xlu0 %835 }
 0xa56   :  { %v3105_v15 = vadd.f32 %v836_v14, %v832_v13  ;;  %v2409_v13 = vld [vmem:[%s3635_s8 + $0x10] sm:$0xf] }
 0xa57   :  { %v2391_v14 = vld [vmem:[%s3636_s6 + $0x10] sm:$0xf] }
 0xa58   :  { %2629 = vtanh.f32 %v3105_v15 }
 0xa5e   :  { %v2630_v23 = vpop.eup %2629 }
 0xa5f   :  { %v840_v28 = vmul.f32 %v2630_v23, %v830_v27  ;;  %v2527_v23 = vld [vmem:[%s3636_s6 + $0x14] sm:$0xf]  ;;  %v2393_v27 = vld [vmem:[%s3636_s6 + $0x18] sm:$0xf0] }
 0xa61   :  { %v844_v3 = vpack.c.bf16 %v840_v28, %v840_v28  ;;  %v2515_v28 = vld [vmem:[%s3635_s8 + $0x34] sm:$0xf] }
 0xa63   :  { %846 = vrot.lane.b32.xlu1 %v844_v3, %s2774_s2  ;;  %v2384_v3 = vor.u32 %v2526_v21, %v2383_v18 }
 0xad5   :  { %v847_v30 = vpop.permute.xlu1 %846 }
 0xad6   :  { %2360 = vmatmul.msk.bf16.vlgmr.msra.gmra.mxu2 %vm245_vm10, %v847_v30  ;;  %2361 = vmatmul.msk.bf16.vlgmr.msra.gmra.mxu3 %vm245_vm10, %v847_v30  ;;  %v2396_v30 = vor.u32 %v2527_v23, %v2393_v27 }
 0xad8   :  { %1038 = vmatpush.bf16.msrb.mxu2 %v2396_v30 }
 0xb59   :  { %v860_v9 = vpop.f32.mrf.mxu2  ;;  %v873_v31 = vpop.f32.mrf.mxu3 }
 0xb5a   :  { %v877_v20 = vadd.f32 %v860_v9, %v3016_v60  ;;  %v878_v24 = vadd.f32 %v873_v31, %v185_v36  ;;  %v2427_v9 = vld [vmem:[%s3635_s8 + $0x38] sm:$0xf0]  ;;  %v2385_v36 = vld [vmem:[%s3636_s6 + $0x8] sm:$0xf0] }
 0xb5b   :  { %v3176_v31 = vor.u32 %v2515_v28, %v2427_v9 }
 0xb5c   :  { %v2362_v22 = vmul.f32 -1.442695, %v877_v20  ;;  %v2363_v62 = vmul.f32 -1.442695, %v878_v24  ;;  %v3179_v20 = vor.u32 %v2512_v50, %v2409_v13 }
 0xb5d   :  { %1102 = vmatpush.bf16.msrb.mxu0 %v3176_v31 }
 0xb5e   :  { %2631 = vpow2.f32 %v2362_v22  ;;  %v2401_v22 = vld [vmem:[%s3635_s8] sm:$0xf]  ;;  %1091 = vmatpush.bf16.msrb.mxu3 %v3179_v20 }
 0xb61   :  { %v862_v26 = vpop.f32.mrf.mxu2  ;;  %v875_v34 = vpop.f32.mrf.mxu3 }
 0xb62   :  { %v2510_v26 = vld [vmem:[%s3635_s8 + $0x4] sm:$0xf0] }
 0xb63   :  { %v3190_v34 = vor.u32 %v2510_v26, %v2401_v22 }
 0xb64   :  { %v2632_v35 = vpop.eup %2631 }
 0xb65   :  { %v882_v46 = vadd.f32 1.0, %v2632_v35  ;;  %1092 = vmatpush.bf16.msrb.mxu3 %v3190_v34 }
 0xb67   :  { %2633 = vrcp.f32 %v882_v46  ;;  %v894_v42 = vand.u32 2147483648, %v882_v46  ;;  %v892_v43 = vand.u32 2147483647, %v882_v46  ;;  %vm888_vm15 = vweird.f32 %v882_v46 }
 0xb68   :  { %2635 = vtanh.f32 %v878_v24  ;;  %1093 = vmatmul.bf16.vlgmr.msrb.gmra.mxu3 %v2773_v32 }
 0xb69   :  { %v895_v29 = vor.u32 1.1754944e-38, %v894_v42  ;;  %vm893_vm1 = vcmp.eq.f32.partialorder %v892_v43, 8.507059e+37  ;;  %2637 = vpow2.f32 %v2363_v62  ;;  %1276 = vmatpush.bf16.msra.mxu3 %v3138_v11  ;;  %v2511_v42 = vld [vmem:[%s3635_s8 + $0x14] sm:$0xf] }
 0xb6d   :  { %v2634_v38 = vpop.eup %2633  ;;  %1277 = vmatpush.bf16.msra.mxu3 %v3153_v16 }
 0xb6e   :  { %v884_v19 = vmul.f32 %v2634_v38, %v882_v46  ;;  %vm889_vm14 = vweird.f32 %v2634_v38  ;;  %v2636_v47 = vpop.eup %2635  ;;  %v2525_v46 = vld [vmem:[%s3636_s6 + $0x4] sm:$0xf] }
 0xb6f   :  { %vm890_vm0 = vmor %vm888_vm15, %vm889_vm14  ;;  %v2638_v45 = vpop.eup %2637  ;;  %v2388_v24 = vor.u32 %v2525_v46, %v2385_v36 }
 0xb70   :  { %v885_v41 = vsub.f32 1.0, %v884_v19  ;;  %v902_v37 = vadd.f32 1.0, %v2638_v45  ;;  %v2419_v19 = vld [vmem:[%s3635_s8 + $0x28] sm:$0xf0] }
 0xb71   :  { %1278 = vmatpush.bf16.msra.mxu3 %v3179_v20  ;;  %1039 = vmatpush.bf16.msrb.mxu2 %v2388_v24 }
 0xb72   :  { %v886_v25 = vmul.f32 %v2634_v38, %v885_v41  ;;  %2639 = vrcp.f32 %v902_v37  ;;  %v914_v63 = vand.u32 2147483648, %v902_v37  ;;  %vm908_vm3 = vweird.f32 %v902_v37 }
 0xb73   :  { %v912_v55 = vand.u32 2147483647, %v902_v37 }
 0xb74   :  { %v887_v60 = vadd.f32 %v2634_v38, %v886_v25  ;;  %v915_v1 = vor.u32 1.1754944e-38, %v914_v63  ;;  %v2411_v25 = vld [vmem:[%s3635_s8 + $0x18] sm:$0xf0] }
 0xb75   :  { %vm913_vm5 = vcmp.eq.f32.partialorder %v912_v55, 8.507059e+37  ;;  %1279 = vmatpush.bf16.msra.mxu3 %v3190_v34  ;;  %1195 = vmatpush.bf16.msra.mxu2 %v3176_v31  ;;  %v3228_v43 = vor.u32 %v2511_v42, %v2411_v25 }
 0xb76   :  { %v891_v44 = vsel %vm890_vm0, %v2634_v38, %v887_v60  ;;  %v2513_v38 = vld [vmem:[%s3635_s8 + $0x24] sm:$0xf] }
 0xb77   :  { %v896_v33 = vsel %vm893_vm1, %v895_v29, %v891_v44  ;;  %v3218_v41 = vor.u32 %v2513_v38, %v2419_v19  ;;  %v2509_v60 = vld [vmem:[%s3635_s8 + $0x4] sm:$0xf]  ;;  %v2403_v29 = vld [vmem:[%s3635_s8 + $0x8] sm:$0xf0] }
 0xb78   :  { %v919_v48 = vmul.f32 %v2636_v47, %v896_v33  ;;  %v2640_v51 = vpop.eup %2639  ;;  %v918_v58 = vmul.f32 %v896_v33, %v3105_v15  ;;  %v2528_v15 = vld [vmem:[%s3636_s6 + $0x14] sm:$0xf0]  ;;  %v3238_v44 = vor.u32 %v2509_v60, %v2403_v29  ;;  %v2542_v33 = vld [vmem:[%s3634_s5] ss:$0 sm:$0xff] }
 0xb79   :  { %v904_v53 = vmul.f32 %v2640_v51, %v902_v37  ;;  %vm909_vm2 = vweird.f32 %v2640_v51  ;;  %v2392_v17 = vor.u32 %v2528_v15, %v2391_v14  ;;  %1464 = vmatpush.bf16.msrb.mxu3 %v3138_v11  ;;  %1103 = vmatpush.bf16.msrb.mxu0 %v3218_v41 }
 0xb7a   :  { %921 = vrot.lane.b32.xlu2 %v919_v48, %s2774_s2  ;;  %vm910_vm4 = vmor %vm908_vm3, %vm909_vm2  ;;  %1196 = vmatpush.bf16.msra.mxu2 %v3218_v41 }
 0xb7b   :  { %v905_v56 = vsub.f32 1.0, %v904_v53  ;;  %1025 = vmatpush.bf16.msrb.mxu1 %v2392_v17 }
 0xb7d   :  { %v906_v57 = vmul.f32 %v2640_v51, %v905_v56  ;;  %1465 = vmatpush.bf16.msrb.mxu3 %v3153_v16  ;;  %1104 = vmatpush.bf16.msrb.mxu0 %v3228_v43 }
 0xb7e   :  { %1197 = vmatpush.bf16.msra.mxu2 %v3228_v43 }
 0xb7f   :  { %v907_v39 = vadd.f32 %v2640_v51, %v906_v57  ;;  %1026 = vmatpush.bf16.msrb.mxu1 %v2384_v3 }
 0xb81   :  { %v911_v0 = vsel %vm910_vm4, %v2640_v51, %v907_v39  ;;  %1466 = vmatpush.bf16.msrb.mxu3 %v3179_v20  ;;  %1105 = vmatpush.bf16.msrb.mxu0 %v3238_v44  ;;  %v990_v51 = vld [vmem:[%s3638_s7] sm:$0x3]  ;;  %s2775_s7 = smov 32  }
 0xb82   :  { %v916_v4 = vsel %vm913_vm5, %v915_v1, %v911_v0  ;;  %1198 = vmatpush.bf16.msra.mxu2 %v3238_v44  ;;  %v992_v52 = vperm.slane %v990_v51, 0  ;;  %v993_v39 = vperm.slane %v990_v51, 1 }
 0xb83   :  { %1182 = vmatpush.bf16.msra.mxu1 %v3138_v11 }
 0xb85   :  { %1467 = vmatpush.bf16.msrb.mxu3 %v3190_v34 }
 0xb87   :  { %1183 = vmatpush.bf16.msra.mxu1 %v3153_v16 }
 0xb8b   :  { %1184 = vmatpush.bf16.msra.mxu1 %v3179_v20 }
 0xb8f   :  { %1185 = vmatpush.bf16.msra.mxu1 %v3190_v34 }
 0xbd4   :  { %v922_v59 = vpop.permute.xlu2 %921 }
 0xbd5   :  { %v924_v61 = vadd.f32 %v922_v59, %v918_v58 }
 0xbd7   :  { %2641 = vtanh.f32 %v924_v61 }
 0xbdd   :  { %v2642_v2 = vpop.eup %2641 }
 0xbde   :  { %v926_v5 = vmul.f32 %v2642_v2, %v916_v4 }
 0xbe0   :  { %v927_v6 = vpack.c.bf16 %v926_v5, %v926_v5 }
 0xbe2   :  { %941 = vrot.lane.b32.xlu0 %v927_v6, %s2774_s2 }
 0xbeb   :  { %v1094_v47 = vpop.f32.mrf.mxu3 }
 0xc54   :  { %v942_v35 = vpop.permute.xlu0 %941 }
 0xc55   :  { %2380 = vmatmul.msk.bf16.vlgmr.msra.gmra.mxu0 %vm245_vm10, %v942_v35 }
 0xc56   :  { %1289 = vmatpush.bf16.msra.mxu0 %v3176_v31 }
 0xc5a   :  { %1290 = vmatpush.bf16.msra.mxu0 %v3218_v41 }
 0xc5e   :  { %1291 = vmatpush.bf16.msra.mxu0 %v3228_v43 }
 0xc62   :  { %1292 = vmatpush.bf16.msra.mxu0 %v3238_v44 }
 0xc65   :  { %1106 = vmatmul.bf16.vlgmr.msrb.gmra.mxu0 %v2773_v32  ;;  %v1096_v32 = vpop.f32.mrf.mxu3 }
 0xc66   :  { %1477 = vmatpush.bf16.msrb.mxu0 %v3176_v31 }
 0xc6a   :  { %1478 = vmatpush.bf16.msrb.mxu0 %v3218_v41 }
 0xc6e   :  { %1479 = vmatpush.bf16.msrb.mxu0 %v3228_v43 }
 0xc72   :  { %1480 = vmatpush.bf16.msrb.mxu0 %v3238_v44 }
 0xcd2   :  { %v979_v48 = vpop.f32.mrf.mxu0 }
 0xcd3   :  { %v980_v62 = vadd.f32 %v2542_v33, %v979_v48 }
 0xcd5   :  { %984 = vst.msk [vmem:[%s3637_s16] sm:$0xff] %vm983_vm6, %v980_v62  ;;  %v985_v45 = vpack.c.bf16 %v980_v62, %v980_v62 }
 0xcd7   :  { %2397 = vmatmul.msk.bf16.vlgmr.msrb.gmra.mxu1 %vm983_vm6, %v985_v45  ;;  %2398 = vmatmul.msk.bf16.vlgmr.msrb.gmra.mxu2 %vm983_vm6, %v985_v45 }
 0xcd8   :  { %1370 = vmatpush.bf16.msrb.mxu1 %v3138_v11  ;;  %1383 = vmatpush.bf16.msrb.mxu2 %v3176_v31 }
 0xcda   :  { %v981_v37 = vpop.f32.mrf.mxu0 }
 0xcdc   :  { %1371 = vmatpush.bf16.msrb.mxu1 %v3153_v16  ;;  %1384 = vmatpush.bf16.msrb.mxu2 %v3218_v41 }
 0xce0   :  { %1372 = vmatpush.bf16.msrb.mxu1 %v3179_v20  ;;  %1385 = vmatpush.bf16.msrb.mxu2 %v3228_v43 }
 0xce2   :  { %v1107_v40 = vpop.f32.mrf.mxu0 }
 0xce4   :  { %1373 = vmatpush.bf16.msrb.mxu1 %v3190_v34  ;;  %1386 = vmatpush.bf16.msrb.mxu2 %v3238_v44 }
 0xcea   :  { %v1109_v49 = vpop.f32.mrf.mxu0 }
 0xd54   :  { %v1028_v53 = vpop.f32.mrf.mxu1 }
 0xd55   :  { %v3272_v54 = vadd.f32 %v1028_v53, %v992_v52 }
 0xd57   :  { %v1111_v56 = vadd.f32 %v1094_v47, %v3272_v54 }
 0xd59   :  { %v2431_v57 = vmul.f32 -1.442695, %v1111_v56 }
 0xd5a   :  { %v1041_v58 = vpop.f32.mrf.mxu2 }
 0xd5b   :  { %2643 = vpow2.f32 %v2431_v57  ;;  %v3275_v0 = vadd.f32 %v1041_v58, %v993_v39 }
 0xd5c   :  { %v1030_v59 = vpop.f32.mrf.mxu1 }
 0xd5d   :  { %v1112_v2 = vadd.f32 %v1107_v40, %v3275_v0 }
 0xd5f   :  { %v2432_v17 = vmul.f32 -1.442695, %v1112_v2 }
 0xd61   :  { %v2644_v61 = vpop.eup %2643 }
 0xd62   :  { %v1043_v63 = vpop.f32.mrf.mxu2  ;;  %v1116_v55 = vadd.f32 1.0, %v2644_v61 }
 0xd64   :  { %2645 = vrcp.f32 %v1116_v55  ;;  %v1128_v6 = vand.u32 2147483648, %v1116_v55  ;;  %v1126_v8 = vand.u32 2147483647, %v1116_v55  ;;  %vm1122_vm8 = vweird.f32 %v1116_v55 }
 0xd65   :  { %2647 = vtanh.f32 %v1112_v2 }
 0xd66   :  { %v1129_v12 = vor.u32 1.1754944e-38, %v1128_v6  ;;  %vm1127_vm11 = vcmp.eq.f32.partialorder %v1126_v8, 8.507059e+37  ;;  %2649 = vpow2.f32 %v2432_v17 }
 0xd6a   :  { %v2646_v1 = vpop.eup %2645 }
 0xd6b   :  { %v1118_v4 = vmul.f32 %v2646_v1, %v1116_v55  ;;  %vm1123_vm7 = vweird.f32 %v2646_v1  ;;  %v2648_v14 = vpop.eup %2647 }
 0xd6c   :  { %vm1124_vm9 = vmor %vm1122_vm8, %vm1123_vm7  ;;  %v2650_v18 = vpop.eup %2649 }
 0xd6d   :  { %v1119_v5 = vsub.f32 1.0, %v1118_v4  ;;  %v1136_v21 = vadd.f32 1.0, %v2650_v18 }
 0xd6f   :  { %v1120_v7 = vmul.f32 %v2646_v1, %v1119_v5  ;;  %2651 = vrcp.f32 %v1136_v21  ;;  %v1148_v35 = vand.u32 2147483648, %v1136_v21  ;;  %vm1142_vm13 = vweird.f32 %v1136_v21 }
 0xd70   :  { %v1146_v46 = vand.u32 2147483647, %v1136_v21 }
 0xd71   :  { %v1121_v10 = vadd.f32 %v2646_v1, %v1120_v7  ;;  %v1149_v38 = vor.u32 1.1754944e-38, %v1148_v35 }
 0xd72   :  { %vm1147_vm15 = vcmp.eq.f32.partialorder %v1146_v46, 8.507059e+37 }
 0xd73   :  { %v1125_v13 = vsel %vm1124_vm9, %v2646_v1, %v1121_v10 }
 0xd74   :  { %v1130_v15 = vsel %vm1127_vm11, %v1129_v12, %v1125_v13 }
 0xd75   :  { %v1153_v50 = vmul.f32 %v2648_v14, %v1130_v15  ;;  %v2652_v23 = vpop.eup %2651  ;;  %v1152_v30 = vmul.f32 0.0, %v1130_v15 }
 0xd76   :  { %v1138_v27 = vmul.f32 %v2652_v23, %v1136_v21  ;;  %vm1143_vm12 = vweird.f32 %v2652_v23 }
 0xd77   :  { %1155 = vrot.lane.b32.xlu1 %v1153_v50, %s2774_s2  ;;  %vm1144_vm14 = vmor %vm1142_vm13, %vm1143_vm12 }
 0xd78   :  { %v1139_v28 = vsub.f32 1.0, %v1138_v27 }
 0xd7a   :  { %v1140_v3 = vmul.f32 %v2652_v23, %v1139_v28 }
 0xd7c   :  { %v1141_v26 = vadd.f32 %v2652_v23, %v1140_v3 }
 0xd7e   :  { %v1145_v36 = vsel %vm1144_vm14, %v2652_v23, %v1141_v26 }
 0xd7f   :  { %v1150_v19 = vsel %vm1147_vm15, %v1149_v38, %v1145_v36 }
 0xde9   :  { %v1156_v9 = vpop.permute.xlu1 %1155 }
 0xdea   :  { %v3279_v22 = vadd.f32 %v1156_v9, %v1152_v30 }
 0xdec   :  { %2653 = vtanh.f32 %v3279_v22 }
 0xdf2   :  { %v2654_v24 = vpop.eup %2653 }
 0xdf3   :  { %v3282_v42 = vmul.f32 %v2654_v24, %v1150_v19 }
 0xdf5   :  { %v1171_v25 = vpack.c.bf16 %v3282_v42, %v3282_v42 }
 0xdf7   :  { %1173 = vrot.lane.b32.xlu2 %v1171_v25, %s2774_s2 }
 0xe51   :  { %v1174_v60 = vpop.permute.xlu2 %1173 }
 0xe52   :  { %2433 = vmatmul.msk.bf16.vlgmr.msra.gmra.mxu1 %vm245_vm10, %v1174_v60  ;;  %2434 = vmatmul.msk.bf16.vlgmr.msra.gmra.mxu2 %vm245_vm10, %v1174_v60 }
 0xe53   :  { %1558 = vmatpush.bf16.msra.mxu1 %v3138_v11  ;;  %1571 = vmatpush.bf16.msra.mxu2 %v3176_v31 }
 0xe57   :  { %1559 = vmatpush.bf16.msra.mxu1 %v3153_v16  ;;  %1572 = vmatpush.bf16.msra.mxu2 %v3218_v41 }
 0xe5b   :  { %1560 = vmatpush.bf16.msra.mxu1 %v3179_v20  ;;  %1573 = vmatpush.bf16.msra.mxu2 %v3228_v43 }
 0xe5f   :  { %1561 = vmatpush.bf16.msra.mxu1 %v3190_v34  ;;  %1574 = vmatpush.bf16.msra.mxu2 %v3238_v44 }
 0xecf   :  { %v1187_v29 = vpop.f32.mrf.mxu1 }
 0xed0   :  { %v1204_v47 = vadd.f32 %v1187_v29, %v3272_v54 }
 0xed2   :  { %v2435_v33 = vmul.f32 -1.442695, %v1204_v47 }
 0xed4   :  { %2655 = vpow2.f32 %v2435_v33 }
 0xed5   :  { %v1200_v48 = vpop.f32.mrf.mxu2 }
 0xed6   :  { %v1205_v49 = vadd.f32 %v1200_v48, %v3275_v0 }
 0xed7   :  { %v1189_v32 = vpop.f32.mrf.mxu1 }
 0xed8   :  { %v2436_v1 = vmul.f32 -1.442695, %v1205_v49 }
 0xeda   :  { %v2656_v62 = vpop.eup %2655 }
 0xedb   :  { %v1209_v45 = vadd.f32 1.0, %v2656_v62 }
 0xedd   :  { %2657 = vrcp.f32 %v1209_v45  ;;  %v1202_v37 = vpop.f32.mrf.mxu2  ;;  %v1221_v53 = vand.u32 2147483648, %v1209_v45  ;;  %v1219_v57 = vand.u32 2147483647, %v1209_v45  ;;  %vm1215_vm1 = vweird.f32 %v1209_v45 }
 0xede   :  { %2659 = vtanh.f32 %v1205_v49 }
 0xedf   :  { %v1222_v59 = vor.u32 1.1754944e-38, %v1221_v53  ;;  %vm1220_vm3 = vcmp.eq.f32.partialorder %v1219_v57, 8.507059e+37  ;;  %2661 = vpow2.f32 %v2436_v1 }
 0xee3   :  { %v2658_v40 = vpop.eup %2657 }
 0xee4   :  { %v1211_v51 = vmul.f32 %v2658_v40, %v1209_v45  ;;  %vm1216_vm0 = vweird.f32 %v2658_v40  ;;  %v2660_v39 = vpop.eup %2659 }
 0xee5   :  { %vm1217_vm2 = vmor %vm1215_vm1, %vm1216_vm0  ;;  %v2662_v2 = vpop.eup %2661 }
 0xee6   :  { %v1212_v52 = vsub.f32 1.0, %v1211_v51  ;;  %v1229_v4 = vadd.f32 1.0, %v2662_v2 }
 0xee8   :  { %v1213_v56 = vmul.f32 %v2658_v40, %v1212_v52  ;;  %2663 = vrcp.f32 %v1229_v4  ;;  %v1241_v15 = vand.u32 2147483648, %v1229_v4  ;;  %vm1235_vm5 = vweird.f32 %v1229_v4 }
 0xee9   :  { %v1239_v50 = vand.u32 2147483647, %v1229_v4 }
 0xeea   :  { %v1214_v58 = vadd.f32 %v2658_v40, %v1213_v56  ;;  %v1242_v18 = vor.u32 1.1754944e-38, %v1241_v15 }
 0xeeb   :  { %vm1240_vm8 = vcmp.eq.f32.partialorder %v1239_v50, 8.507059e+37 }
 0xeec   :  { %v1218_v61 = vsel %vm1217_vm2, %v2658_v40, %v1214_v58 }
 0xeed   :  { %v1223_v63 = vsel %vm1220_vm3, %v1222_v59, %v1218_v61 }
 0xeee   :  { %v1246_v55 = vmul.f32 %v2660_v39, %v1223_v63  ;;  %v2664_v5 = vpop.eup %2663  ;;  %v1245_v10 = vmul.f32 %v1223_v63, %v3279_v22 }
 0xeef   :  { %v1231_v6 = vmul.f32 %v2664_v5, %v1229_v4  ;;  %vm1236_vm4 = vweird.f32 %v2664_v5 }
 0xef0   :  { %1248 = vrot.lane.b32.xlu0 %v1246_v55, %s2774_s2  ;;  %vm1237_vm7 = vmor %vm1235_vm5, %vm1236_vm4 }
 0xef1   :  { %v1232_v7 = vsub.f32 1.0, %v1231_v6 }
 0xef3   :  { %v1233_v8 = vmul.f32 %v2664_v5, %v1232_v7 }
 0xef5   :  { %v1234_v14 = vadd.f32 %v2664_v5, %v1233_v8 }
 0xef7   :  { %v1238_v17 = vsel %vm1237_vm7, %v2664_v5, %v1234_v14 }
 0xef8   :  { %v1243_v23 = vsel %vm1240_vm8, %v1242_v18, %v1238_v17 }
 0xf62   :  { %v1249_v12 = vpop.permute.xlu0 %1248 }
 0xf63   :  { %v3301_v13 = vadd.f32 %v1249_v12, %v1245_v10 }
 0xf65   :  { %2665 = vtanh.f32 %v3301_v13 }
 0xf6b   :  { %v2666_v21 = vpop.eup %2665 }
 0xf6c   :  { %v3304_v27 = vmul.f32 %v2666_v21, %v1243_v23 }
 0xf6e   :  { %v1265_v28 = vpack.c.bf16 %v3304_v27, %v3304_v27 }
 0xf70   :  { %1267 = vrot.lane.b32.xlu1 %v1265_v28, %s2774_s2 }
 0xfe2   :  { %v1268_v3 = vpop.permute.xlu1 %1267 }
 0xfe3   :  { %2437 = vmatmul.msk.bf16.vlgmr.msra.gmra.mxu3 %vm245_vm10, %v1268_v3  ;;  %2438 = vmatmul.msk.bf16.vlgmr.msra.gmra.mxu0 %vm245_vm10, %v1268_v3 }
 0xfe4   :  { %1652 = vmatpush.bf16.msra.mxu3 %v3138_v11  ;;  %1665 = vmatpush.bf16.msra.mxu0 %v3176_v31 }
 0xfe8   :  { %1653 = vmatpush.bf16.msra.mxu3 %v3153_v16  ;;  %1666 = vmatpush.bf16.msra.mxu0 %v3218_v41 }
 0xfec   :  { %1654 = vmatpush.bf16.msra.mxu3 %v3179_v20  ;;  %1667 = vmatpush.bf16.msra.mxu0 %v3228_v43 }
 0xff0   :  { %1655 = vmatpush.bf16.msra.mxu3 %v3190_v34  ;;  %1668 = vmatpush.bf16.msra.mxu0 %v3238_v44 }
0x1060   :  { %v1294_v30 = vpop.f32.mrf.mxu0 }
0x1061   :  { %v1299_v19 = vadd.f32 %v1294_v30, %v3275_v0 }
0x1063   :  { %v2440_v49 = vmul.f32 -1.442695, %v1299_v19 }
0x1066   :  { %v1281_v9 = vpop.f32.mrf.mxu3 }
0x1067   :  { %v1298_v22 = vadd.f32 %v1281_v9, %v3272_v54 }
0x1068   :  { %v1296_v26 = vpop.f32.mrf.mxu0 }
0x1069   :  { %v2439_v35 = vmul.f32 -1.442695, %v1298_v22 }
0x106b   :  { %2667 = vpow2.f32 %v2439_v35 }
0x106e   :  { %v1283_v46 = vpop.f32.mrf.mxu3 }
0x1071   :  { %v2668_v36 = vpop.eup %2667 }
0x1072   :  { %v1303_v38 = vadd.f32 1.0, %v2668_v36 }
0x1074   :  { %2669 = vrcp.f32 %v1303_v38  ;;  %v1315_v29 = vand.u32 2147483648, %v1303_v38  ;;  %v1313_v33 = vand.u32 2147483647, %v1303_v38  ;;  %vm1309_vm11 = vweird.f32 %v1303_v38 }
0x1075   :  { %2671 = vtanh.f32 %v1299_v19 }
0x1076   :  { %v1316_v32 = vor.u32 1.1754944e-38, %v1315_v29  ;;  %vm1314_vm13 = vcmp.eq.f32.partialorder %v1313_v33, 8.507059e+37  ;;  %2673 = vpow2.f32 %v2440_v49 }
0x107a   :  { %v2670_v24 = vpop.eup %2669 }
0x107b   :  { %v1305_v25 = vmul.f32 %v2670_v24, %v1303_v38  ;;  %vm1310_vm9 = vweird.f32 %v2670_v24  ;;  %v2672_v45 = vpop.eup %2671 }
0x107c   :  { %vm1311_vm12 = vmor %vm1309_vm11, %vm1310_vm9  ;;  %v2674_v51 = vpop.eup %2673 }
0x107d   :  { %v1306_v60 = vsub.f32 1.0, %v1305_v25  ;;  %v1323_v52 = vadd.f32 1.0, %v2674_v51 }
0x107f   :  { %v1307_v47 = vmul.f32 %v2670_v24, %v1306_v60  ;;  %2675 = vrcp.f32 %v1323_v52  ;;  %v1335_v55 = vand.u32 2147483648, %v1323_v52  ;;  %vm1329_vm15 = vweird.f32 %v1323_v52 }
0x1080   :  { %v1333_v1 = vand.u32 2147483647, %v1323_v52 }
0x1081   :  { %v1308_v48 = vadd.f32 %v2670_v24, %v1307_v47  ;;  %v1336_v4 = vor.u32 1.1754944e-38, %v1335_v55 }
0x1082   :  { %vm1334_vm1 = vcmp.eq.f32.partialorder %v1333_v1, 8.507059e+37 }
0x1083   :  { %v1312_v62 = vsel %vm1311_vm12, %v2670_v24, %v1308_v48 }
0x1084   :  { %v1317_v37 = vsel %vm1314_vm13, %v1316_v32, %v1312_v62 }
0x1085   :  { %v1340_v40 = vmul.f32 %v2672_v45, %v1317_v37  ;;  %v2676_v53 = vpop.eup %2675  ;;  %v1339_v59 = vmul.f32 %v1317_v37, %v3301_v13 }
0x1086   :  { %v1325_v56 = vmul.f32 %v2676_v53, %v1323_v52  ;;  %vm1330_vm14 = vweird.f32 %v2676_v53 }
0x1087   :  { %1342 = vrot.lane.b32.xlu2 %v1340_v40, %s2774_s2  ;;  %vm1331_vm0 = vmor %vm1329_vm15, %vm1330_vm14 }
0x1088   :  { %v1326_v57 = vsub.f32 1.0, %v1325_v56 }
0x108a   :  { %v1327_v58 = vmul.f32 %v2676_v53, %v1326_v57 }
0x108c   :  { %v1328_v63 = vadd.f32 %v2676_v53, %v1327_v58 }
0x108e   :  { %v1332_v2 = vsel %vm1331_vm0, %v2676_v53, %v1328_v63 }
0x108f   :  { %v1337_v6 = vsel %vm1334_vm1, %v1336_v4, %v1332_v2 }
0x10e1   :  { %v1343_v61 = vpop.permute.xlu2 %1342 }
0x10e2   :  { %v3323_v39 = vadd.f32 %v1343_v61, %v1339_v59 }
0x10e4   :  { %2677 = vtanh.f32 %v3323_v39 }
0x10ea   :  { %v2678_v5 = vpop.eup %2677 }
0x10eb   :  { %v3326_v7 = vmul.f32 %v2678_v5, %v1337_v6 }
0x10ed   :  { %v1359_v8 = vpack.c.bf16 %v3326_v7, %v3326_v7 }
0x10ef   :  { %1361 = vrot.lane.b32.xlu0 %v1359_v8, %s2774_s2 }
0x1161   :  { %v1362_v10 = vpop.permute.xlu0 %1361 }
0x1162   :  { %2441 = vmatmul.msk.bf16.vlgmr.msrb.gmra.mxu1 %vm245_vm10, %v1362_v10  ;;  %2442 = vmatmul.msk.bf16.vlgmr.msrb.gmra.mxu2 %vm245_vm10, %v1362_v10 }
0x1163   :  { %1746 = vmatpush.bf16.msrb.mxu1 %v3138_v11  ;;  %1759 = vmatpush.bf16.msrb.mxu2 %v3176_v31 }
0x1167   :  { %1747 = vmatpush.bf16.msrb.mxu1 %v3153_v16  ;;  %1760 = vmatpush.bf16.msrb.mxu2 %v3218_v41 }
0x116b   :  { %1748 = vmatpush.bf16.msrb.mxu1 %v3179_v20  ;;  %1761 = vmatpush.bf16.msrb.mxu2 %v3228_v43 }
0x116f   :  { %1749 = vmatpush.bf16.msrb.mxu1 %v3190_v34  ;;  %1762 = vmatpush.bf16.msrb.mxu2 %v3238_v44 }
0x11df   :  { %v1375_v12 = vpop.f32.mrf.mxu1 }
0x11e0   :  { %v1392_v13 = vadd.f32 %v1375_v12, %v3272_v54 }
0x11e2   :  { %v2443_v14 = vmul.f32 -1.442695, %v1392_v13 }
0x11e4   :  { %2679 = vpow2.f32 %v2443_v14 }
0x11e5   :  { %v1388_v11 = vpop.f32.mrf.mxu2 }
0x11e6   :  { %v1393_v20 = vadd.f32 %v1388_v11, %v3275_v0 }
0x11e7   :  { %v1377_v15 = vpop.f32.mrf.mxu1 }
0x11e8   :  { %v2444_v22 = vmul.f32 -1.442695, %v1393_v20 }
0x11ea   :  { %v2680_v31 = vpop.eup %2679 }
0x11eb   :  { %v1397_v50 = vadd.f32 1.0, %v2680_v31 }
0x11ed   :  { %2681 = vrcp.f32 %v1397_v50  ;;  %v1390_v16 = vpop.f32.mrf.mxu2  ;;  %v1409_v34 = vand.u32 2147483648, %v1397_v50  ;;  %v1407_v44 = vand.u32 2147483647, %v1397_v50  ;;  %vm1403_vm3 = vweird.f32 %v1397_v50 }
0x11ee   :  { %2683 = vtanh.f32 %v1393_v20 }
0x11ef   :  { %v1410_v23 = vor.u32 1.1754944e-38, %v1409_v34  ;;  %vm1408_vm5 = vcmp.eq.f32.partialorder %v1407_v44, 8.507059e+37  ;;  %2685 = vpow2.f32 %v2444_v22 }
0x11f3   :  { %v2682_v41 = vpop.eup %2681 }
0x11f4   :  { %v1399_v17 = vmul.f32 %v2682_v41, %v1397_v50  ;;  %vm1404_vm2 = vweird.f32 %v2682_v41  ;;  %v2684_v3 = vpop.eup %2683 }
0x11f5   :  { %vm1405_vm4 = vmor %vm1403_vm3, %vm1404_vm2  ;;  %v2686_v26 = vpop.eup %2685 }
0x11f6   :  { %v1400_v43 = vsub.f32 1.0, %v1399_v17  ;;  %v1417_v35 = vadd.f32 1.0, %v2686_v26 }
0x11f8   :  { %v1401_v18 = vmul.f32 %v2682_v41, %v1400_v43  ;;  %2687 = vrcp.f32 %v1417_v35  ;;  %v1429_v47 = vand.u32 2147483648, %v1417_v35  ;;  %vm1423_vm8 = vweird.f32 %v1417_v35 }
0x11f9   :  { %v1427_v33 = vand.u32 2147483647, %v1417_v35 }
0x11fa   :  { %v1402_v21 = vadd.f32 %v2682_v41, %v1401_v18  ;;  %v1430_v32 = vor.u32 1.1754944e-38, %v1429_v47 }
0x11fb   :  { %vm1428_vm11 = vcmp.eq.f32.partialorder %v1427_v33, 8.507059e+37 }
0x11fc   :  { %v1406_v28 = vsel %vm1405_vm4, %v2682_v41, %v1402_v21 }
0x11fd   :  { %v1411_v30 = vsel %vm1408_vm5, %v1410_v23, %v1406_v28 }
0x11fe   :  { %v1434_v9 = vmul.f32 %v2684_v3, %v1411_v30  ;;  %v2688_v46 = vpop.eup %2687  ;;  %v1433_v19 = vmul.f32 %v1411_v30, %v3323_v39 }
0x11ff   :  { %v1419_v36 = vmul.f32 %v2688_v46, %v1417_v35  ;;  %vm1424_vm7 = vweird.f32 %v2688_v46 }
0x1200   :  { %1436 = vrot.lane.b32.xlu1 %v1434_v9, %s2774_s2  ;;  %vm1425_vm9 = vmor %vm1423_vm8, %vm1424_vm7 }
0x1201   :  { %v1420_v38 = vsub.f32 1.0, %v1419_v36 }
0x1203   :  { %v1421_v24 = vmul.f32 %v2688_v46, %v1420_v38 }
0x1205   :  { %v1422_v29 = vadd.f32 %v2688_v46, %v1421_v24 }
0x1207   :  { %v1426_v48 = vsel %vm1425_vm9, %v2688_v46, %v1422_v29 }
0x1208   :  { %v1431_v45 = vsel %vm1428_vm11, %v1430_v32, %v1426_v48 }
0x1272   :  { %v1437_v25 = vpop.permute.xlu1 %1436 }
0x1273   :  { %v1439_v60 = vadd.f32 %v1437_v25, %v1433_v19 }
0x1275   :  { %2689 = vtanh.f32 %v1439_v60 }
0x127b   :  { %v2690_v62 = vpop.eup %2689 }
0x127c   :  { %v3345_v37 = vmul.f32 %v2690_v62, %v1431_v45 }
0x127e   :  { %v1453_v40 = vpack.c.bf16 %v3345_v37, %v3345_v37 }
0x1280   :  { %1455 = vrot.lane.b32.xlu2 %v1453_v40, %s2774_s2 }
0x12da   :  { %v1456_v49 = vpop.permute.xlu2 %1455 }
0x12db   :  { %2445 = vmatmul.msk.bf16.vlgmr.msrb.gmra.mxu3 %vm245_vm10, %v1456_v49  ;;  %2446 = vmatmul.msk.bf16.vlgmr.msrb.gmra.mxu0 %vm245_vm10, %v1456_v49 }
0x1358   :  { %v1482_v51 = vpop.f32.mrf.mxu0 }
0x1359   :  { %v1487_v63 = vadd.f32 %v1482_v51, %v3275_v0 }
0x135b   :  { %v2448_v11 = vmul.f32 -1.442695, %v1487_v63 }
0x135e   :  { %v1469_v52 = vpop.f32.mrf.mxu3 }
0x135f   :  { %v1486_v53 = vadd.f32 %v1469_v52, %v3272_v54 }
0x1360   :  { %v1484_v56 = vpop.f32.mrf.mxu0 }
0x1361   :  { %v2447_v57 = vmul.f32 -1.442695, %v1486_v53 }
0x1363   :  { %2691 = vpow2.f32 %v2447_v57 }
0x1366   :  { %v1471_v58 = vpop.f32.mrf.mxu3 }
0x1369   :  { %v2692_v59 = vpop.eup %2691 }
0x136a   :  { %v1491_v61 = vadd.f32 1.0, %v2692_v59 }
0x136c   :  { %2693 = vrcp.f32 %v1491_v61  ;;  %v1503_v2 = vand.u32 2147483648, %v1491_v61  ;;  %v1501_v5 = vand.u32 2147483647, %v1491_v61  ;;  %vm1497_vm13 = vweird.f32 %v1491_v61 }
0x136d   :  { %2695 = vtanh.f32 %v1487_v63 }
0x136e   :  { %v1504_v8 = vor.u32 1.1754944e-38, %v1503_v2  ;;  %vm1502_vm15 = vcmp.eq.f32.partialorder %v1501_v5, 8.507059e+37  ;;  %2697 = vpow2.f32 %v2448_v11 }
0x1372   :  { %v2694_v39 = vpop.eup %2693 }
0x1373   :  { %v1493_v55 = vmul.f32 %v2694_v39, %v1491_v61  ;;  %vm1498_vm12 = vweird.f32 %v2694_v39  ;;  %v2696_v12 = vpop.eup %2695 }
0x1374   :  { %vm1499_vm14 = vmor %vm1497_vm13, %vm1498_vm12  ;;  %v2698_v15 = vpop.eup %2697 }
0x1375   :  { %v1494_v1 = vsub.f32 1.0, %v1493_v55  ;;  %v1511_v31 = vadd.f32 1.0, %v2698_v15 }
0x1377   :  { %v1495_v4 = vmul.f32 %v2694_v39, %v1494_v1  ;;  %2699 = vrcp.f32 %v1511_v31  ;;  %v1523_v44 = vand.u32 2147483648, %v1511_v31  ;;  %vm1517_vm1 = vweird.f32 %v1511_v31 }
0x1378   :  { %v1521_v21 = vand.u32 2147483647, %v1511_v31 }
0x1379   :  { %v1496_v6 = vadd.f32 %v2694_v39, %v1495_v4  ;;  %v1524_v28 = vor.u32 1.1754944e-38, %v1523_v44 }
0x137a   :  { %vm1522_vm3 = vcmp.eq.f32.partialorder %v1521_v21, 8.507059e+37 }
0x137b   :  { %v1500_v10 = vsel %vm1499_vm14, %v2694_v39, %v1496_v6 }
0x137c   :  { %v1505_v13 = vsel %vm1502_vm15, %v1504_v8, %v1500_v10 }
0x137d   :  { %v1528_v14 = vmul.f32 %v2696_v12, %v1505_v13  ;;  %v2700_v50 = vpop.eup %2699  ;;  %v1527_v17 = vmul.f32 %v1505_v13, %v1439_v60 }
0x137e   :  { %v1513_v16 = vmul.f32 %v2700_v50, %v1511_v31  ;;  %vm1518_vm0 = vweird.f32 %v2700_v50 }
0x137f   :  { %1530 = vrot.lane.b32.xlu0 %v1528_v14, %s2774_s2  ;;  %vm1519_vm2 = vmor %vm1517_vm1, %vm1518_vm0 }
0x1380   :  { %v1514_v41 = vsub.f32 1.0, %v1513_v16 }
0x1382   :  { %v1515_v20 = vmul.f32 %v2700_v50, %v1514_v41 }
0x1384   :  { %v1516_v18 = vadd.f32 %v2700_v50, %v1515_v20 }
0x1386   :  { %v1520_v23 = vsel %vm1519_vm2, %v2700_v50, %v1516_v18 }
0x1387   :  { %v1525_v30 = vsel %vm1522_vm3, %v1524_v28, %v1520_v23 }
0x13f1   :  { %v1531_v43 = vpop.permute.xlu0 %1530 }
0x13f2   :  { %v1533_v34 = vadd.f32 %v1531_v43, %v1527_v17 }
0x13f4   :  { %2701 = vtanh.f32 %v1533_v34 }
0x13fa   :  { %v2702_v3 = vpop.eup %2701 }
0x13fb   :  { %v3355_v9 = vmul.f32 %v2702_v3, %v1525_v30 }
0x13fd   :  { %v1547_v22 = vpack.c.bf16 %v3355_v9, %v3355_v9 }
0x13ff   :  { %1549 = vrot.lane.b32.xlu1 %v1547_v22, %s2774_s2 }
0x1471   :  { %v1550_v26 = vpop.permute.xlu1 %1549 }
0x1472   :  { %2449 = vmatmul.msk.bf16.vlgmr.msra.gmra.mxu1 %vm245_vm10, %v1550_v26  ;;  %2450 = vmatmul.msk.bf16.vlgmr.msra.gmra.mxu2 %vm245_vm10, %v1550_v26 }
0x14ef   :  { %v1563_v35 = vpop.f32.mrf.mxu1 }
0x14f0   :  { %v1580_v46 = vadd.f32 %v1563_v35, %v3272_v54 }
0x14f2   :  { %v2451_v36 = vmul.f32 -1.442695, %v1580_v46 }
0x14f4   :  { %2703 = vpow2.f32 %v2451_v36 }
0x14f5   :  { %v1576_v38 = vpop.f32.mrf.mxu2 }
0x14f6   :  { %v1581_v47 = vadd.f32 %v1576_v38, %v3275_v0 }
0x14f7   :  { %v1565_v24 = vpop.f32.mrf.mxu1 }
0x14f8   :  { %v2452_v57 = vmul.f32 -1.442695, %v1581_v47 }
0x14fa   :  { %v2704_v19 = vpop.eup %2703 }
0x14fb   :  { %v1585_v25 = vadd.f32 1.0, %v2704_v19 }
0x14fd   :  { %2705 = vrcp.f32 %v1585_v25  ;;  %v1578_v60 = vpop.f32.mrf.mxu2  ;;  %v1597_v32 = vand.u32 2147483648, %v1585_v25  ;;  %v1595_v45 = vand.u32 2147483647, %v1585_v25  ;;  %vm1591_vm5 = vweird.f32 %v1585_v25 }
0x14fe   :  { %2707 = vtanh.f32 %v1581_v47 }
0x14ff   :  { %v1598_v49 = vor.u32 1.1754944e-38, %v1597_v32  ;;  %vm1596_vm8 = vcmp.eq.f32.partialorder %v1595_v45, 8.507059e+37  ;;  %2709 = vpow2.f32 %v2452_v57 }
0x1503   :  { %v2706_v29 = vpop.eup %2705 }
0x1504   :  { %v1587_v33 = vmul.f32 %v2706_v29, %v1585_v25  ;;  %vm1592_vm4 = vweird.f32 %v2706_v29  ;;  %v2708_v52 = vpop.eup %2707 }
0x1505   :  { %vm1593_vm7 = vmor %vm1591_vm5, %vm1592_vm4  ;;  %v2710_v58 = vpop.eup %2709 }
0x1506   :  { %v1588_v48 = vsub.f32 1.0, %v1587_v33  ;;  %v1605_v59 = vadd.f32 1.0, %v2710_v58 }
0x1508   :  { %v1589_v62 = vmul.f32 %v2706_v29, %v1588_v48  ;;  %2711 = vrcp.f32 %v1605_v59  ;;  %v1617_v6 = vand.u32 2147483648, %v1605_v59  ;;  %vm1611_vm11 = vweird.f32 %v1605_v59 }
0x1509   :  { %v1615_v8 = vand.u32 2147483647, %v1605_v59 }
0x150a   :  { %v1590_v40 = vadd.f32 %v2706_v29, %v1589_v62  ;;  %v1618_v12 = vor.u32 1.1754944e-38, %v1617_v6 }
0x150b   :  { %vm1616_vm13 = vcmp.eq.f32.partialorder %v1615_v8, 8.507059e+37 }
0x150c   :  { %v1594_v51 = vsel %vm1593_vm7, %v2706_v29, %v1590_v40 }
0x150d   :  { %v1599_v53 = vsel %vm1596_vm8, %v1598_v49, %v1594_v51 }
0x150e   :  { %v1622_v56 = vmul.f32 %v2708_v52, %v1599_v53  ;;  %v2712_v61 = vpop.eup %2711  ;;  %v1621_v1 = vmul.f32 %v1599_v53, %v1533_v34 }
0x150f   :  { %v1607_v39 = vmul.f32 %v2712_v61, %v1605_v59  ;;  %vm1612_vm9 = vweird.f32 %v2712_v61 }
0x1510   :  { %1624 = vrot.lane.b32.xlu2 %v1622_v56, %s2774_s2  ;;  %vm1613_vm12 = vmor %vm1611_vm11, %vm1612_vm9 }
0x1511   :  { %v1608_v63 = vsub.f32 1.0, %v1607_v39 }
0x1513   :  { %v1609_v55 = vmul.f32 %v2712_v61, %v1608_v63 }
0x1515   :  { %v1610_v5 = vadd.f32 %v2712_v61, %v1609_v55 }
0x1517   :  { %v1614_v10 = vsel %vm1613_vm12, %v2712_v61, %v1610_v5 }
0x1518   :  { %v1619_v14 = vsel %vm1616_vm13, %v1618_v12, %v1614_v10 }
0x156a   :  { %v1625_v2 = vpop.permute.xlu2 %1624 }
0x156b   :  { %v1627_v4 = vadd.f32 %v1625_v2, %v1621_v1 }
0x156d   :  { %2713 = vtanh.f32 %v1627_v4 }
0x1573   :  { %v2714_v13 = vpop.eup %2713 }
0x1574   :  { %v3365_v11 = vmul.f32 %v2714_v13, %v1619_v14 }
0x1576   :  { %v1641_v15 = vpack.c.bf16 %v3365_v11, %v3365_v11 }
0x1578   :  { %1643 = vrot.lane.b32.xlu0 %v1641_v15, %s2774_s2 }
0x15ea   :  { %v1644_v31 = vpop.permute.xlu0 %1643 }
0x15eb   :  { %2453 = vmatmul.msk.bf16.vlgmr.msra.gmra.mxu3 %vm245_vm10, %v1644_v31  ;;  %2454 = vmatmul.msk.bf16.vlgmr.msra.gmra.mxu0 %vm245_vm10, %v1644_v31 }
0x1668   :  { %v1670_v50 = vpop.f32.mrf.mxu0 }
0x1669   :  { %v1675_v21 = vadd.f32 %v1670_v50, %v3275_v0 }
0x166b   :  { %v2456_v19 = vmul.f32 -1.442695, %v1675_v21 }
0x166e   :  { %v1657_v16 = vpop.f32.mrf.mxu3 }
0x166f   :  { %v1674_v41 = vadd.f32 %v1657_v16, %v3272_v54 }
0x1670   :  { %v1672_v20 = vpop.f32.mrf.mxu0 }
0x1671   :  { %v2455_v17 = vmul.f32 -1.442695, %v1674_v41 }
0x1673   :  { %2715 = vpow2.f32 %v2455_v17 }
0x1676   :  { %v1659_v43 = vpop.f32.mrf.mxu3 }
0x1679   :  { %v2716_v34 = vpop.eup %2715 }
0x167a   :  { %v1679_v18 = vadd.f32 1.0, %v2716_v34 }
0x167c   :  { %2717 = vrcp.f32 %v1679_v18  ;;  %v1691_v3 = vand.u32 2147483648, %v1679_v18  ;;  %v1689_v22 = vand.u32 2147483647, %v1679_v18  ;;  %vm1685_vm15 = vweird.f32 %v1679_v18 }
0x167d   :  { %2719 = vtanh.f32 %v1675_v21 }
0x167e   :  { %v1692_v35 = vor.u32 1.1754944e-38, %v1691_v3  ;;  %vm1690_vm1 = vcmp.eq.f32.partialorder %v1689_v22, 8.507059e+37  ;;  %2721 = vpow2.f32 %v2456_v19 }
0x1682   :  { %v2718_v44 = vpop.eup %2717 }
0x1683   :  { %v1681_v23 = vmul.f32 %v2718_v44, %v1679_v18  ;;  %vm1686_vm14 = vweird.f32 %v2718_v44  ;;  %v2720_v36 = vpop.eup %2719 }
0x1684   :  { %vm1687_vm0 = vmor %vm1685_vm15, %vm1686_vm14  ;;  %v2722_v25 = vpop.eup %2721 }
0x1685   :  { %v1682_v28 = vsub.f32 1.0, %v1681_v23  ;;  %v1699_v60 = vadd.f32 1.0, %v2722_v25 }
0x1687   :  { %v1683_v30 = vmul.f32 %v2718_v44, %v1682_v28  ;;  %2723 = vrcp.f32 %v1699_v60  ;;  %v1711_v49 = vand.u32 2147483648, %v1699_v60  ;;  %vm1705_vm3 = vweird.f32 %v1699_v60 }
0x1688   :  { %v1709_v51 = vand.u32 2147483647, %v1699_v60 }
0x1689   :  { %v1684_v26 = vadd.f32 %v2718_v44, %v1683_v30  ;;  %v1712_v53 = vor.u32 1.1754944e-38, %v1711_v49 }
0x168a   :  { %vm1710_vm5 = vcmp.eq.f32.partialorder %v1709_v51, 8.507059e+37 }
0x168b   :  { %v1688_v46 = vsel %vm1687_vm0, %v2718_v44, %v1684_v26 }
0x168c   :  { %v1693_v38 = vsel %vm1690_vm1, %v1692_v35, %v1688_v46 }
0x168d   :  { %v1716_v24 = vmul.f32 %v2720_v36, %v1693_v38  ;;  %v2724_v29 = vpop.eup %2723  ;;  %v1715_v32 = vmul.f32 %v1693_v38, %v1627_v4 }
0x168e   :  { %v1701_v47 = vmul.f32 %v2724_v29, %v1699_v60  ;;  %vm1706_vm2 = vweird.f32 %v2724_v29 }
0x168f   :  { %1718 = vrot.lane.b32.xlu1 %v1716_v24, %s2774_s2  ;;  %vm1707_vm4 = vmor %vm1705_vm3, %vm1706_vm2 }
0x1690   :  { %v1702_v33 = vsub.f32 1.0, %v1701_v47 }
0x1692   :  { %v1703_v48 = vmul.f32 %v2724_v29, %v1702_v33 }
0x1694   :  { %v1704_v40 = vadd.f32 %v2724_v29, %v1703_v48 }
0x1696   :  { %v1708_v52 = vsel %vm1707_vm4, %v2724_v29, %v1704_v40 }
0x1697   :  { %v1713_v57 = vsel %vm1710_vm5, %v1712_v53, %v1708_v52 }
0x1701   :  { %v1719_v62 = vpop.permute.xlu1 %1718 }
0x1702   :  { %v3375_v45 = vadd.f32 %v1719_v62, %v1715_v32 }
0x1704   :  { %2725 = vtanh.f32 %v3375_v45 }
0x170a   :  { %v2726_v56 = vpop.eup %2725 }
0x170b   :  { %v3378_v58 = vmul.f32 %v2726_v56, %v1713_v57 }
0x170d   :  { %1730 = vrot.lane.b32.xlu1 %v3378_v58, %s2775_s7  ;;  %v1735_v59 = vpack.c.bf16 %v3378_v58, %v3378_v58 }
0x170f   :  { %1737 = vrot.lane.b32.xlu2 %v1735_v59, %s2774_s2 }
0x1715   :  { %1636 = vrot.lane.b32.xlu1 %v3365_v11, %s2775_s7 }
0x171d   :  { %1162 = vrot.lane.b32.xlu1 %v3282_v42, %s2774_s2 }
0x1769   :  { %v1738_v61 = vpop.permute.xlu2 %1737 }
0x176a   :  { %2457 = vmatmul.msk.bf16.vlgmr.msrb.gmra.mxu1 %vm245_vm10, %v1738_v61  ;;  %2458 = vmatmul.msk.bf16.vlgmr.msrb.gmra.mxu2 %vm245_vm10, %v1738_v61 }
0x177f   :  { %v1731_v39 = vpop.permute.xlu1 %1730 }
0x1780   :  { %1734 = vst.msk [vmem:[#allocation4 + $0x8] sm:$0xff] %vm983_vm6, %v1731_v39 }
0x1787   :  { %v1637_v63 = vpop.permute.xlu1 %1636  ;;  %v1837_v55 = vld [vmem:[#allocation4 + $0x8] sm:$0xff] }
0x1788   :  { %1640 = vst.msk [vmem:[#allocation4 + $0x10] sm:$0xff] %vm983_vm6, %v1637_v63  ;;  %1854 = vrot.lane.b32.xlu1 %v1837_v55, %s2775_s7 }
0x178f   :  { %v1163_v1 = vpop.permute.xlu1 %1162 }
0x1790   :  { %1165 = vst.msk [vmem:[#allocation3] sm:$0xff] %vm983_vm6, %v1163_v1  ;;  %1349 = vrot.lane.b32.xlu1 %v3326_v7, %s2774_s2 }
0x17e7   :  { %v1751_v2 = vpop.f32.mrf.mxu1 }
0x17e8   :  { %v1768_v4 = vadd.f32 %v1751_v2, %v3272_v54 }
0x17ea   :  { %v2459_v5 = vmul.f32 -1.442695, %v1768_v4  ;;  %v1828_v4 = vld [vmem:[#allocation3] sm:$0xff] }
0x17ec   :  { %2727 = vpow2.f32 %v2459_v5 }
0x17ed   :  { %v1764_v6 = vpop.f32.mrf.mxu2 }
0x17ee   :  { %v1769_v31 = vadd.f32 %v1764_v6, %v3275_v0 }
0x17ef   :  { %v1753_v8 = vpop.f32.mrf.mxu1 }
0x17f0   :  { %v2460_v0 = vmul.f32 -1.442695, %v1769_v31 }
0x17f2   :  { %v2728_v10 = vpop.eup %2727 }
0x17f3   :  { %v1773_v12 = vadd.f32 1.0, %v2728_v10 }
0x17f5   :  { %2729 = vrcp.f32 %v1773_v12  ;;  %v1766_v13 = vpop.f32.mrf.mxu2  ;;  %v1785_v41 = vand.u32 2147483648, %v1773_v12  ;;  %v1783_v54 = vand.u32 2147483647, %v1773_v12  ;;  %vm1779_vm8 = vweird.f32 %v1773_v12 }
0x17f6   :  { %2731 = vtanh.f32 %v1769_v31 }
0x17f7   :  { %v1786_v34 = vor.u32 1.1754944e-38, %v1785_v41  ;;  %vm1784_vm11 = vcmp.eq.f32.partialorder %v1783_v54, 8.507059e+37  ;;  %2733 = vpow2.f32 %v2460_v0 }
0x17fa   :  { %v3398_v14 = vpop.permute.xlu1 %1854 }
0x17fb   :  { %v2730_v15 = vpop.eup %2729 }
0x17fc   :  { %v1775_v50 = vmul.f32 %v2730_v15, %v1773_v12  ;;  %vm1780_vm7 = vweird.f32 %v2730_v15  ;;  %v2732_v44 = vpop.eup %2731 }
0x17fd   :  { %vm1781_vm9 = vmor %vm1779_vm8, %vm1780_vm7  ;;  %v2734_v28 = vpop.eup %2733 }
0x17fe   :  { %v1776_v16 = vsub.f32 1.0, %v1775_v50  ;;  %v1793_v3 = vadd.f32 1.0, %v2734_v28 }
0x1800   :  { %v1777_v20 = vmul.f32 %v2730_v15, %v1776_v16  ;;  %2735 = vrcp.f32 %v1793_v3  ;;  %v1805_v19 = vand.u32 2147483648, %v1793_v3  ;;  %vm1799_vm13 = vweird.f32 %v1793_v3 }
0x1801   :  { %v1803_v25 = vand.u32 2147483647, %v1793_v3 }
0x1802   :  { %v1350_v17 = vpop.permute.xlu1 %1349  ;;  %v1778_v43 = vadd.f32 %v2730_v15, %v1777_v20  ;;  %v1806_v29 = vor.u32 1.1754944e-38, %v1805_v19 }
0x1803   :  { %1353 = vst.msk [vmem:[#allocation3 + $0x10] sm:$0xff] %vm983_vm6, %v1350_v17  ;;  %vm1804_vm15 = vcmp.eq.f32.partialorder %v1803_v25, 8.507059e+37 }
0x1804   :  { %v1782_v18 = vsel %vm1781_vm9, %v2730_v15, %v1778_v43 }
0x1805   :  { %v1787_v21 = vsel %vm1784_vm11, %v1786_v34, %v1782_v18  ;;  %v2776_v18 = vmov 64.0  }
0x1806   :  { %v1810_v23 = vmul.f32 %v2732_v44, %v1787_v21  ;;  %v2736_v30 = vpop.eup %2735  ;;  %v1809_v46 = vmul.f32 %v1787_v21, %v3375_v45 }
0x1807   :  { %v1795_v22 = vmul.f32 %v2736_v30, %v1793_v3  ;;  %vm1800_vm12 = vweird.f32 %v2736_v30 }
0x1808   :  { %1812 = vrot.lane.b32.xlu0 %v1810_v23, %s2774_s2  ;;  %vm1801_vm14 = vmor %vm1799_vm13, %vm1800_vm12 }
0x1809   :  { %v1796_v26 = vsub.f32 1.0, %v1795_v22 }
0x180a   :  { %v1830_v12 = vld [vmem:[#allocation3 + $0x10] sm:$0xff] }
0x180b   :  { %v1797_v35 = vmul.f32 %v2736_v30, %v1796_v26 }
0x180d   :  { %v1798_v24 = vadd.f32 %v2736_v30, %v1797_v35 }
0x180f   :  { %v1802_v60 = vsel %vm1801_vm14, %v2736_v30, %v1798_v24 }
0x1810   :  { %1542 = vrot.lane.b32.xlu0 %v3355_v9, %s2775_s7  ;;  %v1807_v48 = vsel %vm1804_vm15, %v1806_v29, %v1802_v60 }
0x1818   :  { %1448 = vrot.lane.b32.xlu0 %v3345_v37, %s2775_s7 }
0x1820   :  { %1260 = vrot.lane.b32.xlu0 %v3304_v27, %s2775_s7 }
0x187a   :  { %v1813_v36 = vpop.permute.xlu0 %1812 }
0x187b   :  { %v1815_v38 = vadd.f32 %v1813_v36, %v1809_v46 }
0x187d   :  { %2737 = vtanh.f32 %v1815_v38 }
0x187e   :  { %2739 = vrcp.f32 %v2776_v18 }
0x1882   :  { %v1543_v47 = vpop.permute.xlu0 %1542 }
0x1883   :  { %v2738_v33 = vpop.eup %2737  ;;  %1546 = vst.msk [vmem:[#allocation4 + $0x18] sm:$0xff] %vm983_vm6, %v1543_v47 }
0x1884   :  { %v1817_v32 = vmul.f32 %v2738_v33, %v1807_v48  ;;  %v2740_v44 = vpop.eup %2739 }
0x1885   :  { %v1909_v21 = vmul.f32 64.0, %v2740_v44  ;;  %vm1913_vm0 = vweird.f32 %v2740_v44 }
0x1886   :  { %1824 = vrot.lane.b32.xlu2 %v1817_v32, %s2775_s7 }
0x1887   :  { %v1910_v23 = vsub.f32 1.0, %v1909_v21 }
0x1889   :  { %v1911_v0 = vmul.f32 %v2740_v44, %v1910_v23 }
0x188a   :  { %v1449_v62 = vpop.permute.xlu0 %1448  ;;  %v1839_v45 = vld [vmem:[#allocation4 + $0x18] sm:$0xff] }
0x188b   :  { %1452 = vst.msk [vmem:[#allocation4 + $0x20] sm:$0xff] %vm983_vm6, %v1449_v62  ;;  %1858 = vrot.lane.b32.xlu1 %v1839_v45, %s2775_s7  ;;  %v1912_v28 = vadd.f32 %v2740_v44, %v1911_v0 }
0x188d   :  { %v3458_v3 = vsel %vm1913_vm0, %v2740_v44, %v1912_v28 }
0x188e   :  { %1354 = vrot.lane.b32.xlu2 %v3326_v7, %s2775_s7 }
0x1892   :  { %v1261_v40 = vpop.permute.xlu0 %1260  ;;  %v1840_v49 = vld [vmem:[#allocation4 + $0x20] sm:$0xff] }
0x1893   :  { %1264 = vst.msk [vmem:[#allocation4 + $0x30] sm:$0xff] %vm983_vm6, %v1261_v40  ;;  %1860 = vrot.lane.b32.xlu1 %v1840_v49, %s2775_s7 }
0x1896   :  { %1255 = vrot.lane.b32.xlu2 %v3304_v27, %s2774_s2 }
0x189a   :  { %v1842_v51 = vld [vmem:[#allocation4 + $0x30] sm:$0xff] }
0x189b   :  { %1819 = vrot.lane.b32.xlu1 %v1817_v32, %s2774_s2 }
0x189e   :  { %1166 = vrot.lane.b32.xlu2 %v3282_v42, %s2775_s7  ;;  %v1838_v42 = vld [vmem:[#allocation4 + $0x10] sm:$0xff] }
0x18a3   :  { %1864 = vrot.lane.b32.xlu1 %v1842_v51, %s2775_s7 }
0x18a6   :  { %1443 = vrot.lane.b32.xlu2 %v3345_v37, %s2774_s2 }
0x18ae   :  { %1537 = vrot.lane.b32.xlu2 %v3355_v9, %s2774_s2 }
0x18e0   :  { %v1825_v7 = vpop.permute.xlu2 %1824 }
0x18e1   :  { %1827 = vst.msk [vmem:[#allocation4] sm:$0xff] %vm983_vm6, %v1825_v7 }
0x18e8   :  { %v1355_v52 = vpop.permute.xlu2 %1354  ;;  %v1836_v53 = vld [vmem:[#allocation4] sm:$0xff] }
0x18e9   :  { %1358 = vst.msk [vmem:[#allocation4 + $0x28] sm:$0xff] %vm983_vm6, %v1355_v52  ;;  %1852 = vrot.lane.b32.xlu0 %v1836_v53, %s2775_s7 }
0x18f0   :  { %v1256_v27 = vpop.permute.xlu2 %1255  ;;  %v1841_v56 = vld [vmem:[#allocation4 + $0x28] sm:$0xff] }
0x18f1   :  { %1259 = vst.msk [vmem:[#allocation3 + $0x8] sm:$0xff] %vm983_vm6, %v1256_v27  ;;  %1856 = vrot.lane.b32.xlu0 %v1838_v42, %s2775_s7  ;;  %1862 = vrot.lane.b32.xlu2 %v1841_v56, %s2775_s7 }
0x18f8   :  { %v1167_v37 = vpop.permute.xlu2 %1166  ;;  %v1829_v55 = vld [vmem:[#allocation3 + $0x8] sm:$0xff] }
0x18f9   :  { %1170 = vst.msk [vmem:[#allocation4 + $0x38] sm:$0xff] %vm983_vm6, %v1167_v37  ;;  %1631 = vrot.lane.b32.xlu0 %v3365_v11, %s2774_s2  ;;  %v1877_v11 = vsel %vm983_vm6, %v1829_v55, %v3398_v14 }
0x18fa   :  { %v1887_v1 = vsel %vm245_vm10, %v1877_v11, 0.0 }
0x18fd   :  { %v1859_v9 = vpop.permute.xlu1 %1858 }
0x1900   :  { %v1444_v57 = vpop.permute.xlu2 %1443  ;;  %v1843_v59 = vld [vmem:[#allocation4 + $0x38] sm:$0xff] }
0x1901   :  { %1447 = vst.msk [vmem:[#allocation3 + $0x18] sm:$0xff] %vm983_vm6, %v1444_v57  ;;  %1725 = vrot.lane.b32.xlu0 %v3378_v58, %s2774_s2  ;;  %1866 = vrot.lane.b32.xlu1 %v1843_v59, %s2775_s7 }
0x1905   :  { %v1861_v61 = vpop.permute.xlu1 %1860 }
0x1908   :  { %v1538_v39 = vpop.permute.xlu2 %1537  ;;  %v1831_v6 = vld [vmem:[#allocation3 + $0x18] sm:$0xff] }
0x1909   :  { %1541 = vst.msk [vmem:[#allocation3 + $0x20] sm:$0xff] %vm983_vm6, %v1538_v39  ;;  %v1879_v8 = vsel %vm983_vm6, %v1831_v6, %v1859_v9 }
0x190a   :  { %v1893_v14 = vsel %vm245_vm10, %v1879_v8, 0.0 }
0x190d   :  { %v1820_v63 = vpop.permute.xlu1 %1819 }
0x190e   :  { %1823 = vst.msk [vmem:[#allocation3 + $0x38] sm:$0xff] %vm983_vm6, %v1820_v63 }
0x1910   :  { %v1832_v31 = vld [vmem:[#allocation3 + $0x20] sm:$0xff] }
0x1911   :  { %v1880_v50 = vsel %vm983_vm6, %v1832_v31, %v1861_v61  ;;  %v2530_v31 = vld [vmem:[%s3641_s11 + $0x8] sm:$0xff] }
0x1912   :  { %v1896_v41 = vsel %vm245_vm10, %v1880_v50, 0.0 }
0x1915   :  { %v1865_v22 = vpop.permute.xlu1 %1864  ;;  %v1835_v24 = vld [vmem:[#allocation3 + $0x38] sm:$0xff] }
0x192b   :  { %1888 = vadd.xlane.f32.xlu0 %v1887_v1 }
0x194b   :  { %v1863_v20 = vpop.permute.xlu2 %1862 }
0x195b   :  { %v1853_v2 = vpop.permute.xlu0 %1852 }
0x195c   :  { %v1876_v58 = vsel %vm983_vm6, %v1828_v4, %v1853_v2 }
0x195d   :  { %v1884_v5 = vsel %vm245_vm10, %v1876_v58, 0.0 }
0x195e   :  { %1885 = vadd.xlane.f32.xlu2 %v1884_v5 }
0x1963   :  { %v1857_v10 = vpop.permute.xlu0 %1856 }
0x1964   :  { %v1878_v13 = vsel %vm983_vm6, %v1830_v12, %v1857_v10 }
0x1965   :  { %v1890_v15 = vsel %vm245_vm10, %v1878_v13, 0.0 }
0x1966   :  { %1891 = vadd.xlane.f32.xlu1 %v1890_v15  ;;  %1894 = vadd.xlane.f32.xlu2 %v1893_v14  ;;  %v2531_v14 = vld [vmem:[%s3641_s11 + $0x10] sm:$0xff] }
0x196b   :  { %v1632_v16 = vpop.permute.xlu0 %1631 }
0x196c   :  { %1635 = vst.msk [vmem:[#allocation3 + $0x28] sm:$0xff] %vm983_vm6, %v1632_v16  ;;  %v2529_v16 = vld [vmem:[%s3641_s11] sm:$0xff] }
0x196e   :  { %1897 = vadd.xlane.f32.xlu2 %v1896_v41 }
0x1973   :  { %v1726_v54 = vpop.permute.xlu0 %1725  ;;  %v1833_v17 = vld [vmem:[#allocation3 + $0x28] sm:$0xff]  ;;  %v1867_v38 = vpop.permute.xlu1 %1866 }
0x1974   :  { %1729 = vst.msk [vmem:[#allocation3 + $0x30] sm:$0xff] %vm983_vm6, %v1726_v54  ;;  %v1881_v43 = vsel %vm983_vm6, %v1833_v17, %v1863_v20  ;;  %v1883_v19 = vsel %vm983_vm6, %v1835_v24, %v1867_v38 }
0x1975   :  { %v1899_v34 = vsel %vm245_vm10, %v1881_v43, 0.0  ;;  %v1905_v25 = vsel %vm245_vm10, %v1883_v19, 0.0 }
0x1976   :  { %1900 = vadd.xlane.f32.xlu0 %v1899_v34 }
0x197b   :  { %v1834_v40 = vld [vmem:[#allocation3 + $0x30] sm:$0xff] }
0x197c   :  { %v1882_v7 = vsel %vm983_vm6, %v1834_v40, %v1865_v22 }
0x197d   :  { %v1902_v42 = vsel %vm245_vm10, %v1882_v7, 0.0 }
0x199e   :  { %v1889_v30 = vpop.xlane.xlu0 %1888 }
0x199f   :  { %v1916_v26 = vmul.f32 %v3458_v3, %v1889_v30 }
0x19a1   :  { %v3461_v35 = vsub.f32 %v1877_v11, %v1916_v26 }
0x19a3   :  { %v1932_v46 = vmul.f32 %v3461_v35, %v3461_v35 }
0x19a5   :  { %v1942_v36 = vsel %vm245_vm10, %v1932_v46, 0.0 }
0x19a6   :  { %1943 = vadd.xlane.f32.xlu0 %v1942_v36 }
0x19ae   :  { %1906 = vadd.xlane.f32.xlu0 %v1905_v25 }
0x19d1   :  { %v1886_v60 = vpop.xlane.xlu2 %1885 }
0x19d2   :  { %v1915_v29 = vmul.f32 %v3458_v3, %v1886_v60 }
0x19d4   :  { %v3469_v47 = vsub.f32 %v1876_v58, %v1915_v29 }
0x19d6   :  { %v1931_v33 = vmul.f32 %v3469_v47, %v3469_v47 }
0x19d8   :  { %v1939_v48 = vsel %vm245_vm10, %v1931_v33, 0.0 }
0x19d9   :  { %v1892_v32 = vpop.xlane.xlu1 %1891  ;;  %1940 = vadd.xlane.f32.xlu2 %v1939_v48  ;;  %v1895_v62 = vpop.xlane.xlu2 %1894 }
0x19da   :  { %v1917_v45 = vmul.f32 %v3458_v3, %v1892_v32  ;;  %v1918_v51 = vmul.f32 %v3458_v3, %v1895_v62 }
0x19dc   :  { %v3475_v49 = vsub.f32 %v1878_v13, %v1917_v45  ;;  %v3481_v53 = vsub.f32 %v1879_v8, %v1918_v51  ;;  %v2532_v13 = vld [vmem:[%s3641_s11 + $0x18] sm:$0xff]  ;;  %v3534_v51 = vld [vmem:[%s3639_s9] ss:$0 sm:$0xff] }
0x19dd   :  { %2147 = vmatpush.bf16.msrb.mxu3 %v2532_v13 }
0x19de   :  { %v1933_v52 = vmul.f32 %v3475_v49, %v3475_v49  ;;  %v1934_v57 = vmul.f32 %v3481_v53, %v3481_v53 }
0x19e0   :  { %v1945_v27 = vsel %vm245_vm10, %v1933_v52, 0.0  ;;  %v1948_v61 = vsel %vm245_vm10, %v1934_v57, 0.0  ;;  %v3542_v57 = vld [vmem:[%s3640_s10] ss:$0 sm:$0xff] }
0x19e1   :  { %1946 = vadd.xlane.f32.xlu1 %v1945_v27  ;;  %1903 = vadd.xlane.f32.xlu2 %v1902_v42  ;;  %v1898_v56 = vpop.xlane.xlu2 %1897 }
0x19e2   :  { %v1919_v37 = vmul.f32 %v3458_v3, %v1898_v56  ;;  %2148 = vmatpush.bf16.msrb.mxu3 %v2531_v14 }
0x19e4   :  { %v3486_v9 = vsub.f32 %v1880_v50, %v1919_v37 }
0x19e6   :  { %v1935_v59 = vmul.f32 %v3486_v9, %v3486_v9  ;;  %2149 = vmatpush.bf16.msrb.mxu3 %v2530_v31 }
0x19e8   :  { %v1951_v39 = vsel %vm245_vm10, %v1935_v59, 0.0 }
0x19e9   :  { %v1901_v63 = vpop.xlane.xlu0 %1900  ;;  %1949 = vadd.xlane.f32.xlu2 %v1948_v61  ;;  %1952 = vadd.xlane.f32.xlu0 %v1951_v39 }
0x19ea   :  { %v1920_v55 = vmul.f32 %v3458_v3, %v1901_v63  ;;  %2150 = vmatpush.bf16.msrb.mxu3 %v2529_v16 }
0x19ec   :  { %v3495_v11 = vsub.f32 %v1881_v43, %v1920_v55 }
0x19ee   :  { %v1936_v1 = vmul.f32 %v3495_v11, %v3495_v11 }
0x19f0   :  { %v1954_v2 = vsel %vm245_vm10, %v1936_v1, 0.0 }
0x19f1   :  { %1955 = vadd.xlane.f32.xlu1 %v1954_v2 }
0x1a19   :  { %v1944_v4 = vpop.xlane.xlu0 %1943 }
0x1a1a   :  { %v1964_v12 = vmul.f32 %v1944_v4, %v3458_v3 }
0x1a1c   :  { %v1972_v15 = vadd.f32 1e-05, %v1964_v12 }
0x1a1e   :  { %2741 = vrsqrt.f32 %v1972_v15  ;;  %vm1995_vm1 = vweird.f32 %v1972_v15 }
0x1a21   :  { %v1907_v58 = vpop.xlane.xlu0 %1906 }
0x1a22   :  { %v1922_v5 = vmul.f32 %v3458_v3, %v1907_v58 }
0x1a24   :  { %v3501_v6 = vsub.f32 %v1883_v19, %v1922_v5  ;;  %v2742_v50 = vpop.eup %2741 }
0x1a25   :  { %v1990_v41 = vmul.f32 %v2742_v50, %v1972_v15  ;;  %vm1996_vm6 = vweird.f32 %v2742_v50 }
0x1a26   :  { %v1938_v8 = vmul.f32 %v3501_v6, %v3501_v6  ;;  %vm1997_vm2 = vmor %vm1995_vm1, %vm1996_vm6 }
0x1a27   :  { %v1991_v54 = vmul.f32 %v2742_v50, %v1990_v41 }
0x1a28   :  { %v1960_v10 = vsel %vm245_vm10, %v1938_v8, 0.0 }
0x1a29   :  { %1961 = vadd.xlane.f32.xlu0 %v1960_v10  ;;  %v1992_v34 = vmul.f32 0.5, %v1991_v54 }
0x1a2b   :  { %v1993_v21 = vsub.f32 1.5, %v1992_v34 }
0x1a2d   :  { %v1994_v46 = vmul.f32 %v2742_v50, %v1993_v21 }
0x1a2f   :  { %v1998_v29 = vsel %vm1997_vm2, %v2742_v50, %v1994_v46 }
0x1a4c   :  { %v1941_v20 = vpop.xlane.xlu2 %1940 }
0x1a4d   :  { %v1963_v17 = vmul.f32 %v1941_v20, %v3458_v3 }
0x1a4f   :  { %v1971_v43 = vadd.f32 1e-05, %v1963_v17 }
0x1a51   :  { %2743 = vrsqrt.f32 %v1971_v43  ;;  %vm1985_vm4 = vweird.f32 %v1971_v43 }
0x1a54   :  { %v1947_v18 = vpop.xlane.xlu1 %1946  ;;  %v1904_v44 = vpop.xlane.xlu2 %1903 }
0x1a55   :  { %v1965_v23 = vmul.f32 %v1947_v18, %v3458_v3  ;;  %v1921_v0 = vmul.f32 %v3458_v3, %v1904_v44 }
0x1a57   :  { %v2744_v28 = vpop.eup %2743  ;;  %v1973_v30 = vadd.f32 1e-05, %v1965_v23  ;;  %v3522_v22 = vsub.f32 %v1882_v7, %v1921_v0  ;;  %v2060_v7 = vmul.f32 %v1998_v29, %v3461_v35 }
0x1a58   :  { %v1980_v26 = vmul.f32 %v2744_v28, %v1971_v43  ;;  %vm1986_vm3 = vweird.f32 %v2744_v28 }
0x1a59   :  { %2745 = vrsqrt.f32 %v1973_v30  ;;  %v1937_v36 = vmul.f32 %v3522_v22, %v3522_v22  ;;  %vm1987_vm5 = vmor %vm1985_vm4, %vm1986_vm3  ;;  %v2072_v59 = vmul.f32 %v3534_v51, %v2060_v7  ;;  %vm2005_vm8 = vweird.f32 %v1973_v30 }
0x1a5a   :  { %v1981_v38 = vmul.f32 %v2744_v28, %v1980_v26 }
0x1a5b   :  { %v1957_v24 = vsel %vm245_vm10, %v1937_v36, 0.0 }
0x1a5c   :  { %v1982_v19 = vmul.f32 0.5, %v1981_v38  ;;  %v1953_v25 = vpop.xlane.xlu0 %1952  ;;  %1958 = vadd.xlane.f32.xlu2 %v1957_v24  ;;  %v1950_v60 = vpop.xlane.xlu2 %1949 }
0x1a5d   :  { %v1967_v33 = vmul.f32 %v1953_v25, %v3458_v3  ;;  %v1966_v48 = vmul.f32 %v1950_v60, %v3458_v3 }
0x1a5e   :  { %v1983_v32 = vsub.f32 1.5, %v1982_v19 }
0x1a5f   :  { %v2746_v62 = vpop.eup %2745  ;;  %v3529_v45 = vadd.f32 1e-05, %v1967_v33  ;;  %v1974_v40 = vadd.f32 1e-05, %v1966_v48 }
0x1a60   :  { %v1984_v52 = vmul.f32 %v2744_v28, %v1983_v32  ;;  %v2000_v27 = vmul.f32 %v2746_v62, %v1973_v30  ;;  %vm2006_vm7 = vweird.f32 %v2746_v62 }
0x1a61   :  { %2747 = vrsqrt.f32 %v3529_v45  ;;  %vm2007_vm9 = vmor %vm2005_vm8, %vm2006_vm7  ;;  %vm2015_vm12 = vweird.f32 %v1974_v40  ;;  %vm2025_vm1 = vweird.f32 %v3529_v45 }
0x1a62   :  { %v1988_v42 = vsel %vm1987_vm5, %v2744_v28, %v1984_v52  ;;  %v2001_v56 = vmul.f32 %v2746_v62, %v2000_v27  ;;  %2749 = vrsqrt.f32 %v1974_v40 }
0x1a63   :  { %v2059_v37 = vmul.f32 %v1988_v42, %v3469_v47  ;;  %v2084_v47 = vadd.f32 %v3542_v57, %v2072_v59  ;;  %v2536_v42 = vld [vmem:[%s3643_s13 + $0x18] sm:$0xff] }
0x1a64   :  { %v2002_v61 = vmul.f32 0.5, %v2001_v56  ;;  %v1956_v35 = vpop.xlane.xlu1 %1955  ;;  %2236 = vmatpush.bf16.msrb.mxu0 %v2536_v42 }
0x1a65   :  { %v2071_v39 = vmul.f32 %v3534_v51, %v2059_v37  ;;  %v1968_v63 = vmul.f32 %v1956_v35, %v3458_v3  ;;  %v2535_v37 = vld [vmem:[%s3643_s13 + $0x10] sm:$0xff]  ;;  %v2534_v35 = vld [vmem:[%s3643_s13 + $0x8] sm:$0xff] }
0x1a66   :  { %v2003_v55 = vsub.f32 1.5, %v2002_v61 }
0x1a67   :  { %v2748_v1 = vpop.eup %2747  ;;  %v2083_v2 = vadd.f32 %v3542_v57, %v2071_v39  ;;  %v1976_v4 = vadd.f32 1e-05, %v1968_v63 }
0x1a68   :  { %v2750_v58 = vpop.eup %2749  ;;  %v2004_v5 = vmul.f32 %v2746_v62, %v2003_v55  ;;  %v2020_v8 = vmul.f32 %v2748_v1, %v3529_v45  ;;  %vm2026_vm15 = vweird.f32 %v2748_v1  ;;  %2237 = vmatpush.bf16.msrb.mxu0 %v2535_v37  ;;  %v2533_v55 = vld [vmem:[%s3643_s13] sm:$0xff] }
0x1a69   :  { %v2010_v10 = vmul.f32 %v2750_v58, %v1974_v40  ;;  %2751 = vrsqrt.f32 %v1976_v4  ;;  %v2091_v12 = vpack.c.bf16 %v2084_v47, %v2083_v2  ;;  %vm2016_vm11 = vweird.f32 %v2750_v58  ;;  %vm2027_vm2 = vmor %vm2025_vm1, %vm2026_vm15 }
0x1a6a   :  { %v2008_v15 = vsel %vm2007_vm9, %v2746_v62, %v2004_v5  ;;  %v2021_v14 = vmul.f32 %v2748_v1, %v2020_v8  ;;  %vm2017_vm13 = vmor %vm2015_vm12, %vm2016_vm11  ;;  %vm2035_vm0 = vweird.f32 %v1976_v4  ;;  %vm2261_vm11 = vcmask 31744  }
0x1a6b   :  { %v2011_v13 = vmul.f32 %v2750_v58, %v2010_v10  ;;  %2477 = vmatmul.msk.bf16.vlgmr.msrb.gmra.mxu3 %vm245_vm10, %v2091_v12  ;;  %v2061_v41 = vmul.f32 %v2008_v15, %v3475_v49 }
0x1a6c   :  { %v2022_v54 = vmul.f32 0.5, %v2021_v14  ;;  %2238 = vmatpush.bf16.msrb.mxu0 %v2534_v35 }
0x1a6d   :  { %v2012_v31 = vmul.f32 0.5, %v2011_v13  ;;  %v2073_v21 = vmul.f32 %v3534_v51, %v2061_v41 }
0x1a6e   :  { %v2023_v23 = vsub.f32 1.5, %v2022_v54 }
0x1a6f   :  { %v2752_v50 = vpop.eup %2751  ;;  %v2013_v16 = vsub.f32 1.5, %v2012_v31  ;;  %v2085_v49 = vadd.f32 %v3542_v57, %v2073_v21 }
0x1a70   :  { %v2030_v20 = vmul.f32 %v2752_v50, %v1976_v4  ;;  %vm2036_vm14 = vweird.f32 %v2752_v50  ;;  %v2024_v46 = vmul.f32 %v2748_v1, %v2023_v23  ;;  %2239 = vmatpush.bf16.msrb.mxu0 %v2533_v55 }
0x1a71   :  { %v2014_v17 = vmul.f32 %v2750_v58, %v2013_v16  ;;  %vm2037_vm6 = vmor %vm2035_vm0, %vm2036_vm14 }
0x1a72   :  { %v2031_v43 = vmul.f32 %v2752_v50, %v2030_v20  ;;  %v2028_v38 = vsel %vm2027_vm2, %v2748_v1, %v2024_v46 }
0x1a73   :  { %v2018_v34 = vsel %vm2017_vm13, %v2750_v58, %v2014_v17  ;;  %v2063_v19 = vmul.f32 %v2028_v38, %v3486_v9 }
0x1a74   :  { %v2062_v18 = vmul.f32 %v2018_v34, %v3481_v53  ;;  %v2032_v44 = vmul.f32 0.5, %v2031_v43 }
0x1a75   :  { %v2075_v60 = vmul.f32 %v3534_v51, %v2063_v19 }
0x1a76   :  { %v2033_v0 = vsub.f32 1.5, %v2032_v44  ;;  %v2074_v28 = vmul.f32 %v3534_v51, %v2062_v18 }
0x1a77   :  { %v2087_v33 = vadd.f32 %v3542_v57, %v2075_v60 }
0x1a78   :  { %v2034_v30 = vmul.f32 %v2752_v50, %v2033_v0  ;;  %v2086_v26 = vadd.f32 %v3542_v57, %v2074_v28 }
0x1a7a   :  { %v2092_v36 = vpack.c.bf16 %v2086_v26, %v2085_v49  ;;  %v2038_v53 = vsel %vm2037_vm6, %v2752_v50, %v2034_v30 }
0x1a7b   :  { %v2064_v24 = vmul.f32 %v2038_v53, %v3495_v11 }
0x1a7c   :  { %2478 = vmatmul.msk.bf16.gmra.mxu3 %vm245_vm10, %v2092_v36 }
0x1a7d   :  { %v2076_v25 = vmul.f32 %v3534_v51, %v2064_v24  ;;  %v2546_v24 = vld [vmem:[%s3644_s14] ss:$0 sm:$0xff] }
0x1a7f   :  { %v2088_v29 = vadd.f32 %v3542_v57, %v2076_v25 }
0x1a81   :  { %v2093_v48 = vpack.c.bf16 %v2088_v29, %v2087_v33 }
0x1a8c   :  { %2479 = vmatmul.msk.bf16.gmra.mxu3 %vm245_vm10, %v2093_v48 }
0x1a9c   :  { %v1962_v32 = vpop.xlane.xlu0 %1961 }
0x1a9d   :  { %v1970_v62 = vmul.f32 %v1962_v32, %v3458_v3 }
0x1a9f   :  { %v1978_v45 = vadd.f32 1e-05, %v1970_v62 }
0x1aa1   :  { %2753 = vrsqrt.f32 %v1978_v45  ;;  %vm2055_vm4 = vweird.f32 %v1978_v45 }
0x1aa7   :  { %v2754_v40 = vpop.eup %2753 }
0x1aa8   :  { %v2050_v11 = vmul.f32 %v2754_v40, %v1978_v45  ;;  %vm2056_vm3 = vweird.f32 %v2754_v40 }
0x1aa9   :  { %vm2057_vm5 = vmor %vm2055_vm4, %vm2056_vm3 }
0x1aaa   :  { %v2051_v7 = vmul.f32 %v2754_v40, %v2050_v11 }
0x1aac   :  { %v2052_v56 = vmul.f32 0.5, %v2051_v7 }
0x1aae   :  { %v2053_v59 = vsub.f32 1.5, %v2052_v56 }
0x1acf   :  { %v1959_v9 = vpop.xlane.xlu2 %1958 }
0x1ad0   :  { %v1969_v52 = vmul.f32 %v1959_v9, %v3458_v3  ;;  %v2054_v3 = vmul.f32 %v2754_v40, %v2053_v59 }
0x1ad2   :  { %v1977_v27 = vadd.f32 1e-05, %v1969_v52  ;;  %v2058_v1 = vsel %vm2057_vm5, %v2754_v40, %v2054_v3 }
0x1ad3   :  { %v2066_v58 = vmul.f32 %v2058_v1, %v3501_v6  ;;  %v2545_v6 = vld [vmem:[%s3642_s12] ss:$0 sm:$0xff] }
0x1ad4   :  { %2755 = vrsqrt.f32 %v1977_v27  ;;  %vm2045_vm8 = vweird.f32 %v1977_v27 }
0x1ad5   :  { %v2078_v10 = vmul.f32 %v3534_v51, %v2066_v58 }
0x1ad7   :  { %v2090_v15 = vadd.f32 %v3542_v57, %v2078_v10 }
0x1ada   :  { %v2756_v61 = vpop.eup %2755 }
0x1adb   :  { %v2040_v39 = vmul.f32 %v2756_v61, %v1977_v27  ;;  %vm2046_vm7 = vweird.f32 %v2756_v61 }
0x1adc   :  { %vm2047_vm9 = vmor %vm2045_vm8, %vm2046_vm7 }
0x1add   :  { %v2041_v63 = vmul.f32 %v2756_v61, %v2040_v39 }
0x1adf   :  { %v2042_v2 = vmul.f32 0.5, %v2041_v63 }
0x1ae1   :  { %v2043_v4 = vsub.f32 1.5, %v2042_v2 }
0x1ae3   :  { %v2044_v47 = vmul.f32 %v2756_v61, %v2043_v4 }
0x1ae5   :  { %v2048_v5 = vsel %vm2047_vm9, %v2756_v61, %v2044_v47 }
0x1ae6   :  { %v2065_v8 = vmul.f32 %v2048_v5, %v3522_v22 }
0x1ae8   :  { %v2077_v12 = vmul.f32 %v3534_v51, %v2065_v8 }
0x1aea   :  { %v2089_v13 = vadd.f32 %v3542_v57, %v2077_v12 }
0x1aec   :  { %v2094_v14 = vpack.c.bf16 %v2090_v15, %v2089_v13 }
0x1aee   :  { %2480 = vmatmul.msk.bf16.gmra.mxu3 %vm245_vm10, %v2094_v14  ;;  %v2152_v31 = vpop.f32.mrf.mxu3 }
0x1aef   :  { %v2153_v50 = vadd.f32 %v2545_v6, %v2152_v31 }
0x1af1   :  { %2757 = vtanh.f32 %v2153_v50 }
0x1af6   :  { %v2154_v16 = vpop.f32.mrf.mxu3 }
0x1af7   :  { %v2155_v41 = vadd.f32 %v2545_v6, %v2154_v16  ;;  %v2758_v22 = vpop.eup %2757 }
0x1af9   :  { %2759 = vtanh.f32 %v2155_v41 }
0x1aff   :  { %v2157_v20 = vpop.f32.mrf.mxu3  ;;  %v2760_v51 = vpop.eup %2759 }
0x1b00   :  { %v2180_v54 = vpack.c.bf16 %v2760_v51, %v2758_v22  ;;  %v2158_v57 = vadd.f32 %v2545_v6, %v2157_v20 }
0x1b02   :  { %2497 = vmatmul.msk.bf16.vlgmr.msrb.gmra.mxu0 %vm245_vm10, %v2180_v54  ;;  %2761 = vtanh.f32 %v2158_v57 }
0x1b07   :  { %v2159_v17 = vpop.f32.mrf.mxu3 }
0x1b08   :  { %v2160_v43 = vadd.f32 %v2545_v6, %v2159_v17  ;;  %v2762_v34 = vpop.eup %2761 }
0x1b0a   :  { %2763 = vtanh.f32 %v2160_v43 }
0x1b0f   :  { %v2162_v18 = vpop.f32.mrf.mxu3 }
0x1b10   :  { %v2764_v44 = vpop.eup %2763  ;;  %v2163_v23 = vadd.f32 %v2545_v6, %v2162_v18 }
0x1b11   :  { %v2181_v21 = vpack.c.bf16 %v2764_v44, %v2762_v34 }
0x1b12   :  { %2765 = vtanh.f32 %v2163_v23 }
0x1b13   :  { %2498 = vmatmul.msk.bf16.gmra.mxu0 %vm245_vm10, %v2181_v21 }
0x1b17   :  { %v2164_v0 = vpop.f32.mrf.mxu3 }
0x1b18   :  { %v2165_v28 = vadd.f32 %v2545_v6, %v2164_v0  ;;  %v2766_v30 = vpop.eup %2765 }
0x1b1a   :  { %2767 = vtanh.f32 %v2165_v28 }
0x1b20   :  { %v2768_v49 = vpop.eup %2767 }
0x1b21   :  { %v2182_v26 = vpack.c.bf16 %v2768_v49, %v2766_v30 }
0x1b23   :  { %2499 = vmatmul.msk.bf16.gmra.mxu0 %vm245_vm10, %v2182_v26 }
0x1b71   :  { %v2167_v46 = vpop.f32.mrf.mxu3 }
0x1b72   :  { %v2168_v36 = vadd.f32 %v2545_v6, %v2167_v46 }
0x1b74   :  { %2769 = vtanh.f32 %v2168_v36 }
0x1b79   :  { %v2169_v53 = vpop.f32.mrf.mxu3 }
0x1b7a   :  { %v2170_v38 = vadd.f32 %v2545_v6, %v2169_v53  ;;  %v2770_v25 = vpop.eup %2769 }
0x1b7c   :  { %2771 = vtanh.f32 %v2170_v38 }
0x1b7f   :  { %v2241_v19 = vpop.f32.mrf.mxu0 }
0x1b80   :  { %v2242_v60 = vadd.f32 %v2546_v24, %v2241_v19 }
0x1b82   :  { %v2772_v29 = vpop.eup %2771  ;;  %2262 = vst.msk [vmem:[%s3645_s15] sm:$0xff] %vm2261_vm11, %v2242_v60 }
0x1b83   :  { %v2183_v33 = vpack.c.bf16 %v2772_v29, %v2770_v25 }
0x1b85   :  { %2500 = vmatmul.msk.bf16.gmra.mxu0 %vm245_vm10, %v2183_v33 }
0x1b87   :  { %v2243_v48 = vpop.f32.mrf.mxu0 }
0x1b88   :  { %v2244_v32 = vadd.f32 %v2546_v24, %v2243_v48 }
0x1b8a   :  { %2263 = vst.msk [vmem:[%s3645_s15 + $0x8] sm:$0xff] %vm2261_vm11, %v2244_v32 }
0x1b90   :  { %v2246_v62 = vpop.f32.mrf.mxu0 }
0x1b91   :  { %v2247_v45 = vadd.f32 %v2546_v24, %v2246_v62 }
0x1b93   :  { %2264 = vst.msk [vmem:[%s3645_s15 + $0x10] sm:$0xff] %vm2261_vm11, %v2247_v45 }
0x1b98   :  { %v2248_v40 = vpop.f32.mrf.mxu0 }
0x1b99   :  { %v2249_v11 = vadd.f32 %v2546_v24, %v2248_v40 }
0x1b9b   :  { %2265 = vst.msk [vmem:[%s3645_s15 + $0x18] sm:$0xff] %vm2261_vm11, %v2249_v11 }
0x1ba0   :  { %v2251_v7 = vpop.f32.mrf.mxu0 }
0x1ba1   :  { %v2252_v9 = vadd.f32 %v2546_v24, %v2251_v7 }
0x1ba3   :  { %2266 = vst.msk [vmem:[%s3645_s15 + $0x20] sm:$0xff] %vm2261_vm11, %v2252_v9 }
0x1ba8   :  { %v2253_v52 = vpop.f32.mrf.mxu0 }
0x1ba9   :  { %v2254_v27 = vadd.f32 %v2546_v24, %v2253_v52 }
0x1bab   :  { %2267 = vst.msk [vmem:[%s3645_s15 + $0x28] sm:$0xff] %vm2261_vm11, %v2254_v27 }
0x1c02   :  { %v2256_v42 = vpop.f32.mrf.mxu0 }
0x1c03   :  { %v2257_v56 = vadd.f32 %v2546_v24, %v2256_v42 }
0x1c05   :  { %2268 = vst.msk [vmem:[%s3645_s15 + $0x30] sm:$0xff] %vm2261_vm11, %v2257_v56 }
0x1c0a   :  { %v2258_v37 = vpop.f32.mrf.mxu0 }
0x1c0b   :  { %v2259_v59 = vadd.f32 %v2546_v24, %v2258_v37 }
0x1c0d   :  { %2269 = vst.msk [vmem:[%s3645_s15 + $0x38] sm:$0xff] %vm2261_vm11, %v2259_v59 }

</bundles_post_ra>
